<compile_context>
chip_gen: v6e
topology: v6e:2x2x1
jax: 0.10.0
libtpu: 0.0.40
codegen_flags: <defaults>
</compile_context>

<pallas_src>
import functools

import jax
import jax.numpy as jnp
from jax import lax
from jax.experimental import pallas as pl
from jax.experimental.pallas import tpu as pltpu

EPS = 1e-5  # BatchNorm eps (PyTorch default)


# ---------------------------------------------------------------------------
# Fused Pallas kernel: whole TrumpetAttention forward for one batch element.
# ---------------------------------------------------------------------------
def _trumpet_kernel(*refs, C, H, W, threshold, coef, has_resize):
    if has_resize:
        (x_ref, xT_ref, w_ref, b_ref, masks_ref, mt_ref,
         o_ref, ap_ref, patch_ref) = refs
    else:
        (x_ref, xT_ref, w_ref, b_ref, masks_ref,
         o_ref, ap_ref, patch_ref) = refs
        mt_ref = None

    f32 = jnp.float32
    HW = H * W
    G = 2 * C                       # patch rows per tap (group zero-padded to 2C)
    apw = ap_ref.shape[1]
    pad = (apw - HW) // 2           # zero-halo width (multiple of 128)

    x = x_ref[...]                  # (C, H*W), flattened h*W + w
    xT = xT_ref[...]                # (C, W*H), flattened w*H + h (transposed view)

    # column-border masks: zero out taps that would wrap across row ends
    ml_hw, mr_hw = masks_ref[0:1, :], masks_ref[1:2, :]   # grid (H, W), stride W
    ml_wh, mr_wh = masks_ref[2:3, :], masks_ref[3:4, :]   # grid (W, H), stride H

    # zero the halo scratch once; only its interior rows [0:C) are rewritten,
    # so the halo (and rows [C:2C)) stay zero for every conv.
    ap_ref[...] = jnp.zeros((G, apw), f32)

    taps = [(dy, dx) for dy in (-1, 0, 1) for dx in (-1, 0, 1)]

    def convg(a, wmat, cols, mask_l, mask_r):
        """One channel-group contribution of a 3x3 'same' conv on a
        lane-flattened (rows*cols) image: build the im2col patch matrix in
        VMEM and issue a single MXU matmul (Cout, 9*G) x (9*G, rows*cols)."""
        ap_ref[0:C, pad:pad + HW] = a
        for t, (dy, dx) in enumerate(taps):
            start = pad + dy * cols + dx
            s = ap_ref[0:G, start:start + HW]
            if dx == -1:
                s = s * mask_l
            elif dx == 1:
                s = s * mask_r
            patch_ref[G * t:G * (t + 1), :] = s
        return jnp.dot(wmat, patch_ref[...], preferred_element_type=f32)

    sig_x = jax.nn.sigmoid(x)
    relu_x = jnp.maximum(x, 0.0)

    # ---- horizon branch: spatial grid (H, W) ----
    h = jax.nn.sigmoid(sig_x + relu_x)                               # x_horizon_2
    h = jnp.maximum(convg(h, w_ref[0], W, ml_hw, mr_hw) + b_ref[0], 0.0)
    h = jnp.maximum(convg(h, w_ref[1], W, ml_hw, mr_hw) + b_ref[1], 0.0)
    # F.interpolate(size=(H, W)) is the identity for this branch.
    h4 = (convg(jax.nn.sigmoid(sig_x), w_ref[4], W, ml_hw, mr_hw)    # sigmoid(cat(...))
          + convg(jax.nn.sigmoid(h), w_ref[5], W, ml_hw, mr_hw)      # fused as split-K
          + b_ref[4])

    # ---- vertical branch: computed on the spatially transposed (W, H) grid ----
    v = jnp.maximum(jnp.maximum(xT, 0.0) + jax.nn.sigmoid(xT), 0.0)  # x_vertical_2
    v = jnp.maximum(convg(v, w_ref[2], H, ml_wh, mr_wh) + b_ref[2], 0.0)
    v = jnp.maximum(convg(v, w_ref[3], H, ml_wh, mr_wh) + b_ref[3], 0.0)
    if has_resize:
        # bilinear (W, H) -> (H, W) resize as one matmul with a precomputed
        # kron(Rrow, Rcol) interpolation matrix.
        v = jnp.dot(v, mt_ref[...], preferred_element_type=f32)
    # when H == W, F.interpolate(size=(H, W)) is a no-op and the data stays
    # spatially transposed — exactly matching the PyTorch module.
    v4 = (convg(relu_x, w_ref[6], W, ml_hw, mr_hw)                   # relu(cat(...))
          + convg(jnp.maximum(v, 0.0), w_ref[7], W, ml_hw, mr_hw)    # fused as split-K
          + b_ref[5])

    # ---- fusion + threshold / residual add ----
    fused = (convg(jax.nn.sigmoid(v4), w_ref[8], W, ml_hw, mr_hw)    # sigmoid(cat(...))
             + convg(jax.nn.sigmoid(h4), w_ref[9], W, ml_hw, mr_hw)
             + b_ref[6])
    res = jnp.where(fused < threshold, jnp.zeros_like(fused), fused * coef)
    o_ref[...] = (x + res).astype(o_ref.dtype)


# ---------------------------------------------------------------------------
# Wrapper: weight prep (BN folding, matmul-ready layouts) + pallas_call.
# ---------------------------------------------------------------------------
def _fold_bn(w_oihw, b, gamma, beta, mean, var):
    scale = gamma / jnp.sqrt(var + EPS)
    return w_oihw * scale[:, None, None, None], (b - mean) * scale + beta


def _interp_matrix(out_size, in_size):
    """Row-interpolation matrix for bilinear, align_corners=False."""
    d = jnp.arange(out_size, dtype=jnp.float32)
    s = jnp.maximum((d + 0.5) * (in_size / out_size) - 0.5, 0.0)
    i0 = jnp.minimum(jnp.floor(s).astype(jnp.int32), in_size - 1)
    i1 = jnp.minimum(i0 + 1, in_size - 1)
    lam = s - i0.astype(jnp.float32)
    rows = jnp.arange(out_size)
    R = jnp.zeros((out_size, in_size), jnp.float32)
    R = R.at[rows, i0].add(1.0 - lam)
    R = R.at[rows, i1].add(lam)
    return R


def trumpet_pallas(x_nchw, params, threshold=0.9, coef=0.1):
    B, C, H, W = x_nchw.shape
    HW = H * W
    f32 = jnp.float32
    G = 2 * C

    x_flat = x_nchw.reshape(B, C, HW)
    # TODO(synk): absorb this tiny transposed view of x into the kernel (lane
    # permute) instead of one small XLA transpose in the wrapper.
    xT_flat = jnp.transpose(x_nchw, (0, 1, 3, 2)).reshape(B, C, HW)

    def group_wmat(w_oihw):
        """(Cout, Cin_group=C, 3, 3) -> (Cout, 9*2C) matmul matrix; tap blocks
        are zero-padded from C to 2C rows so every im2col scratch store stays
        sublane-aligned."""
        O, I = w_oihw.shape[0], w_oihw.shape[1]
        wp = jnp.concatenate(
            [w_oihw, jnp.zeros((O, G - I, 3, 3), w_oihw.dtype)], axis=1)
        return jnp.transpose(wp, (0, 2, 3, 1)).reshape(O, 9 * G)

    wmats, biases = [], []
    for name in ("dc_h1", "dc_h2", "dc_v1", "dc_v2"):
        p = params[name]
        w, b = _fold_bn(p["w"], p["b"], *p["bn"])
        wmats.append(group_wmat(w))
        biases.append(b.reshape(C, 1))
    for name in ("conv_h", "conv_v", "conv_f"):
        p = params[name]
        wmats.append(group_wmat(p["w"][:, :C]))   # first half of the channel concat
        wmats.append(group_wmat(p["w"][:, C:]))   # second half (split-K)
        biases.append(p["b"].reshape(C, 1))
    wall = jnp.stack(wmats)     # (10, C, 18C)
    ball = jnp.stack(biases)    # (7, C, 1)

    # column-border masks for both spatial grids (lane position within a row)
    def col_masks(cols):
        cpos = jnp.arange(HW, dtype=jnp.int32) % cols
        return (cpos > 0).astype(f32), (cpos < cols - 1).astype(f32)

    lw, rw = col_masks(W)
    lh, rh = col_masks(H)
    masks = jnp.stack([lw, rw, lh, rh])   # (4, HW)

    has_resize = (H != W)
    inputs = [x_flat, xT_flat, wall, ball, masks]
    in_specs = [
        pl.BlockSpec((None, C, HW), lambda bi: (bi, 0, 0)),
        pl.BlockSpec((None, C, HW), lambda bi: (bi, 0, 0)),
        pl.BlockSpec(wall.shape, lambda bi: (0, 0, 0)),
        pl.BlockSpec(ball.shape, lambda bi: (0, 0, 0)),
        pl.BlockSpec(masks.shape, lambda bi: (0, 0)),
    ]
    if has_resize:
        r_row = _interp_matrix(H, W)   # output rows (H) from input rows (W)
        r_col = _interp_matrix(W, H)   # output cols (W) from input cols (H)
        mt = jnp.kron(r_row, r_col).T  # (W*H, H*W)
        inputs.append(mt)
        in_specs.append(pl.BlockSpec(mt.shape, lambda bi: (0, 0)))

    pad = ((max(H, W) + 1 + 127) // 128) * 128   # 128-aligned zero halo
    apw = HW + 2 * pad

    kernel = functools.partial(_trumpet_kernel, C=C, H=H, W=W,
                               threshold=float(threshold), coef=float(coef),
                               has_resize=has_resize)
    out_flat = pl.pallas_call(
        kernel,
        out_shape=jax.ShapeDtypeStruct((B, C, HW), x_nchw.dtype),
        grid=(B,),
        in_specs=in_specs,
        out_specs=pl.BlockSpec((None, C, HW), lambda bi: (bi, 0, 0)),
        scratch_shapes=[
            pltpu.VMEM((G, apw), jnp.float32),      # zero-halo padded group image
            pltpu.VMEM((9 * G, HW), jnp.float32),   # im2col patch matrix
        ],
        compiler_params=pltpu.CompilerParams(dimension_semantics=("parallel",)),
    )(*inputs)
    return out_flat.reshape(B, C, H, W)


# ---------------------------------------------------------------------------
# Pure-JAX reference (mirrors the PyTorch forward literally, NCHW).
# ---------------------------------------------------------------------------
def _conv_ref(x, p):
    y = lax.conv_general_dilated(x, p["w"], (1, 1), "SAME",
                                 dimension_numbers=("NCHW", "OIHW", "NCHW"))
    return y + p["b"][None, :, None, None]


def _bn_ref(x, bn):
    gamma, beta, mean, var = bn
    inv = gamma / jnp.sqrt(var + EPS)
    return (x - mean[None, :, None, None]) * inv[None, :, None, None] \
        + beta[None, :, None, None]


def _doubleconv_ref(x, p1, p2):
    y = jnp.maximum(_bn_ref(_conv_ref(x, p1), p1["bn"]), 0.0)
    return jnp.maximum(_bn_ref(_conv_ref(y, p2), p2["bn"]), 0.0)


def _bilinear_resize_ref(x, out_h, out_w):
    B, C, H, W = x.shape
    if (H, W) == (out_h, out_w):
        return x
    r_r = _interp_matrix(out_h, H)
    r_c = _interp_matrix(out_w, W)
    return jnp.einsum('oa,bcab,pb->bcop', r_r, x, r_c)


def trumpet_ref(x, params, threshold=0.9, coef=0.1):
    """Returns (out, pre-threshold fusion output)."""
    B, C, H, W = x.shape
    s = jax.nn.sigmoid(x)
    r = jnp.maximum(x, 0.0)

    x_h2 = jax.nn.sigmoid(s + r)
    x_h21 = _doubleconv_ref(x_h2, params["dc_h1"], params["dc_h2"])
    x_h21 = _bilinear_resize_ref(x_h21, H, W)
    x_h3 = jnp.concatenate([s, x_h21], axis=1)
    x_h4 = _conv_ref(jax.nn.sigmoid(x_h3), params["conv_h"])

    x_v2 = jnp.transpose(jnp.maximum(r + s, 0.0), (0, 1, 3, 2))
    x_v21 = _doubleconv_ref(x_v2, params["dc_v1"], params["dc_v2"])
    x_v21 = _bilinear_resize_ref(x_v21, H, W)
    x_v3 = jnp.concatenate([r, x_v21], axis=1)
    x_v4 = _conv_ref(jnp.maximum(x_v3, 0.0), params["conv_v"])

    comb = jnp.concatenate([x_v4, x_h4], axis=1)
    fused = _conv_ref(jax.nn.sigmoid(comb), params["conv_f"])
    res = jnp.where(fused < threshold, 0.0, fused * coef)
    return x + res, fused


# ---------------------------------------------------------------------------
# Deterministic parameter init (shapes from the PyTorch __init__).
# ---------------------------------------------------------------------------
def init_params(key, C):
    keys = list(jax.random.split(key, 24))
    it = iter(keys)

    def conv(cin, cout, with_bn):
        w = 0.1 * jax.random.normal(next(it), (cout, cin, 3, 3), jnp.float32)
        b = 0.1 * jax.random.normal(next(it), (cout,), jnp.float32)
        p = {"w": w, "b": b}
        if with_bn:
            gamma = 1.0 + 0.1 * jax.random.normal(next(it), (cout,), jnp.float32)
            beta = 0.1 * jax.random.normal(next(it), (cout,), jnp.float32)
            mean = jnp.zeros((cout,), jnp.float32)   # inference-mode running stats
            var = jnp.ones((cout,), jnp.float32)
            p["bn"] = (gamma, beta, mean, var)
        return p

    return {
        "dc_h1": conv(C, C, True), "dc_h2": conv(C, C, True),
        "dc_v1": conv(C, C, True), "dc_v2": conv(C, C, True),
        "conv_h": conv(2 * C, C, False),
        "conv_v": conv(2 * C, C, False),
        "conv_f": conv(2 * C, C, False),
    }


# ---------------------------------------------------------------------------
if __name__ == "__main__":
    B, C, H, W = 2, 4, 16, 16
    key = jax.random.PRNGKey(0)
    kx, kp = jax.random.split(key)
    x = jax.random.normal(kx, (B, C, H, W), jnp.float32)
    params = init_params(kp, C)

    fwd = jax.jit(lambda xx: trumpet_pallas(xx, params))
    out = jax.block_until_ready(fwd(x))

    out_ref, fused_ref = trumpet_ref(x, params)
    assert out.shape == (B, C, H, W)

    # Elements whose pre-threshold fusion value sits essentially on the hard
    # 0.9 threshold are excluded from the check: a ~1e-6 numeric difference
    # would flip the where() branch there and is not a kernel bug.
    stable = jnp.abs(fused_ref - 0.9) > 1e-3
    assert float(jnp.mean(stable.astype(jnp.float32))) > 0.99
    ok = jnp.isclose(out, out_ref, atol=2e-4, rtol=2e-4) | (~stable)
    assert bool(jnp.all(ok)), "Pallas output mismatch vs reference"

    print("KERNEL_OK")
</pallas_src>

<mosaic_0001>
module attributes {stable_mosaic.version = 11 : i64} {
  func.func @_trumpet_kernel(%arg0: i32, %arg1: memref<1x4x256xf32, #tpu.memory_space<vmem>>, %arg2: memref<1x4x256xf32, #tpu.memory_space<vmem>>, %arg3: memref<10x4x72xf32, #tpu.memory_space<vmem>>, %arg4: memref<7x4x1xf32, #tpu.memory_space<vmem>>, %arg5: memref<4x256xf32, #tpu.memory_space<vmem>>, %arg6: memref<1x4x256xf32, #tpu.memory_space<vmem>>, %arg7: memref<8x512xf32, #tpu.memory_space<vmem>>, %arg8: memref<72x256xf32, #tpu.memory_space<vmem>>) attributes {dimension_semantics = [#tpu.dimension_semantics<parallel>], iteration_bounds = array<i64: 2>, scalar_prefetch = 0 : i64, scratch_operands = 2 : i64, tpu.core_type = #tpu.core_type<tc>, window_params = [{transform_indices = @transform_0, window_bounds = array<i64: 1, 4, 256>}, {transform_indices = @transform_1, window_bounds = array<i64: 1, 4, 256>}, {pipeline_mode = #tpu.pipeline_mode<synchronous>, transform_indices = @transform_2, window_bounds = array<i64: 10, 4, 72>}, {pipeline_mode = #tpu.pipeline_mode<synchronous>, transform_indices = @transform_3, window_bounds = array<i64: 7, 4, 1>}, {pipeline_mode = #tpu.pipeline_mode<synchronous>, transform_indices = @transform_4, window_bounds = array<i64: 4, 256>}, {transform_indices = @transform_5, window_bounds = array<i64: 1, 4, 256>}]} {
    %c0 = arith.constant 0 : index
    %c0_0 = arith.constant 0 : index
    %c0_1 = arith.constant 0 : index
    %0 = vector.load %arg1[%c0, %c0_0, %c0_1] : memref<1x4x256xf32, #tpu.memory_space<vmem>>, vector<1x4x256xf32>
    %1 = vector.shape_cast %0 : vector<1x4x256xf32> to vector<4x256xf32>
    %c0_2 = arith.constant 0 : index
    %c0_3 = arith.constant 0 : index
    %c0_4 = arith.constant 0 : index
    %2 = vector.load %arg2[%c0_2, %c0_3, %c0_4] : memref<1x4x256xf32, #tpu.memory_space<vmem>>, vector<1x4x256xf32>
    %3 = vector.shape_cast %2 : vector<1x4x256xf32> to vector<4x256xf32>
    %c0_5 = arith.constant 0 : index
    %c0_6 = arith.constant 0 : index
    %4 = vector.load %arg5[%c0_5, %c0_6] : memref<4x256xf32, #tpu.memory_space<vmem>>, vector<1x256xf32>
    %c1 = arith.constant 1 : index
    %c0_7 = arith.constant 0 : index
    %5 = vector.load %arg5[%c1, %c0_7] : memref<4x256xf32, #tpu.memory_space<vmem>>, vector<1x256xf32>
    %c2 = arith.constant 2 : index
    %c0_8 = arith.constant 0 : index
    %6 = vector.load %arg5[%c2, %c0_8] : memref<4x256xf32, #tpu.memory_space<vmem>>, vector<1x256xf32>
    %c3 = arith.constant 3 : index
    %c0_9 = arith.constant 0 : index
    %7 = vector.load %arg5[%c3, %c0_9] : memref<4x256xf32, #tpu.memory_space<vmem>>, vector<1x256xf32>
    %cst = arith.constant 0.000000e+00 : f32
    %8 = vector.broadcast %cst : f32 to vector<8x512xf32>
    %c0_10 = arith.constant 0 : index
    %c0_11 = arith.constant 0 : index
    %9 = vector.load %arg7[%c0_10, %c0_11] : memref<8x512xf32, #tpu.memory_space<vmem>>, vector<8x512xf32>
    tpu.vector_store %arg7[%c0_10, %c0_11], %8 {strides = array<i32>} : memref<8x512xf32, #tpu.memory_space<vmem>>, vector<8x512xf32>,
    %10 = arith.negf %1 : vector<4x256xf32>
    %11 = math.exp %10 : vector<4x256xf32>
    %cst_12 = arith.constant 1.000000e+00 : f32
    %12 = vector.broadcast %cst_12 : f32 to vector<4x256xf32>
    %13 = arith.addf %12, %11 : vector<4x256xf32>
    %14 = arith.divf %12, %13 : vector<4x256xf32>
    %cst_13 = arith.constant 0.000000e+00 : f32
    %15 = vector.broadcast %cst_13 : f32 to vector<4x256xf32>
    %16 = arith.maximumf %1, %15 : vector<4x256xf32>
    %17 = arith.addf %14, %16 : vector<4x256xf32>
    %18 = arith.negf %17 : vector<4x256xf32>
    %19 = math.exp %18 : vector<4x256xf32>
    %cst_14 = arith.constant 1.000000e+00 : f32
    %20 = vector.broadcast %cst_14 : f32 to vector<4x256xf32>
    %21 = arith.addf %20, %19 : vector<4x256xf32>
    %22 = arith.divf %20, %21 : vector<4x256xf32>
    %c0_15 = arith.constant 0 : index
    %c0_16 = arith.constant 0 : index
    %c0_17 = arith.constant 0 : index
    %23 = vector.load %arg3[%c0_15, %c0_16, %c0_17] : memref<10x4x72xf32, #tpu.memory_space<vmem>>, vector<1x4x72xf32>
    %24 = vector.shape_cast %23 : vector<1x4x72xf32> to vector<4x72xf32>
    %c0_18 = arith.constant 0 : index
    %c128 = arith.constant 128 : index
    %25 = vector.load %arg7[%c0_18, %c128] : memref<8x512xf32, #tpu.memory_space<vmem>>, vector<4x256xf32>
    tpu.vector_store %arg7[%c0_18, %c128], %22 {strides = array<i32>} : memref<8x512xf32, #tpu.memory_space<vmem>>, vector<4x256xf32>,
    %c0_19 = arith.constant 0 : index
    %c111 = arith.constant 111 : index
    %26 = vector.load %arg7[%c0_19, %c111] : memref<8x512xf32, #tpu.memory_space<vmem>>, vector<8x256xf32>
    %27 = vector.broadcast %4 : vector<1x256xf32> to vector<8x256xf32>
    %28 = arith.mulf %26, %27 : vector<8x256xf32>
    %c0_20 = arith.constant 0 : index
    %c0_21 = arith.constant 0 : index
    %29 = vector.load %arg8[%c0_20, %c0_21] : memref<72x256xf32, #tpu.memory_space<vmem>>, vector<8x256xf32>
    tpu.vector_store %arg8[%c0_20, %c0_21], %28 {strides = array<i32>} : memref<72x256xf32, #tpu.memory_space<vmem>>, vector<8x256xf32>,
    %c0_22 = arith.constant 0 : index
    %c112 = arith.constant 112 : index
    %30 = vector.load %arg7[%c0_22, %c112] : memref<8x512xf32, #tpu.memory_space<vmem>>, vector<8x256xf32>
    %c8 = arith.constant 8 : index
    %c0_23 = arith.constant 0 : index
    %31 = vector.load %arg8[%c8, %c0_23] : memref<72x256xf32, #tpu.memory_space<vmem>>, vector<8x256xf32>
    tpu.vector_store %arg8[%c8, %c0_23], %30 {strides = array<i32>} : memref<72x256xf32, #tpu.memory_space<vmem>>, vector<8x256xf32>,
    %c0_24 = arith.constant 0 : index
    %c113 = arith.constant 113 : index
    %32 = vector.load %arg7[%c0_24, %c113] : memref<8x512xf32, #tpu.memory_space<vmem>>, vector<8x256xf32>
    %33 = vector.broadcast %5 : vector<1x256xf32> to vector<8x256xf32>
    %34 = arith.mulf %32, %33 : vector<8x256xf32>
    %c16 = arith.constant 16 : index
    %c0_25 = arith.constant 0 : index
    %35 = vector.load %arg8[%c16, %c0_25] : memref<72x256xf32, #tpu.memory_space<vmem>>, vector<8x256xf32>
    tpu.vector_store %arg8[%c16, %c0_25], %34 {strides = array<i32>} : memref<72x256xf32, #tpu.memory_space<vmem>>, vector<8x256xf32>,
    %c0_26 = arith.constant 0 : index
    %c127 = arith.constant 127 : index
    %36 = vector.load %arg7[%c0_26, %c127] : memref<8x512xf32, #tpu.memory_space<vmem>>, vector<8x256xf32>
    %37 = vector.broadcast %4 : vector<1x256xf32> to vector<8x256xf32>
    %38 = arith.mulf %36, %37 : vector<8x256xf32>
    %c24 = arith.constant 24 : index
    %c0_27 = arith.constant 0 : index
    %39 = vector.load %arg8[%c24, %c0_27] : memref<72x256xf32, #tpu.memory_space<vmem>>, vector<8x256xf32>
    tpu.vector_store %arg8[%c24, %c0_27], %38 {strides = array<i32>} : memref<72x256xf32, #tpu.memory_space<vmem>>, vector<8x256xf32>,
    %c0_28 = arith.constant 0 : index
    %c128_29 = arith.constant 128 : index
    %40 = vector.load %arg7[%c0_28, %c128_29] : memref<8x512xf32, #tpu.memory_space<vmem>>, vector<8x256xf32>
    %c32 = arith.constant 32 : index
    %c0_30 = arith.constant 0 : index
    %41 = vector.load %arg8[%c32, %c0_30] : memref<72x256xf32, #tpu.memory_space<vmem>>, vector<8x256xf32>
    tpu.vector_store %arg8[%c32, %c0_30], %40 {strides = array<i32>} : memref<72x256xf32, #tpu.memory_space<vmem>>, vector<8x256xf32>,
    %c0_31 = arith.constant 0 : index
    %c129 = arith.constant 129 : index
    %42 = vector.load %arg7[%c0_31, %c129] : memref<8x512xf32, #tpu.memory_space<vmem>>, vector<8x256xf32>
    %43 = vector.broadcast %5 : vector<1x256xf32> to vector<8x256xf32>
    %44 = arith.mulf %42, %43 : vector<8x256xf32>
    %c40 = arith.constant 40 : index
    %c0_32 = arith.constant 0 : index
    %45 = vector.load %arg8[%c40, %c0_32] : memref<72x256xf32, #tpu.memory_space<vmem>>, vector<8x256xf32>
    tpu.vector_store %arg8[%c40, %c0_32], %44 {strides = array<i32>} : memref<72x256xf32, #tpu.memory_space<vmem>>, vector<8x256xf32>,
    %c0_33 = arith.constant 0 : index
    %c143 = arith.constant 143 : index
    %46 = vector.load %arg7[%c0_33, %c143] : memref<8x512xf32, #tpu.memory_space<vmem>>, vector<8x256xf32>
    %47 = vector.broadcast %4 : vector<1x256xf32> to vector<8x256xf32>
    %48 = arith.mulf %46, %47 : vector<8x256xf32>
    %c48 = arith.constant 48 : index
    %c0_34 = arith.constant 0 : index
    %49 = vector.load %arg8[%c48, %c0_34] : memref<72x256xf32, #tpu.memory_space<vmem>>, vector<8x256xf32>
    tpu.vector_store %arg8[%c48, %c0_34], %48 {strides = array<i32>} : memref<72x256xf32, #tpu.memory_space<vmem>>, vector<8x256xf32>,
    %c0_35 = arith.constant 0 : index
    %c144 = arith.constant 144 : index
    %50 = vector.load %arg7[%c0_35, %c144] : memref<8x512xf32, #tpu.memory_space<vmem>>, vector<8x256xf32>
    %c56 = arith.constant 56 : index
    %c0_36 = arith.constant 0 : index
    %51 = vector.load %arg8[%c56, %c0_36] : memref<72x256xf32, #tpu.memory_space<vmem>>, vector<8x256xf32>
    tpu.vector_store %arg8[%c56, %c0_36], %50 {strides = array<i32>} : memref<72x256xf32, #tpu.memory_space<vmem>>, vector<8x256xf32>,
    %c0_37 = arith.constant 0 : index
    %c145 = arith.constant 145 : index
    %52 = vector.load %arg7[%c0_37, %c145] : memref<8x512xf32, #tpu.memory_space<vmem>>, vector<8x256xf32>
    %53 = vector.broadcast %5 : vector<1x256xf32> to vector<8x256xf32>
    %54 = arith.mulf %52, %53 : vector<8x256xf32>
    %c64 = arith.constant 64 : index
    %c0_38 = arith.constant 0 : index
    %55 = vector.load %arg8[%c64, %c0_38] : memref<72x256xf32, #tpu.memory_space<vmem>>, vector<8x256xf32>
    tpu.vector_store %arg8[%c64, %c0_38], %54 {strides = array<i32>} : memref<72x256xf32, #tpu.memory_space<vmem>>, vector<8x256xf32>,
    %c0_39 = arith.constant 0 : index
    %c0_40 = arith.constant 0 : index
    %56 = vector.load %arg8[%c0_39, %c0_40] : memref<72x256xf32, #tpu.memory_space<vmem>>, vector<72x256xf32>
    %cst_41 = arith.constant dense<0.000000e+00> : vector<4x256xf32>
    %57 = tpu.matmul %24, %56, %cst_41 {dimension_numbers = #tpu.dot_dimension_numbers<[1], [0], [0], [1], [0, 0, 1, 1], [], []>} : vector<4x72xf32>, vector<72x256xf32>, vector<4x256xf32> -> vector<4x256xf32>
    %c0_42 = arith.constant 0 : index
    %c0_43 = arith.constant 0 : index
    %c0_44 = arith.constant 0 : index
    %58 = vector.load %arg4[%c0_42, %c0_43, %c0_44] : memref<7x4x1xf32, #tpu.memory_space<vmem>>, vector<1x4x1xf32>
    %59 = vector.shape_cast %58 : vector<1x4x1xf32> to vector<4x1xf32>
    %60 = vector.broadcast %59 : vector<4x1xf32> to vector<4x256xf32>
    %61 = arith.addf %57, %60 : vector<4x256xf32>
    %cst_45 = arith.constant 0.000000e+00 : f32
    %62 = vector.broadcast %cst_45 : f32 to vector<4x256xf32>
    %63 = arith.maximumf %61, %62 : vector<4x256xf32>
    %c1_46 = arith.constant 1 : index
    %c0_47 = arith.constant 0 : index
    %c0_48 = arith.constant 0 : index
    %64 = vector.load %arg3[%c1_46, %c0_47, %c0_48] : memref<10x4x72xf32, #tpu.memory_space<vmem>>, vector<1x4x72xf32>
    %65 = vector.shape_cast %64 : vector<1x4x72xf32> to vector<4x72xf32>
    %c0_49 = arith.constant 0 : index
    %c128_50 = arith.constant 128 : index
    %66 = vector.load %arg7[%c0_49, %c128_50] : memref<8x512xf32, #tpu.memory_space<vmem>>, vector<4x256xf32>
    tpu.vector_store %arg7[%c0_49, %c128_50], %63 {strides = array<i32>} : memref<8x512xf32, #tpu.memory_space<vmem>>, vector<4x256xf32>,
    %c0_51 = arith.constant 0 : index
    %c111_52 = arith.constant 111 : index
    %67 = vector.load %arg7[%c0_51, %c111_52] : memref<8x512xf32, #tpu.memory_space<vmem>>, vector<8x256xf32>
    %68 = vector.broadcast %4 : vector<1x256xf32> to vector<8x256xf32>
    %69 = arith.mulf %67, %68 : vector<8x256xf32>
    %c0_53 = arith.constant 0 : index
    %c0_54 = arith.constant 0 : index
    %70 = vector.load %arg8[%c0_53, %c0_54] : memref<72x256xf32, #tpu.memory_space<vmem>>, vector<8x256xf32>
    tpu.vector_store %arg8[%c0_53, %c0_54], %69 {strides = array<i32>} : memref<72x256xf32, #tpu.memory_space<vmem>>, vector<8x256xf32>,
    %c0_55 = arith.constant 0 : index
    %c112_56 = arith.constant 112 : index
    %71 = vector.load %arg7[%c0_55, %c112_56] : memref<8x512xf32, #tpu.memory_space<vmem>>, vector<8x256xf32>
    %c8_57 = arith.constant 8 : index
    %c0_58 = arith.constant 0 : index
    %72 = vector.load %arg8[%c8_57, %c0_58] : memref<72x256xf32, #tpu.memory_space<vmem>>, vector<8x256xf32>
    tpu.vector_store %arg8[%c8_57, %c0_58], %71 {strides = array<i32>} : memref<72x256xf32, #tpu.memory_space<vmem>>, vector<8x256xf32>,
    %c0_59 = arith.constant 0 : index
    %c113_60 = arith.constant 113 : index
    %73 = vector.load %arg7[%c0_59, %c113_60] : memref<8x512xf32, #tpu.memory_space<vmem>>, vector<8x256xf32>
    %74 = vector.broadcast %5 : vector<1x256xf32> to vector<8x256xf32>
    %75 = arith.mulf %73, %74 : vector<8x256xf32>
    %c16_61 = arith.constant 16 : index
    %c0_62 = arith.constant 0 : index
    %76 = vector.load %arg8[%c16_61, %c0_62] : memref<72x256xf32, #tpu.memory_space<vmem>>, vector<8x256xf32>
    tpu.vector_store %arg8[%c16_61, %c0_62], %75 {strides = array<i32>} : memref<72x256xf32, #tpu.memory_space<vmem>>, vector<8x256xf32>,
    %c0_63 = arith.constant 0 : index
    %c127_64 = arith.constant 127 : index
    %77 = vector.load %arg7[%c0_63, %c127_64] : memref<8x512xf32, #tpu.memory_space<vmem>>, vector<8x256xf32>
    %78 = vector.broadcast %4 : vector<1x256xf32> to vector<8x256xf32>
    %79 = arith.mulf %77, %78 : vector<8x256xf32>
    %c24_65 = arith.constant 24 : index
    %c0_66 = arith.constant 0 : index
    %80 = vector.load %arg8[%c24_65, %c0_66] : memref<72x256xf32, #tpu.memory_space<vmem>>, vector<8x256xf32>
    tpu.vector_store %arg8[%c24_65, %c0_66], %79 {strides = array<i32>} : memref<72x256xf32, #tpu.memory_space<vmem>>, vector<8x256xf32>,
    %c0_67 = arith.constant 0 : index
    %c128_68 = arith.constant 128 : index
    %81 = vector.load %arg7[%c0_67, %c128_68] : memref<8x512xf32, #tpu.memory_space<vmem>>, vector<8x256xf32>
    %c32_69 = arith.constant 32 : index
    %c0_70 = arith.constant 0 : index
    %82 = vector.load %arg8[%c32_69, %c0_70] : memref<72x256xf32, #tpu.memory_space<vmem>>, vector<8x256xf32>
    tpu.vector_store %arg8[%c32_69, %c0_70], %81 {strides = array<i32>} : memref<72x256xf32, #tpu.memory_space<vmem>>, vector<8x256xf32>,
    %c0_71 = arith.constant 0 : index
    %c129_72 = arith.constant 129 : index
    %83 = vector.load %arg7[%c0_71, %c129_72] : memref<8x512xf32, #tpu.memory_space<vmem>>, vector<8x256xf32>
    %84 = vector.broadcast %5 : vector<1x256xf32> to vector<8x256xf32>
    %85 = arith.mulf %83, %84 : vector<8x256xf32>
    %c40_73 = arith.constant 40 : index
    %c0_74 = arith.constant 0 : index
    %86 = vector.load %arg8[%c40_73, %c0_74] : memref<72x256xf32, #tpu.memory_space<vmem>>, vector<8x256xf32>
    tpu.vector_store %arg8[%c40_73, %c0_74], %85 {strides = array<i32>} : memref<72x256xf32, #tpu.memory_space<vmem>>, vector<8x256xf32>,
    %c0_75 = arith.constant 0 : index
    %c143_76 = arith.constant 143 : index
    %87 = vector.load %arg7[%c0_75, %c143_76] : memref<8x512xf32, #tpu.memory_space<vmem>>, vector<8x256xf32>
    %88 = vector.broadcast %4 : vector<1x256xf32> to vector<8x256xf32>
    %89 = arith.mulf %87, %88 : vector<8x256xf32>
    %c48_77 = arith.constant 48 : index
    %c0_78 = arith.constant 0 : index
    %90 = vector.load %arg8[%c48_77, %c0_78] : memref<72x256xf32, #tpu.memory_space<vmem>>, vector<8x256xf32>
    tpu.vector_store %arg8[%c48_77, %c0_78], %89 {strides = array<i32>} : memref<72x256xf32, #tpu.memory_space<vmem>>, vector<8x256xf32>,
    %c0_79 = arith.constant 0 : index
    %c144_80 = arith.constant 144 : index
    %91 = vector.load %arg7[%c0_79, %c144_80] : memref<8x512xf32, #tpu.memory_space<vmem>>, vector<8x256xf32>
    %c56_81 = arith.constant 56 : index
    %c0_82 = arith.constant 0 : index
    %92 = vector.load %arg8[%c56_81, %c0_82] : memref<72x256xf32, #tpu.memory_space<vmem>>, vector<8x256xf32>
    tpu.vector_store %arg8[%c56_81, %c0_82], %91 {strides = array<i32>} : memref<72x256xf32, #tpu.memory_space<vmem>>, vector<8x256xf32>,
    %c0_83 = arith.constant 0 : index
    %c145_84 = arith.constant 145 : index
    %93 = vector.load %arg7[%c0_83, %c145_84] : memref<8x512xf32, #tpu.memory_space<vmem>>, vector<8x256xf32>
    %94 = vector.broadcast %5 : vector<1x256xf32> to vector<8x256xf32>
    %95 = arith.mulf %93, %94 : vector<8x256xf32>
    %c64_85 = arith.constant 64 : index
    %c0_86 = arith.constant 0 : index
    %96 = vector.load %arg8[%c64_85, %c0_86] : memref<72x256xf32, #tpu.memory_space<vmem>>, vector<8x256xf32>
    tpu.vector_store %arg8[%c64_85, %c0_86], %95 {strides = array<i32>} : memref<72x256xf32, #tpu.memory_space<vmem>>, vector<8x256xf32>,
    %c0_87 = arith.constant 0 : index
    %c0_88 = arith.constant 0 : index
    %97 = vector.load %arg8[%c0_87, %c0_88] : memref<72x256xf32, #tpu.memory_space<vmem>>, vector<72x256xf32>
    %cst_89 = arith.constant dense<0.000000e+00> : vector<4x256xf32>
    %98 = tpu.matmul %65, %97, %cst_89 {dimension_numbers = #tpu.dot_dimension_numbers<[1], [0], [0], [1], [0, 0, 1, 1], [], []>} : vector<4x72xf32>, vector<72x256xf32>, vector<4x256xf32> -> vector<4x256xf32>
    %c1_90 = arith.constant 1 : index
    %c0_91 = arith.constant 0 : index
    %c0_92 = arith.constant 0 : index
    %99 = vector.load %arg4[%c1_90, %c0_91, %c0_92] : memref<7x4x1xf32, #tpu.memory_space<vmem>>, vector<1x4x1xf32>
    %100 = vector.shape_cast %99 : vector<1x4x1xf32> to vector<4x1xf32>
    %101 = vector.broadcast %100 : vector<4x1xf32> to vector<4x256xf32>
    %102 = arith.addf %98, %101 : vector<4x256xf32>
    %cst_93 = arith.constant 0.000000e+00 : f32
    %103 = vector.broadcast %cst_93 : f32 to vector<4x256xf32>
    %104 = arith.maximumf %102, %103 : vector<4x256xf32>
    %105 = arith.negf %14 : vector<4x256xf32>
    %106 = math.exp %105 : vector<4x256xf32>
    %cst_94 = arith.constant 1.000000e+00 : f32
    %107 = vector.broadcast %cst_94 : f32 to vector<4x256xf32>
    %108 = arith.addf %107, %106 : vector<4x256xf32>
    %109 = arith.divf %107, %108 : vector<4x256xf32>
    %c4 = arith.constant 4 : index
    %c0_95 = arith.constant 0 : index
    %c0_96 = arith.constant 0 : index
    %110 = vector.load %arg3[%c4, %c0_95, %c0_96] : memref<10x4x72xf32, #tpu.memory_space<vmem>>, vector<1x4x72xf32>
    %111 = vector.shape_cast %110 : vector<1x4x72xf32> to vector<4x72xf32>
    %c0_97 = arith.constant 0 : index
    %c128_98 = arith.constant 128 : index
    %112 = vector.load %arg7[%c0_97, %c128_98] : memref<8x512xf32, #tpu.memory_space<vmem>>, vector<4x256xf32>
    tpu.vector_store %arg7[%c0_97, %c128_98], %109 {strides = array<i32>} : memref<8x512xf32, #tpu.memory_space<vmem>>, vector<4x256xf32>,
    %c0_99 = arith.constant 0 : index
    %c111_100 = arith.constant 111 : index
    %113 = vector.load %arg7[%c0_99, %c111_100] : memref<8x512xf32, #tpu.memory_space<vmem>>, vector<8x256xf32>
    %114 = vector.broadcast %4 : vector<1x256xf32> to vector<8x256xf32>
    %115 = arith.mulf %113, %114 : vector<8x256xf32>
    %c0_101 = arith.constant 0 : index
    %c0_102 = arith.constant 0 : index
    %116 = vector.load %arg8[%c0_101, %c0_102] : memref<72x256xf32, #tpu.memory_space<vmem>>, vector<8x256xf32>
    tpu.vector_store %arg8[%c0_101, %c0_102], %115 {strides = array<i32>} : memref<72x256xf32, #tpu.memory_space<vmem>>, vector<8x256xf32>,
    %c0_103 = arith.constant 0 : index
    %c112_104 = arith.constant 112 : index
    %117 = vector.load %arg7[%c0_103, %c112_104] : memref<8x512xf32, #tpu.memory_space<vmem>>, vector<8x256xf32>
    %c8_105 = arith.constant 8 : index
    %c0_106 = arith.constant 0 : index
    %118 = vector.load %arg8[%c8_105, %c0_106] : memref<72x256xf32, #tpu.memory_space<vmem>>, vector<8x256xf32>
    tpu.vector_store %arg8[%c8_105, %c0_106], %117 {strides = array<i32>} : memref<72x256xf32, #tpu.memory_space<vmem>>, vector<8x256xf32>,
    %c0_107 = arith.constant 0 : index
    %c113_108 = arith.constant 113 : index
    %119 = vector.load %arg7[%c0_107, %c113_108] : memref<8x512xf32, #tpu.memory_space<vmem>>, vector<8x256xf32>
    %120 = vector.broadcast %5 : vector<1x256xf32> to vector<8x256xf32>
    %121 = arith.mulf %119, %120 : vector<8x256xf32>
    %c16_109 = arith.constant 16 : index
    %c0_110 = arith.constant 0 : index
    %122 = vector.load %arg8[%c16_109, %c0_110] : memref<72x256xf32, #tpu.memory_space<vmem>>, vector<8x256xf32>
    tpu.vector_store %arg8[%c16_109, %c0_110], %121 {strides = array<i32>} : memref<72x256xf32, #tpu.memory_space<vmem>>, vector<8x256xf32>,
    %c0_111 = arith.constant 0 : index
    %c127_112 = arith.constant 127 : index
    %123 = vector.load %arg7[%c0_111, %c127_112] : memref<8x512xf32, #tpu.memory_space<vmem>>, vector<8x256xf32>
    %124 = vector.broadcast %4 : vector<1x256xf32> to vector<8x256xf32>
    %125 = arith.mulf %123, %124 : vector<8x256xf32>
    %c24_113 = arith.constant 24 : index
    %c0_114 = arith.constant 0 : index
    %126 = vector.load %arg8[%c24_113, %c0_114] : memref<72x256xf32, #tpu.memory_space<vmem>>, vector<8x256xf32>
    tpu.vector_store %arg8[%c24_113, %c0_114], %125 {strides = array<i32>} : memref<72x256xf32, #tpu.memory_space<vmem>>, vector<8x256xf32>,
    %c0_115 = arith.constant 0 : index
    %c128_116 = arith.constant 128 : index
    %127 = vector.load %arg7[%c0_115, %c128_116] : memref<8x512xf32, #tpu.memory_space<vmem>>, vector<8x256xf32>
    %c32_117 = arith.constant 32 : index
    %c0_118 = arith.constant 0 : index
    %128 = vector.load %arg8[%c32_117, %c0_118] : memref<72x256xf32, #tpu.memory_space<vmem>>, vector<8x256xf32>
    tpu.vector_store %arg8[%c32_117, %c0_118], %127 {strides = array<i32>} : memref<72x256xf32, #tpu.memory_space<vmem>>, vector<8x256xf32>,
    %c0_119 = arith.constant 0 : index
    %c129_120 = arith.constant 129 : index
    %129 = vector.load %arg7[%c0_119, %c129_120] : memref<8x512xf32, #tpu.memory_space<vmem>>, vector<8x256xf32>
    %130 = vector.broadcast %5 : vector<1x256xf32> to vector<8x256xf32>
    %131 = arith.mulf %129, %130 : vector<8x256xf32>
    %c40_121 = arith.constant 40 : index
    %c0_122 = arith.constant 0 : index
    %132 = vector.load %arg8[%c40_121, %c0_122] : memref<72x256xf32, #tpu.memory_space<vmem>>, vector<8x256xf32>
    tpu.vector_store %arg8[%c40_121, %c0_122], %131 {strides = array<i32>} : memref<72x256xf32, #tpu.memory_space<vmem>>, vector<8x256xf32>,
    %c0_123 = arith.constant 0 : index
    %c143_124 = arith.constant 143 : index
    %133 = vector.load %arg7[%c0_123, %c143_124] : memref<8x512xf32, #tpu.memory_space<vmem>>, vector<8x256xf32>
    %134 = vector.broadcast %4 : vector<1x256xf32> to vector<8x256xf32>
    %135 = arith.mulf %133, %134 : vector<8x256xf32>
    %c48_125 = arith.constant 48 : index
    %c0_126 = arith.constant 0 : index
    %136 = vector.load %arg8[%c48_125, %c0_126] : memref<72x256xf32, #tpu.memory_space<vmem>>, vector<8x256xf32>
    tpu.vector_store %arg8[%c48_125, %c0_126], %135 {strides = array<i32>} : memref<72x256xf32, #tpu.memory_space<vmem>>, vector<8x256xf32>,
    %c0_127 = arith.constant 0 : index
    %c144_128 = arith.constant 144 : index
    %137 = vector.load %arg7[%c0_127, %c144_128] : memref<8x512xf32, #tpu.memory_space<vmem>>, vector<8x256xf32>
    %c56_129 = arith.constant 56 : index
    %c0_130 = arith.constant 0 : index
    %138 = vector.load %arg8[%c56_129, %c0_130] : memref<72x256xf32, #tpu.memory_space<vmem>>, vector<8x256xf32>
    tpu.vector_store %arg8[%c56_129, %c0_130], %137 {strides = array<i32>} : memref<72x256xf32, #tpu.memory_space<vmem>>, vector<8x256xf32>,
    %c0_131 = arith.constant 0 : index
    %c145_132 = arith.constant 145 : index
    %139 = vector.load %arg7[%c0_131, %c145_132] : memref<8x512xf32, #tpu.memory_space<vmem>>, vector<8x256xf32>
    %140 = vector.broadcast %5 : vector<1x256xf32> to vector<8x256xf32>
    %141 = arith.mulf %139, %140 : vector<8x256xf32>
    %c64_133 = arith.constant 64 : index
    %c0_134 = arith.constant 0 : index
    %142 = vector.load %arg8[%c64_133, %c0_134] : memref<72x256xf32, #tpu.memory_space<vmem>>, vector<8x256xf32>
    tpu.vector_store %arg8[%c64_133, %c0_134], %141 {strides = array<i32>} : memref<72x256xf32, #tpu.memory_space<vmem>>, vector<8x256xf32>,
    %c0_135 = arith.constant 0 : index
    %c0_136 = arith.constant 0 : index
    %143 = vector.load %arg8[%c0_135, %c0_136] : memref<72x256xf32, #tpu.memory_space<vmem>>, vector<72x256xf32>
    %cst_137 = arith.constant dense<0.000000e+00> : vector<4x256xf32>
    %144 = tpu.matmul %111, %143, %cst_137 {dimension_numbers = #tpu.dot_dimension_numbers<[1], [0], [0], [1], [0, 0, 1, 1], [], []>} : vector<4x72xf32>, vector<72x256xf32>, vector<4x256xf32> -> vector<4x256xf32>
    %145 = arith.negf %104 : vector<4x256xf32>
    %146 = math.exp %145 : vector<4x256xf32>
    %cst_138 = arith.constant 1.000000e+00 : f32
    %147 = vector.broadcast %cst_138 : f32 to vector<4x256xf32>
    %148 = arith.addf %147, %146 : vector<4x256xf32>
    %149 = arith.divf %147, %148 : vector<4x256xf32>
    %c5 = arith.constant 5 : index
    %c0_139 = arith.constant 0 : index
    %c0_140 = arith.constant 0 : index
    %150 = vector.load %arg3[%c5, %c0_139, %c0_140] : memref<10x4x72xf32, #tpu.memory_space<vmem>>, vector<1x4x72xf32>
    %151 = vector.shape_cast %150 : vector<1x4x72xf32> to vector<4x72xf32>
    %c0_141 = arith.constant 0 : index
    %c128_142 = arith.constant 128 : index
    %152 = vector.load %arg7[%c0_141, %c128_142] : memref<8x512xf32, #tpu.memory_space<vmem>>, vector<4x256xf32>
    tpu.vector_store %arg7[%c0_141, %c128_142], %149 {strides = array<i32>} : memref<8x512xf32, #tpu.memory_space<vmem>>, vector<4x256xf32>,
    %c0_143 = arith.constant 0 : index
    %c111_144 = arith.constant 111 : index
    %153 = vector.load %arg7[%c0_143, %c111_144] : memref<8x512xf32, #tpu.memory_space<vmem>>, vector<8x256xf32>
    %154 = vector.broadcast %4 : vector<1x256xf32> to vector<8x256xf32>
    %155 = arith.mulf %153, %154 : vector<8x256xf32>
    %c0_145 = arith.constant 0 : index
    %c0_146 = arith.constant 0 : index
    %156 = vector.load %arg8[%c0_145, %c0_146] : memref<72x256xf32, #tpu.memory_space<vmem>>, vector<8x256xf32>
    tpu.vector_store %arg8[%c0_145, %c0_146], %155 {strides = array<i32>} : memref<72x256xf32, #tpu.memory_space<vmem>>, vector<8x256xf32>,
    %c0_147 = arith.constant 0 : index
    %c112_148 = arith.constant 112 : index
    %157 = vector.load %arg7[%c0_147, %c112_148] : memref<8x512xf32, #tpu.memory_space<vmem>>, vector<8x256xf32>
    %c8_149 = arith.constant 8 : index
    %c0_150 = arith.constant 0 : index
    %158 = vector.load %arg8[%c8_149, %c0_150] : memref<72x256xf32, #tpu.memory_space<vmem>>, vector<8x256xf32>
    tpu.vector_store %arg8[%c8_149, %c0_150], %157 {strides = array<i32>} : memref<72x256xf32, #tpu.memory_space<vmem>>, vector<8x256xf32>,
    %c0_151 = arith.constant 0 : index
    %c113_152 = arith.constant 113 : index
    %159 = vector.load %arg7[%c0_151, %c113_152] : memref<8x512xf32, #tpu.memory_space<vmem>>, vector<8x256xf32>
    %160 = vector.broadcast %5 : vector<1x256xf32> to vector<8x256xf32>
    %161 = arith.mulf %159, %160 : vector<8x256xf32>
    %c16_153 = arith.constant 16 : index
    %c0_154 = arith.constant 0 : index
    %162 = vector.load %arg8[%c16_153, %c0_154] : memref<72x256xf32, #tpu.memory_space<vmem>>, vector<8x256xf32>
    tpu.vector_store %arg8[%c16_153, %c0_154], %161 {strides = array<i32>} : memref<72x256xf32, #tpu.memory_space<vmem>>, vector<8x256xf32>,
    %c0_155 = arith.constant 0 : index
    %c127_156 = arith.constant 127 : index
    %163 = vector.load %arg7[%c0_155, %c127_156] : memref<8x512xf32, #tpu.memory_space<vmem>>, vector<8x256xf32>
    %164 = vector.broadcast %4 : vector<1x256xf32> to vector<8x256xf32>
    %165 = arith.mulf %163, %164 : vector<8x256xf32>
    %c24_157 = arith.constant 24 : index
    %c0_158 = arith.constant 0 : index
    %166 = vector.load %arg8[%c24_157, %c0_158] : memref<72x256xf32, #tpu.memory_space<vmem>>, vector<8x256xf32>
    tpu.vector_store %arg8[%c24_157, %c0_158], %165 {strides = array<i32>} : memref<72x256xf32, #tpu.memory_space<vmem>>, vector<8x256xf32>,
    %c0_159 = arith.constant 0 : index
    %c128_160 = arith.constant 128 : index
    %167 = vector.load %arg7[%c0_159, %c128_160] : memref<8x512xf32, #tpu.memory_space<vmem>>, vector<8x256xf32>
    %c32_161 = arith.constant 32 : index
    %c0_162 = arith.constant 0 : index
    %168 = vector.load %arg8[%c32_161, %c0_162] : memref<72x256xf32, #tpu.memory_space<vmem>>, vector<8x256xf32>
    tpu.vector_store %arg8[%c32_161, %c0_162], %167 {strides = array<i32>} : memref<72x256xf32, #tpu.memory_space<vmem>>, vector<8x256xf32>,
    %c0_163 = arith.constant 0 : index
    %c129_164 = arith.constant 129 : index
    %169 = vector.load %arg7[%c0_163, %c129_164] : memref<8x512xf32, #tpu.memory_space<vmem>>, vector<8x256xf32>
    %170 = vector.broadcast %5 : vector<1x256xf32> to vector<8x256xf32>
    %171 = arith.mulf %169, %170 : vector<8x256xf32>
    %c40_165 = arith.constant 40 : index
    %c0_166 = arith.constant 0 : index
    %172 = vector.load %arg8[%c40_165, %c0_166] : memref<72x256xf32, #tpu.memory_space<vmem>>, vector<8x256xf32>
    tpu.vector_store %arg8[%c40_165, %c0_166], %171 {strides = array<i32>} : memref<72x256xf32, #tpu.memory_space<vmem>>, vector<8x256xf32>,
    %c0_167 = arith.constant 0 : index
    %c143_168 = arith.constant 143 : index
    %173 = vector.load %arg7[%c0_167, %c143_168] : memref<8x512xf32, #tpu.memory_space<vmem>>, vector<8x256xf32>
    %174 = vector.broadcast %4 : vector<1x256xf32> to vector<8x256xf32>
    %175 = arith.mulf %173, %174 : vector<8x256xf32>
    %c48_169 = arith.constant 48 : index
    %c0_170 = arith.constant 0 : index
    %176 = vector.load %arg8[%c48_169, %c0_170] : memref<72x256xf32, #tpu.memory_space<vmem>>, vector<8x256xf32>
    tpu.vector_store %arg8[%c48_169, %c0_170], %175 {strides = array<i32>} : memref<72x256xf32, #tpu.memory_space<vmem>>, vector<8x256xf32>,
    %c0_171 = arith.constant 0 : index
    %c144_172 = arith.constant 144 : index
    %177 = vector.load %arg7[%c0_171, %c144_172] : memref<8x512xf32, #tpu.memory_space<vmem>>, vector<8x256xf32>
    %c56_173 = arith.constant 56 : index
    %c0_174 = arith.constant 0 : index
    %178 = vector.load %arg8[%c56_173, %c0_174] : memref<72x256xf32, #tpu.memory_space<vmem>>, vector<8x256xf32>
    tpu.vector_store %arg8[%c56_173, %c0_174], %177 {strides = array<i32>} : memref<72x256xf32, #tpu.memory_space<vmem>>, vector<8x256xf32>,
    %c0_175 = arith.constant 0 : index
    %c145_176 = arith.constant 145 : index
    %179 = vector.load %arg7[%c0_175, %c145_176] : memref<8x512xf32, #tpu.memory_space<vmem>>, vector<8x256xf32>
    %180 = vector.broadcast %5 : vector<1x256xf32> to vector<8x256xf32>
    %181 = arith.mulf %179, %180 : vector<8x256xf32>
    %c64_177 = arith.constant 64 : index
    %c0_178 = arith.constant 0 : index
    %182 = vector.load %arg8[%c64_177, %c0_178] : memref<72x256xf32, #tpu.memory_space<vmem>>, vector<8x256xf32>
    tpu.vector_store %arg8[%c64_177, %c0_178], %181 {strides = array<i32>} : memref<72x256xf32, #tpu.memory_space<vmem>>, vector<8x256xf32>,
    %c0_179 = arith.constant 0 : index
    %c0_180 = arith.constant 0 : index
    %183 = vector.load %arg8[%c0_179, %c0_180] : memref<72x256xf32, #tpu.memory_space<vmem>>, vector<72x256xf32>
    %cst_181 = arith.constant dense<0.000000e+00> : vector<4x256xf32>
    %184 = tpu.matmul %151, %183, %cst_181 {dimension_numbers = #tpu.dot_dimension_numbers<[1], [0], [0], [1], [0, 0, 1, 1], [], []>} : vector<4x72xf32>, vector<72x256xf32>, vector<4x256xf32> -> vector<4x256xf32>
    %185 = arith.addf %144, %184 : vector<4x256xf32>
    %c4_182 = arith.constant 4 : index
    %c0_183 = arith.constant 0 : index
    %c0_184 = arith.constant 0 : index
    %186 = vector.load %arg4[%c4_182, %c0_183, %c0_184] : memref<7x4x1xf32, #tpu.memory_space<vmem>>, vector<1x4x1xf32>
    %187 = vector.shape_cast %186 : vector<1x4x1xf32> to vector<4x1xf32>
    %188 = vector.broadcast %187 : vector<4x1xf32> to vector<4x256xf32>
    %189 = arith.addf %185, %188 : vector<4x256xf32>
    %cst_185 = arith.constant 0.000000e+00 : f32
    %190 = vector.broadcast %cst_185 : f32 to vector<4x256xf32>
    %191 = arith.maximumf %3, %190 : vector<4x256xf32>
    %192 = arith.negf %3 : vector<4x256xf32>
    %193 = math.exp %192 : vector<4x256xf32>
    %cst_186 = arith.constant 1.000000e+00 : f32
    %194 = vector.broadcast %cst_186 : f32 to vector<4x256xf32>
    %195 = arith.addf %194, %193 : vector<4x256xf32>
    %196 = arith.divf %194, %195 : vector<4x256xf32>
    %197 = arith.addf %191, %196 : vector<4x256xf32>
    %cst_187 = arith.constant 0.000000e+00 : f32
    %198 = vector.broadcast %cst_187 : f32 to vector<4x256xf32>
    %199 = arith.maximumf %197, %198 : vector<4x256xf32>
    %c2_188 = arith.constant 2 : index
    %c0_189 = arith.constant 0 : index
    %c0_190 = arith.constant 0 : index
    %200 = vector.load %arg3[%c2_188, %c0_189, %c0_190] : memref<10x4x72xf32, #tpu.memory_space<vmem>>, vector<1x4x72xf32>
    %201 = vector.shape_cast %200 : vector<1x4x72xf32> to vector<4x72xf32>
    %c0_191 = arith.constant 0 : index
    %c128_192 = arith.constant 128 : index
    %202 = vector.load %arg7[%c0_191, %c128_192] : memref<8x512xf32, #tpu.memory_space<vmem>>, vector<4x256xf32>
    tpu.vector_store %arg7[%c0_191, %c128_192], %199 {strides = array<i32>} : memref<8x512xf32, #tpu.memory_space<vmem>>, vector<4x256xf32>,
    %c0_193 = arith.constant 0 : index
    %c111_194 = arith.constant 111 : index
    %203 = vector.load %arg7[%c0_193, %c111_194] : memref<8x512xf32, #tpu.memory_space<vmem>>, vector<8x256xf32>
    %204 = vector.broadcast %6 : vector<1x256xf32> to vector<8x256xf32>
    %205 = arith.mulf %203, %204 : vector<8x256xf32>
    %c0_195 = arith.constant 0 : index
    %c0_196 = arith.constant 0 : index
    %206 = vector.load %arg8[%c0_195, %c0_196] : memref<72x256xf32, #tpu.memory_space<vmem>>, vector<8x256xf32>
    tpu.vector_store %arg8[%c0_195, %c0_196], %205 {strides = array<i32>} : memref<72x256xf32, #tpu.memory_space<vmem>>, vector<8x256xf32>,
    %c0_197 = arith.constant 0 : index
    %c112_198 = arith.constant 112 : index
    %207 = vector.load %arg7[%c0_197, %c112_198] : memref<8x512xf32, #tpu.memory_space<vmem>>, vector<8x256xf32>
    %c8_199 = arith.constant 8 : index
    %c0_200 = arith.constant 0 : index
    %208 = vector.load %arg8[%c8_199, %c0_200] : memref<72x256xf32, #tpu.memory_space<vmem>>, vector<8x256xf32>
    tpu.vector_store %arg8[%c8_199, %c0_200], %207 {strides = array<i32>} : memref<72x256xf32, #tpu.memory_space<vmem>>, vector<8x256xf32>,
    %c0_201 = arith.constant 0 : index
    %c113_202 = arith.constant 113 : index
    %209 = vector.load %arg7[%c0_201, %c113_202] : memref<8x512xf32, #tpu.memory_space<vmem>>, vector<8x256xf32>
    %210 = vector.broadcast %7 : vector<1x256xf32> to vector<8x256xf32>
    %211 = arith.mulf %209, %210 : vector<8x256xf32>
    %c16_203 = arith.constant 16 : index
    %c0_204 = arith.constant 0 : index
    %212 = vector.load %arg8[%c16_203, %c0_204] : memref<72x256xf32, #tpu.memory_space<vmem>>, vector<8x256xf32>
    tpu.vector_store %arg8[%c16_203, %c0_204], %211 {strides = array<i32>} : memref<72x256xf32, #tpu.memory_space<vmem>>, vector<8x256xf32>,
    %c0_205 = arith.constant 0 : index
    %c127_206 = arith.constant 127 : index
    %213 = vector.load %arg7[%c0_205, %c127_206] : memref<8x512xf32, #tpu.memory_space<vmem>>, vector<8x256xf32>
    %214 = vector.broadcast %6 : vector<1x256xf32> to vector<8x256xf32>
    %215 = arith.mulf %213, %214 : vector<8x256xf32>
    %c24_207 = arith.constant 24 : index
    %c0_208 = arith.constant 0 : index
    %216 = vector.load %arg8[%c24_207, %c0_208] : memref<72x256xf32, #tpu.memory_space<vmem>>, vector<8x256xf32>
    tpu.vector_store %arg8[%c24_207, %c0_208], %215 {strides = array<i32>} : memref<72x256xf32, #tpu.memory_space<vmem>>, vector<8x256xf32>,
    %c0_209 = arith.constant 0 : index
    %c128_210 = arith.constant 128 : index
    %217 = vector.load %arg7[%c0_209, %c128_210] : memref<8x512xf32, #tpu.memory_space<vmem>>, vector<8x256xf32>
    %c32_211 = arith.constant 32 : index
    %c0_212 = arith.constant 0 : index
    %218 = vector.load %arg8[%c32_211, %c0_212] : memref<72x256xf32, #tpu.memory_space<vmem>>, vector<8x256xf32>
    tpu.vector_store %arg8[%c32_211, %c0_212], %217 {strides = array<i32>} : memref<72x256xf32, #tpu.memory_space<vmem>>, vector<8x256xf32>,
    %c0_213 = arith.constant 0 : index
    %c129_214 = arith.constant 129 : index
    %219 = vector.load %arg7[%c0_213, %c129_214] : memref<8x512xf32, #tpu.memory_space<vmem>>, vector<8x256xf32>
    %220 = vector.broadcast %7 : vector<1x256xf32> to vector<8x256xf32>
    %221 = arith.mulf %219, %220 : vector<8x256xf32>
    %c40_215 = arith.constant 40 : index
    %c0_216 = arith.constant 0 : index
    %222 = vector.load %arg8[%c40_215, %c0_216] : memref<72x256xf32, #tpu.memory_space<vmem>>, vector<8x256xf32>
    tpu.vector_store %arg8[%c40_215, %c0_216], %221 {strides = array<i32>} : memref<72x256xf32, #tpu.memory_space<vmem>>, vector<8x256xf32>,
    %c0_217 = arith.constant 0 : index
    %c143_218 = arith.constant 143 : index
    %223 = vector.load %arg7[%c0_217, %c143_218] : memref<8x512xf32, #tpu.memory_space<vmem>>, vector<8x256xf32>
    %224 = vector.broadcast %6 : vector<1x256xf32> to vector<8x256xf32>
    %225 = arith.mulf %223, %224 : vector<8x256xf32>
    %c48_219 = arith.constant 48 : index
    %c0_220 = arith.constant 0 : index
    %226 = vector.load %arg8[%c48_219, %c0_220] : memref<72x256xf32, #tpu.memory_space<vmem>>, vector<8x256xf32>
    tpu.vector_store %arg8[%c48_219, %c0_220], %225 {strides = array<i32>} : memref<72x256xf32, #tpu.memory_space<vmem>>, vector<8x256xf32>,
    %c0_221 = arith.constant 0 : index
    %c144_222 = arith.constant 144 : index
    %227 = vector.load %arg7[%c0_221, %c144_222] : memref<8x512xf32, #tpu.memory_space<vmem>>, vector<8x256xf32>
    %c56_223 = arith.constant 56 : index
    %c0_224 = arith.constant 0 : index
    %228 = vector.load %arg8[%c56_223, %c0_224] : memref<72x256xf32, #tpu.memory_space<vmem>>, vector<8x256xf32>
    tpu.vector_store %arg8[%c56_223, %c0_224], %227 {strides = array<i32>} : memref<72x256xf32, #tpu.memory_space<vmem>>, vector<8x256xf32>,
    %c0_225 = arith.constant 0 : index
    %c145_226 = arith.constant 145 : index
    %229 = vector.load %arg7[%c0_225, %c145_226] : memref<8x512xf32, #tpu.memory_space<vmem>>, vector<8x256xf32>
    %230 = vector.broadcast %7 : vector<1x256xf32> to vector<8x256xf32>
    %231 = arith.mulf %229, %230 : vector<8x256xf32>
    %c64_227 = arith.constant 64 : index
    %c0_228 = arith.constant 0 : index
    %232 = vector.load %arg8[%c64_227, %c0_228] : memref<72x256xf32, #tpu.memory_space<vmem>>, vector<8x256xf32>
    tpu.vector_store %arg8[%c64_227, %c0_228], %231 {strides = array<i32>} : memref<72x256xf32, #tpu.memory_space<vmem>>, vector<8x256xf32>,
    %c0_229 = arith.constant 0 : index
    %c0_230 = arith.constant 0 : index
    %233 = vector.load %arg8[%c0_229, %c0_230] : memref<72x256xf32, #tpu.memory_space<vmem>>, vector<72x256xf32>
    %cst_231 = arith.constant dense<0.000000e+00> : vector<4x256xf32>
    %234 = tpu.matmul %201, %233, %cst_231 {dimension_numbers = #tpu.dot_dimension_numbers<[1], [0], [0], [1], [0, 0, 1, 1], [], []>} : vector<4x72xf32>, vector<72x256xf32>, vector<4x256xf32> -> vector<4x256xf32>
    %c2_232 = arith.constant 2 : index
    %c0_233 = arith.constant 0 : index
    %c0_234 = arith.constant 0 : index
    %235 = vector.load %arg4[%c2_232, %c0_233, %c0_234] : memref<7x4x1xf32, #tpu.memory_space<vmem>>, vector<1x4x1xf32>
    %236 = vector.shape_cast %235 : vector<1x4x1xf32> to vector<4x1xf32>
    %237 = vector.broadcast %236 : vector<4x1xf32> to vector<4x256xf32>
    %238 = arith.addf %234, %237 : vector<4x256xf32>
    %cst_235 = arith.constant 0.000000e+00 : f32
    %239 = vector.broadcast %cst_235 : f32 to vector<4x256xf32>
    %240 = arith.maximumf %238, %239 : vector<4x256xf32>
    %c3_236 = arith.constant 3 : index
    %c0_237 = arith.constant 0 : index
    %c0_238 = arith.constant 0 : index
    %241 = vector.load %arg3[%c3_236, %c0_237, %c0_238] : memref<10x4x72xf32, #tpu.memory_space<vmem>>, vector<1x4x72xf32>
    %242 = vector.shape_cast %241 : vector<1x4x72xf32> to vector<4x72xf32>
    %c0_239 = arith.constant 0 : index
    %c128_240 = arith.constant 128 : index
    %243 = vector.load %arg7[%c0_239, %c128_240] : memref<8x512xf32, #tpu.memory_space<vmem>>, vector<4x256xf32>
    tpu.vector_store %arg7[%c0_239, %c128_240], %240 {strides = array<i32>} : memref<8x512xf32, #tpu.memory_space<vmem>>, vector<4x256xf32>,
    %c0_241 = arith.constant 0 : index
    %c111_242 = arith.constant 111 : index
    %244 = vector.load %arg7[%c0_241, %c111_242] : memref<8x512xf32, #tpu.memory_space<vmem>>, vector<8x256xf32>
    %245 = vector.broadcast %6 : vector<1x256xf32> to vector<8x256xf32>
    %246 = arith.mulf %244, %245 : vector<8x256xf32>
    %c0_243 = arith.constant 0 : index
    %c0_244 = arith.constant 0 : index
    %247 = vector.load %arg8[%c0_243, %c0_244] : memref<72x256xf32, #tpu.memory_space<vmem>>, vector<8x256xf32>
    tpu.vector_store %arg8[%c0_243, %c0_244], %246 {strides = array<i32>} : memref<72x256xf32, #tpu.memory_space<vmem>>, vector<8x256xf32>,
    %c0_245 = arith.constant 0 : index
    %c112_246 = arith.constant 112 : index
    %248 = vector.load %arg7[%c0_245, %c112_246] : memref<8x512xf32, #tpu.memory_space<vmem>>, vector<8x256xf32>
    %c8_247 = arith.constant 8 : index
    %c0_248 = arith.constant 0 : index
    %249 = vector.load %arg8[%c8_247, %c0_248] : memref<72x256xf32, #tpu.memory_space<vmem>>, vector<8x256xf32>
    tpu.vector_store %arg8[%c8_247, %c0_248], %248 {strides = array<i32>} : memref<72x256xf32, #tpu.memory_space<vmem>>, vector<8x256xf32>,
    %c0_249 = arith.constant 0 : index
    %c113_250 = arith.constant 113 : index
    %250 = vector.load %arg7[%c0_249, %c113_250] : memref<8x512xf32, #tpu.memory_space<vmem>>, vector<8x256xf32>
    %251 = vector.broadcast %7 : vector<1x256xf32> to vector<8x256xf32>
    %252 = arith.mulf %250, %251 : vector<8x256xf32>
    %c16_251 = arith.constant 16 : index
    %c0_252 = arith.constant 0 : index
    %253 = vector.load %arg8[%c16_251, %c0_252] : memref<72x256xf32, #tpu.memory_space<vmem>>, vector<8x256xf32>
    tpu.vector_store %arg8[%c16_251, %c0_252], %252 {strides = array<i32>} : memref<72x256xf32, #tpu.memory_space<vmem>>, vector<8x256xf32>,
    %c0_253 = arith.constant 0 : index
    %c127_254 = arith.constant 127 : index
    %254 = vector.load %arg7[%c0_253, %c127_254] : memref<8x512xf32, #tpu.memory_space<vmem>>, vector<8x256xf32>
    %255 = vector.broadcast %6 : vector<1x256xf32> to vector<8x256xf32>
    %256 = arith.mulf %254, %255 : vector<8x256xf32>
    %c24_255 = arith.constant 24 : index
    %c0_256 = arith.constant 0 : index
    %257 = vector.load %arg8[%c24_255, %c0_256] : memref<72x256xf32, #tpu.memory_space<vmem>>, vector<8x256xf32>
    tpu.vector_store %arg8[%c24_255, %c0_256], %256 {strides = array<i32>} : memref<72x256xf32, #tpu.memory_space<vmem>>, vector<8x256xf32>,
    %c0_257 = arith.constant 0 : index
    %c128_258 = arith.constant 128 : index
    %258 = vector.load %arg7[%c0_257, %c128_258] : memref<8x512xf32, #tpu.memory_space<vmem>>, vector<8x256xf32>
    %c32_259 = arith.constant 32 : index
    %c0_260 = arith.constant 0 : index
    %259 = vector.load %arg8[%c32_259, %c0_260] : memref<72x256xf32, #tpu.memory_space<vmem>>, vector<8x256xf32>
    tpu.vector_store %arg8[%c32_259, %c0_260], %258 {strides = array<i32>} : memref<72x256xf32, #tpu.memory_space<vmem>>, vector<8x256xf32>,
    %c0_261 = arith.constant 0 : index
    %c129_262 = arith.constant 129 : index
    %260 = vector.load %arg7[%c0_261, %c129_262] : memref<8x512xf32, #tpu.memory_space<vmem>>, vector<8x256xf32>
    %261 = vector.broadcast %7 : vector<1x256xf32> to vector<8x256xf32>
    %262 = arith.mulf %260, %261 : vector<8x256xf32>
    %c40_263 = arith.constant 40 : index
    %c0_264 = arith.constant 0 : index
    %263 = vector.load %arg8[%c40_263, %c0_264] : memref<72x256xf32, #tpu.memory_space<vmem>>, vector<8x256xf32>
    tpu.vector_store %arg8[%c40_263, %c0_264], %262 {strides = array<i32>} : memref<72x256xf32, #tpu.memory_space<vmem>>, vector<8x256xf32>,
    %c0_265 = arith.constant 0 : index
    %c143_266 = arith.constant 143 : index
    %264 = vector.load %arg7[%c0_265, %c143_266] : memref<8x512xf32, #tpu.memory_space<vmem>>, vector<8x256xf32>
    %265 = vector.broadcast %6 : vector<1x256xf32> to vector<8x256xf32>
    %266 = arith.mulf %264, %265 : vector<8x256xf32>
    %c48_267 = arith.constant 48 : index
    %c0_268 = arith.constant 0 : index
    %267 = vector.load %arg8[%c48_267, %c0_268] : memref<72x256xf32, #tpu.memory_space<vmem>>, vector<8x256xf32>
    tpu.vector_store %arg8[%c48_267, %c0_268], %266 {strides = array<i32>} : memref<72x256xf32, #tpu.memory_space<vmem>>, vector<8x256xf32>,
    %c0_269 = arith.constant 0 : index
    %c144_270 = arith.constant 144 : index
    %268 = vector.load %arg7[%c0_269, %c144_270] : memref<8x512xf32, #tpu.memory_space<vmem>>, vector<8x256xf32>
    %c56_271 = arith.constant 56 : index
    %c0_272 = arith.constant 0 : index
    %269 = vector.load %arg8[%c56_271, %c0_272] : memref<72x256xf32, #tpu.memory_space<vmem>>, vector<8x256xf32>
    tpu.vector_store %arg8[%c56_271, %c0_272], %268 {strides = array<i32>} : memref<72x256xf32, #tpu.memory_space<vmem>>, vector<8x256xf32>,
    %c0_273 = arith.constant 0 : index
    %c145_274 = arith.constant 145 : index
    %270 = vector.load %arg7[%c0_273, %c145_274] : memref<8x512xf32, #tpu.memory_space<vmem>>, vector<8x256xf32>
    %271 = vector.broadcast %7 : vector<1x256xf32> to vector<8x256xf32>
    %272 = arith.mulf %270, %271 : vector<8x256xf32>
    %c64_275 = arith.constant 64 : index
    %c0_276 = arith.constant 0 : index
    %273 = vector.load %arg8[%c64_275, %c0_276] : memref<72x256xf32, #tpu.memory_space<vmem>>, vector<8x256xf32>
    tpu.vector_store %arg8[%c64_275, %c0_276], %272 {strides = array<i32>} : memref<72x256xf32, #tpu.memory_space<vmem>>, vector<8x256xf32>,
    %c0_277 = arith.constant 0 : index
    %c0_278 = arith.constant 0 : index
    %274 = vector.load %arg8[%c0_277, %c0_278] : memref<72x256xf32, #tpu.memory_space<vmem>>, vector<72x256xf32>
    %cst_279 = arith.constant dense<0.000000e+00> : vector<4x256xf32>
    %275 = tpu.matmul %242, %274, %cst_279 {dimension_numbers = #tpu.dot_dimension_numbers<[1], [0], [0], [1], [0, 0, 1, 1], [], []>} : vector<4x72xf32>, vector<72x256xf32>, vector<4x256xf32> -> vector<4x256xf32>
    %c3_280 = arith.constant 3 : index
    %c0_281 = arith.constant 0 : index
    %c0_282 = arith.constant 0 : index
    %276 = vector.load %arg4[%c3_280, %c0_281, %c0_282] : memref<7x4x1xf32, #tpu.memory_space<vmem>>, vector<1x4x1xf32>
    %277 = vector.shape_cast %276 : vector<1x4x1xf32> to vector<4x1xf32>
    %278 = vector.broadcast %277 : vector<4x1xf32> to vector<4x256xf32>
    %279 = arith.addf %275, %278 : vector<4x256xf32>
    %cst_283 = arith.constant 0.000000e+00 : f32
    %280 = vector.broadcast %cst_283 : f32 to vector<4x256xf32>
    %281 = arith.maximumf %279, %280 : vector<4x256xf32>
    %c6 = arith.constant 6 : index
    %c0_284 = arith.constant 0 : index
    %c0_285 = arith.constant 0 : index
    %282 = vector.load %arg3[%c6, %c0_284, %c0_285] : memref<10x4x72xf32, #tpu.memory_space<vmem>>, vector<1x4x72xf32>
    %283 = vector.shape_cast %282 : vector<1x4x72xf32> to vector<4x72xf32>
    %c0_286 = arith.constant 0 : index
    %c128_287 = arith.constant 128 : index
    %284 = vector.load %arg7[%c0_286, %c128_287] : memref<8x512xf32, #tpu.memory_space<vmem>>, vector<4x256xf32>
    tpu.vector_store %arg7[%c0_286, %c128_287], %16 {strides = array<i32>} : memref<8x512xf32, #tpu.memory_space<vmem>>, vector<4x256xf32>,
    %c0_288 = arith.constant 0 : index
    %c111_289 = arith.constant 111 : index
    %285 = vector.load %arg7[%c0_288, %c111_289] : memref<8x512xf32, #tpu.memory_space<vmem>>, vector<8x256xf32>
    %286 = vector.broadcast %4 : vector<1x256xf32> to vector<8x256xf32>
    %287 = arith.mulf %285, %286 : vector<8x256xf32>
    %c0_290 = arith.constant 0 : index
    %c0_291 = arith.constant 0 : index
    %288 = vector.load %arg8[%c0_290, %c0_291] : memref<72x256xf32, #tpu.memory_space<vmem>>, vector<8x256xf32>
    tpu.vector_store %arg8[%c0_290, %c0_291], %287 {strides = array<i32>} : memref<72x256xf32, #tpu.memory_space<vmem>>, vector<8x256xf32>,
    %c0_292 = arith.constant 0 : index
    %c112_293 = arith.constant 112 : index
    %289 = vector.load %arg7[%c0_292, %c112_293] : memref<8x512xf32, #tpu.memory_space<vmem>>, vector<8x256xf32>
    %c8_294 = arith.constant 8 : index
    %c0_295 = arith.constant 0 : index
    %290 = vector.load %arg8[%c8_294, %c0_295] : memref<72x256xf32, #tpu.memory_space<vmem>>, vector<8x256xf32>
    tpu.vector_store %arg8[%c8_294, %c0_295], %289 {strides = array<i32>} : memref<72x256xf32, #tpu.memory_space<vmem>>, vector<8x256xf32>,
    %c0_296 = arith.constant 0 : index
    %c113_297 = arith.constant 113 : index
    %291 = vector.load %arg7[%c0_296, %c113_297] : memref<8x512xf32, #tpu.memory_space<vmem>>, vector<8x256xf32>
    %292 = vector.broadcast %5 : vector<1x256xf32> to vector<8x256xf32>
    %293 = arith.mulf %291, %292 : vector<8x256xf32>
    %c16_298 = arith.constant 16 : index
    %c0_299 = arith.constant 0 : index
    %294 = vector.load %arg8[%c16_298, %c0_299] : memref<72x256xf32, #tpu.memory_space<vmem>>, vector<8x256xf32>
    tpu.vector_store %arg8[%c16_298, %c0_299], %293 {strides = array<i32>} : memref<72x256xf32, #tpu.memory_space<vmem>>, vector<8x256xf32>,
    %c0_300 = arith.constant 0 : index
    %c127_301 = arith.constant 127 : index
    %295 = vector.load %arg7[%c0_300, %c127_301] : memref<8x512xf32, #tpu.memory_space<vmem>>, vector<8x256xf32>
    %296 = vector.broadcast %4 : vector<1x256xf32> to vector<8x256xf32>
    %297 = arith.mulf %295, %296 : vector<8x256xf32>
    %c24_302 = arith.constant 24 : index
    %c0_303 = arith.constant 0 : index
    %298 = vector.load %arg8[%c24_302, %c0_303] : memref<72x256xf32, #tpu.memory_space<vmem>>, vector<8x256xf32>
    tpu.vector_store %arg8[%c24_302, %c0_303], %297 {strides = array<i32>} : memref<72x256xf32, #tpu.memory_space<vmem>>, vector<8x256xf32>,
    %c0_304 = arith.constant 0 : index
    %c128_305 = arith.constant 128 : index
    %299 = vector.load %arg7[%c0_304, %c128_305] : memref<8x512xf32, #tpu.memory_space<vmem>>, vector<8x256xf32>
    %c32_306 = arith.constant 32 : index
    %c0_307 = arith.constant 0 : index
    %300 = vector.load %arg8[%c32_306, %c0_307] : memref<72x256xf32, #tpu.memory_space<vmem>>, vector<8x256xf32>
    tpu.vector_store %arg8[%c32_306, %c0_307], %299 {strides = array<i32>} : memref<72x256xf32, #tpu.memory_space<vmem>>, vector<8x256xf32>,
    %c0_308 = arith.constant 0 : index
    %c129_309 = arith.constant 129 : index
    %301 = vector.load %arg7[%c0_308, %c129_309] : memref<8x512xf32, #tpu.memory_space<vmem>>, vector<8x256xf32>
    %302 = vector.broadcast %5 : vector<1x256xf32> to vector<8x256xf32>
    %303 = arith.mulf %301, %302 : vector<8x256xf32>
    %c40_310 = arith.constant 40 : index
    %c0_311 = arith.constant 0 : index
    %304 = vector.load %arg8[%c40_310, %c0_311] : memref<72x256xf32, #tpu.memory_space<vmem>>, vector<8x256xf32>
    tpu.vector_store %arg8[%c40_310, %c0_311], %303 {strides = array<i32>} : memref<72x256xf32, #tpu.memory_space<vmem>>, vector<8x256xf32>,
    %c0_312 = arith.constant 0 : index
    %c143_313 = arith.constant 143 : index
    %305 = vector.load %arg7[%c0_312, %c143_313] : memref<8x512xf32, #tpu.memory_space<vmem>>, vector<8x256xf32>
    %306 = vector.broadcast %4 : vector<1x256xf32> to vector<8x256xf32>
    %307 = arith.mulf %305, %306 : vector<8x256xf32>
    %c48_314 = arith.constant 48 : index
    %c0_315 = arith.constant 0 : index
    %308 = vector.load %arg8[%c48_314, %c0_315] : memref<72x256xf32, #tpu.memory_space<vmem>>, vector<8x256xf32>
    tpu.vector_store %arg8[%c48_314, %c0_315], %307 {strides = array<i32>} : memref<72x256xf32, #tpu.memory_space<vmem>>, vector<8x256xf32>,
    %c0_316 = arith.constant 0 : index
    %c144_317 = arith.constant 144 : index
    %309 = vector.load %arg7[%c0_316, %c144_317] : memref<8x512xf32, #tpu.memory_space<vmem>>, vector<8x256xf32>
    %c56_318 = arith.constant 56 : index
    %c0_319 = arith.constant 0 : index
    %310 = vector.load %arg8[%c56_318, %c0_319] : memref<72x256xf32, #tpu.memory_space<vmem>>, vector<8x256xf32>
    tpu.vector_store %arg8[%c56_318, %c0_319], %309 {strides = array<i32>} : memref<72x256xf32, #tpu.memory_space<vmem>>, vector<8x256xf32>,
    %c0_320 = arith.constant 0 : index
    %c145_321 = arith.constant 145 : index
    %311 = vector.load %arg7[%c0_320, %c145_321] : memref<8x512xf32, #tpu.memory_space<vmem>>, vector<8x256xf32>
    %312 = vector.broadcast %5 : vector<1x256xf32> to vector<8x256xf32>
    %313 = arith.mulf %311, %312 : vector<8x256xf32>
    %c64_322 = arith.constant 64 : index
    %c0_323 = arith.constant 0 : index
    %314 = vector.load %arg8[%c64_322, %c0_323] : memref<72x256xf32, #tpu.memory_space<vmem>>, vector<8x256xf32>
    tpu.vector_store %arg8[%c64_322, %c0_323], %313 {strides = array<i32>} : memref<72x256xf32, #tpu.memory_space<vmem>>, vector<8x256xf32>,
    %c0_324 = arith.constant 0 : index
    %c0_325 = arith.constant 0 : index
    %315 = vector.load %arg8[%c0_324, %c0_325] : memref<72x256xf32, #tpu.memory_space<vmem>>, vector<72x256xf32>
    %cst_326 = arith.constant dense<0.000000e+00> : vector<4x256xf32>
    %316 = tpu.matmul %283, %315, %cst_326 {dimension_numbers = #tpu.dot_dimension_numbers<[1], [0], [0], [1], [0, 0, 1, 1], [], []>} : vector<4x72xf32>, vector<72x256xf32>, vector<4x256xf32> -> vector<4x256xf32>
    %cst_327 = arith.constant 0.000000e+00 : f32
    %317 = vector.broadcast %cst_327 : f32 to vector<4x256xf32>
    %318 = arith.maximumf %281, %317 : vector<4x256xf32>
    %c7 = arith.constant 7 : index
    %c0_328 = arith.constant 0 : index
    %c0_329 = arith.constant 0 : index
    %319 = vector.load %arg3[%c7, %c0_328, %c0_329] : memref<10x4x72xf32, #tpu.memory_space<vmem>>, vector<1x4x72xf32>
    %320 = vector.shape_cast %319 : vector<1x4x72xf32> to vector<4x72xf32>
    %c0_330 = arith.constant 0 : index
    %c128_331 = arith.constant 128 : index
    %321 = vector.load %arg7[%c0_330, %c128_331] : memref<8x512xf32, #tpu.memory_space<vmem>>, vector<4x256xf32>
    tpu.vector_store %arg7[%c0_330, %c128_331], %318 {strides = array<i32>} : memref<8x512xf32, #tpu.memory_space<vmem>>, vector<4x256xf32>,
    %c0_332 = arith.constant 0 : index
    %c111_333 = arith.constant 111 : index
    %322 = vector.load %arg7[%c0_332, %c111_333] : memref<8x512xf32, #tpu.memory_space<vmem>>, vector<8x256xf32>
    %323 = vector.broadcast %4 : vector<1x256xf32> to vector<8x256xf32>
    %324 = arith.mulf %322, %323 : vector<8x256xf32>
    %c0_334 = arith.constant 0 : index
    %c0_335 = arith.constant 0 : index
    %325 = vector.load %arg8[%c0_334, %c0_335] : memref<72x256xf32, #tpu.memory_space<vmem>>, vector<8x256xf32>
    tpu.vector_store %arg8[%c0_334, %c0_335], %324 {strides = array<i32>} : memref<72x256xf32, #tpu.memory_space<vmem>>, vector<8x256xf32>,
    %c0_336 = arith.constant 0 : index
    %c112_337 = arith.constant 112 : index
    %326 = vector.load %arg7[%c0_336, %c112_337] : memref<8x512xf32, #tpu.memory_space<vmem>>, vector<8x256xf32>
    %c8_338 = arith.constant 8 : index
    %c0_339 = arith.constant 0 : index
    %327 = vector.load %arg8[%c8_338, %c0_339] : memref<72x256xf32, #tpu.memory_space<vmem>>, vector<8x256xf32>
    tpu.vector_store %arg8[%c8_338, %c0_339], %326 {strides = array<i32>} : memref<72x256xf32, #tpu.memory_space<vmem>>, vector<8x256xf32>,
    %c0_340 = arith.constant 0 : index
    %c113_341 = arith.constant 113 : index
    %328 = vector.load %arg7[%c0_340, %c113_341] : memref<8x512xf32, #tpu.memory_space<vmem>>, vector<8x256xf32>
    %329 = vector.broadcast %5 : vector<1x256xf32> to vector<8x256xf32>
    %330 = arith.mulf %328, %329 : vector<8x256xf32>
    %c16_342 = arith.constant 16 : index
    %c0_343 = arith.constant 0 : index
    %331 = vector.load %arg8[%c16_342, %c0_343] : memref<72x256xf32, #tpu.memory_space<vmem>>, vector<8x256xf32>
    tpu.vector_store %arg8[%c16_342, %c0_343], %330 {strides = array<i32>} : memref<72x256xf32, #tpu.memory_space<vmem>>, vector<8x256xf32>,
    %c0_344 = arith.constant 0 : index
    %c127_345 = arith.constant 127 : index
    %332 = vector.load %arg7[%c0_344, %c127_345] : memref<8x512xf32, #tpu.memory_space<vmem>>, vector<8x256xf32>
    %333 = vector.broadcast %4 : vector<1x256xf32> to vector<8x256xf32>
    %334 = arith.mulf %332, %333 : vector<8x256xf32>
    %c24_346 = arith.constant 24 : index
    %c0_347 = arith.constant 0 : index
    %335 = vector.load %arg8[%c24_346, %c0_347] : memref<72x256xf32, #tpu.memory_space<vmem>>, vector<8x256xf32>
    tpu.vector_store %arg8[%c24_346, %c0_347], %334 {strides = array<i32>} : memref<72x256xf32, #tpu.memory_space<vmem>>, vector<8x256xf32>,
    %c0_348 = arith.constant 0 : index
    %c128_349 = arith.constant 128 : index
    %336 = vector.load %arg7[%c0_348, %c128_349] : memref<8x512xf32, #tpu.memory_space<vmem>>, vector<8x256xf32>
    %c32_350 = arith.constant 32 : index
    %c0_351 = arith.constant 0 : index
    %337 = vector.load %arg8[%c32_350, %c0_351] : memref<72x256xf32, #tpu.memory_space<vmem>>, vector<8x256xf32>
    tpu.vector_store %arg8[%c32_350, %c0_351], %336 {strides = array<i32>} : memref<72x256xf32, #tpu.memory_space<vmem>>, vector<8x256xf32>,
    %c0_352 = arith.constant 0 : index
    %c129_353 = arith.constant 129 : index
    %338 = vector.load %arg7[%c0_352, %c129_353] : memref<8x512xf32, #tpu.memory_space<vmem>>, vector<8x256xf32>
    %339 = vector.broadcast %5 : vector<1x256xf32> to vector<8x256xf32>
    %340 = arith.mulf %338, %339 : vector<8x256xf32>
    %c40_354 = arith.constant 40 : index
    %c0_355 = arith.constant 0 : index
    %341 = vector.load %arg8[%c40_354, %c0_355] : memref<72x256xf32, #tpu.memory_space<vmem>>, vector<8x256xf32>
    tpu.vector_store %arg8[%c40_354, %c0_355], %340 {strides = array<i32>} : memref<72x256xf32, #tpu.memory_space<vmem>>, vector<8x256xf32>,
    %c0_356 = arith.constant 0 : index
    %c143_357 = arith.constant 143 : index
    %342 = vector.load %arg7[%c0_356, %c143_357] : memref<8x512xf32, #tpu.memory_space<vmem>>, vector<8x256xf32>
    %343 = vector.broadcast %4 : vector<1x256xf32> to vector<8x256xf32>
    %344 = arith.mulf %342, %343 : vector<8x256xf32>
    %c48_358 = arith.constant 48 : index
    %c0_359 = arith.constant 0 : index
    %345 = vector.load %arg8[%c48_358, %c0_359] : memref<72x256xf32, #tpu.memory_space<vmem>>, vector<8x256xf32>
    tpu.vector_store %arg8[%c48_358, %c0_359], %344 {strides = array<i32>} : memref<72x256xf32, #tpu.memory_space<vmem>>, vector<8x256xf32>,
    %c0_360 = arith.constant 0 : index
    %c144_361 = arith.constant 144 : index
    %346 = vector.load %arg7[%c0_360, %c144_361] : memref<8x512xf32, #tpu.memory_space<vmem>>, vector<8x256xf32>
    %c56_362 = arith.constant 56 : index
    %c0_363 = arith.constant 0 : index
    %347 = vector.load %arg8[%c56_362, %c0_363] : memref<72x256xf32, #tpu.memory_space<vmem>>, vector<8x256xf32>
    tpu.vector_store %arg8[%c56_362, %c0_363], %346 {strides = array<i32>} : memref<72x256xf32, #tpu.memory_space<vmem>>, vector<8x256xf32>,
    %c0_364 = arith.constant 0 : index
    %c145_365 = arith.constant 145 : index
    %348 = vector.load %arg7[%c0_364, %c145_365] : memref<8x512xf32, #tpu.memory_space<vmem>>, vector<8x256xf32>
    %349 = vector.broadcast %5 : vector<1x256xf32> to vector<8x256xf32>
    %350 = arith.mulf %348, %349 : vector<8x256xf32>
    %c64_366 = arith.constant 64 : index
    %c0_367 = arith.constant 0 : index
    %351 = vector.load %arg8[%c64_366, %c0_367] : memref<72x256xf32, #tpu.memory_space<vmem>>, vector<8x256xf32>
    tpu.vector_store %arg8[%c64_366, %c0_367], %350 {strides = array<i32>} : memref<72x256xf32, #tpu.memory_space<vmem>>, vector<8x256xf32>,
    %c0_368 = arith.constant 0 : index
    %c0_369 = arith.constant 0 : index
    %352 = vector.load %arg8[%c0_368, %c0_369] : memref<72x256xf32, #tpu.memory_space<vmem>>, vector<72x256xf32>
    %cst_370 = arith.constant dense<0.000000e+00> : vector<4x256xf32>
    %353 = tpu.matmul %320, %352, %cst_370 {dimension_numbers = #tpu.dot_dimension_numbers<[1], [0], [0], [1], [0, 0, 1, 1], [], []>} : vector<4x72xf32>, vector<72x256xf32>, vector<4x256xf32> -> vector<4x256xf32>
    %354 = arith.addf %316, %353 : vector<4x256xf32>
    %c5_371 = arith.constant 5 : index
    %c0_372 = arith.constant 0 : index
    %c0_373 = arith.constant 0 : index
    %355 = vector.load %arg4[%c5_371, %c0_372, %c0_373] : memref<7x4x1xf32, #tpu.memory_space<vmem>>, vector<1x4x1xf32>
    %356 = vector.shape_cast %355 : vector<1x4x1xf32> to vector<4x1xf32>
    %357 = vector.broadcast %356 : vector<4x1xf32> to vector<4x256xf32>
    %358 = arith.addf %354, %357 : vector<4x256xf32>
    %359 = arith.negf %358 : vector<4x256xf32>
    %360 = math.exp %359 : vector<4x256xf32>
    %cst_374 = arith.constant 1.000000e+00 : f32
    %361 = vector.broadcast %cst_374 : f32 to vector<4x256xf32>
    %362 = arith.addf %361, %360 : vector<4x256xf32>
    %363 = arith.divf %361, %362 : vector<4x256xf32>
    %c8_375 = arith.constant 8 : index
    %c0_376 = arith.constant 0 : index
    %c0_377 = arith.constant 0 : index
    %364 = vector.load %arg3[%c8_375, %c0_376, %c0_377] : memref<10x4x72xf32, #tpu.memory_space<vmem>>, vector<1x4x72xf32>
    %365 = vector.shape_cast %364 : vector<1x4x72xf32> to vector<4x72xf32>
    %c0_378 = arith.constant 0 : index
    %c128_379 = arith.constant 128 : index
    %366 = vector.load %arg7[%c0_378, %c128_379] : memref<8x512xf32, #tpu.memory_space<vmem>>, vector<4x256xf32>
    tpu.vector_store %arg7[%c0_378, %c128_379], %363 {strides = array<i32>} : memref<8x512xf32, #tpu.memory_space<vmem>>, vector<4x256xf32>,
    %c0_380 = arith.constant 0 : index
    %c111_381 = arith.constant 111 : index
    %367 = vector.load %arg7[%c0_380, %c111_381] : memref<8x512xf32, #tpu.memory_space<vmem>>, vector<8x256xf32>
    %368 = vector.broadcast %4 : vector<1x256xf32> to vector<8x256xf32>
    %369 = arith.mulf %367, %368 : vector<8x256xf32>
    %c0_382 = arith.constant 0 : index
    %c0_383 = arith.constant 0 : index
    %370 = vector.load %arg8[%c0_382, %c0_383] : memref<72x256xf32, #tpu.memory_space<vmem>>, vector<8x256xf32>
    tpu.vector_store %arg8[%c0_382, %c0_383], %369 {strides = array<i32>} : memref<72x256xf32, #tpu.memory_space<vmem>>, vector<8x256xf32>,
    %c0_384 = arith.constant 0 : index
    %c112_385 = arith.constant 112 : index
    %371 = vector.load %arg7[%c0_384, %c112_385] : memref<8x512xf32, #tpu.memory_space<vmem>>, vector<8x256xf32>
    %c8_386 = arith.constant 8 : index
    %c0_387 = arith.constant 0 : index
    %372 = vector.load %arg8[%c8_386, %c0_387] : memref<72x256xf32, #tpu.memory_space<vmem>>, vector<8x256xf32>
    tpu.vector_store %arg8[%c8_386, %c0_387], %371 {strides = array<i32>} : memref<72x256xf32, #tpu.memory_space<vmem>>, vector<8x256xf32>,
    %c0_388 = arith.constant 0 : index
    %c113_389 = arith.constant 113 : index
    %373 = vector.load %arg7[%c0_388, %c113_389] : memref<8x512xf32, #tpu.memory_space<vmem>>, vector<8x256xf32>
    %374 = vector.broadcast %5 : vector<1x256xf32> to vector<8x256xf32>
    %375 = arith.mulf %373, %374 : vector<8x256xf32>
    %c16_390 = arith.constant 16 : index
    %c0_391 = arith.constant 0 : index
    %376 = vector.load %arg8[%c16_390, %c0_391] : memref<72x256xf32, #tpu.memory_space<vmem>>, vector<8x256xf32>
    tpu.vector_store %arg8[%c16_390, %c0_391], %375 {strides = array<i32>} : memref<72x256xf32, #tpu.memory_space<vmem>>, vector<8x256xf32>,
    %c0_392 = arith.constant 0 : index
    %c127_393 = arith.constant 127 : index
    %377 = vector.load %arg7[%c0_392, %c127_393] : memref<8x512xf32, #tpu.memory_space<vmem>>, vector<8x256xf32>
    %378 = vector.broadcast %4 : vector<1x256xf32> to vector<8x256xf32>
    %379 = arith.mulf %377, %378 : vector<8x256xf32>
    %c24_394 = arith.constant 24 : index
    %c0_395 = arith.constant 0 : index
    %380 = vector.load %arg8[%c24_394, %c0_395] : memref<72x256xf32, #tpu.memory_space<vmem>>, vector<8x256xf32>
    tpu.vector_store %arg8[%c24_394, %c0_395], %379 {strides = array<i32>} : memref<72x256xf32, #tpu.memory_space<vmem>>, vector<8x256xf32>,
    %c0_396 = arith.constant 0 : index
    %c128_397 = arith.constant 128 : index
    %381 = vector.load %arg7[%c0_396, %c128_397] : memref<8x512xf32, #tpu.memory_space<vmem>>, vector<8x256xf32>
    %c32_398 = arith.constant 32 : index
    %c0_399 = arith.constant 0 : index
    %382 = vector.load %arg8[%c32_398, %c0_399] : memref<72x256xf32, #tpu.memory_space<vmem>>, vector<8x256xf32>
    tpu.vector_store %arg8[%c32_398, %c0_399], %381 {strides = array<i32>} : memref<72x256xf32, #tpu.memory_space<vmem>>, vector<8x256xf32>,
    %c0_400 = arith.constant 0 : index
    %c129_401 = arith.constant 129 : index
    %383 = vector.load %arg7[%c0_400, %c129_401] : memref<8x512xf32, #tpu.memory_space<vmem>>, vector<8x256xf32>
    %384 = vector.broadcast %5 : vector<1x256xf32> to vector<8x256xf32>
    %385 = arith.mulf %383, %384 : vector<8x256xf32>
    %c40_402 = arith.constant 40 : index
    %c0_403 = arith.constant 0 : index
    %386 = vector.load %arg8[%c40_402, %c0_403] : memref<72x256xf32, #tpu.memory_space<vmem>>, vector<8x256xf32>
    tpu.vector_store %arg8[%c40_402, %c0_403], %385 {strides = array<i32>} : memref<72x256xf32, #tpu.memory_space<vmem>>, vector<8x256xf32>,
    %c0_404 = arith.constant 0 : index
    %c143_405 = arith.constant 143 : index
    %387 = vector.load %arg7[%c0_404, %c143_405] : memref<8x512xf32, #tpu.memory_space<vmem>>, vector<8x256xf32>
    %388 = vector.broadcast %4 : vector<1x256xf32> to vector<8x256xf32>
    %389 = arith.mulf %387, %388 : vector<8x256xf32>
    %c48_406 = arith.constant 48 : index
    %c0_407 = arith.constant 0 : index
    %390 = vector.load %arg8[%c48_406, %c0_407] : memref<72x256xf32, #tpu.memory_space<vmem>>, vector<8x256xf32>
    tpu.vector_store %arg8[%c48_406, %c0_407], %389 {strides = array<i32>} : memref<72x256xf32, #tpu.memory_space<vmem>>, vector<8x256xf32>,
    %c0_408 = arith.constant 0 : index
    %c144_409 = arith.constant 144 : index
    %391 = vector.load %arg7[%c0_408, %c144_409] : memref<8x512xf32, #tpu.memory_space<vmem>>, vector<8x256xf32>
    %c56_410 = arith.constant 56 : index
    %c0_411 = arith.constant 0 : index
    %392 = vector.load %arg8[%c56_410, %c0_411] : memref<72x256xf32, #tpu.memory_space<vmem>>, vector<8x256xf32>
    tpu.vector_store %arg8[%c56_410, %c0_411], %391 {strides = array<i32>} : memref<72x256xf32, #tpu.memory_space<vmem>>, vector<8x256xf32>,
    %c0_412 = arith.constant 0 : index
    %c145_413 = arith.constant 145 : index
    %393 = vector.load %arg7[%c0_412, %c145_413] : memref<8x512xf32, #tpu.memory_space<vmem>>, vector<8x256xf32>
    %394 = vector.broadcast %5 : vector<1x256xf32> to vector<8x256xf32>
    %395 = arith.mulf %393, %394 : vector<8x256xf32>
    %c64_414 = arith.constant 64 : index
    %c0_415 = arith.constant 0 : index
    %396 = vector.load %arg8[%c64_414, %c0_415] : memref<72x256xf32, #tpu.memory_space<vmem>>, vector<8x256xf32>
    tpu.vector_store %arg8[%c64_414, %c0_415], %395 {strides = array<i32>} : memref<72x256xf32, #tpu.memory_space<vmem>>, vector<8x256xf32>,
    %c0_416 = arith.constant 0 : index
    %c0_417 = arith.constant 0 : index
    %397 = vector.load %arg8[%c0_416, %c0_417] : memref<72x256xf32, #tpu.memory_space<vmem>>, vector<72x256xf32>
    %cst_418 = arith.constant dense<0.000000e+00> : vector<4x256xf32>
    %398 = tpu.matmul %365, %397, %cst_418 {dimension_numbers = #tpu.dot_dimension_numbers<[1], [0], [0], [1], [0, 0, 1, 1], [], []>} : vector<4x72xf32>, vector<72x256xf32>, vector<4x256xf32> -> vector<4x256xf32>
    %399 = arith.negf %189 : vector<4x256xf32>
    %400 = math.exp %399 : vector<4x256xf32>
    %cst_419 = arith.constant 1.000000e+00 : f32
    %401 = vector.broadcast %cst_419 : f32 to vector<4x256xf32>
    %402 = arith.addf %401, %400 : vector<4x256xf32>
    %403 = arith.divf %401, %402 : vector<4x256xf32>
    %c9 = arith.constant 9 : index
    %c0_420 = arith.constant 0 : index
    %c0_421 = arith.constant 0 : index
    %404 = vector.load %arg3[%c9, %c0_420, %c0_421] : memref<10x4x72xf32, #tpu.memory_space<vmem>>, vector<1x4x72xf32>
    %405 = vector.shape_cast %404 : vector<1x4x72xf32> to vector<4x72xf32>
    %c0_422 = arith.constant 0 : index
    %c128_423 = arith.constant 128 : index
    %406 = vector.load %arg7[%c0_422, %c128_423] : memref<8x512xf32, #tpu.memory_space<vmem>>, vector<4x256xf32>
    tpu.vector_store %arg7[%c0_422, %c128_423], %403 {strides = array<i32>} : memref<8x512xf32, #tpu.memory_space<vmem>>, vector<4x256xf32>,
    %c0_424 = arith.constant 0 : index
    %c111_425 = arith.constant 111 : index
    %407 = vector.load %arg7[%c0_424, %c111_425] : memref<8x512xf32, #tpu.memory_space<vmem>>, vector<8x256xf32>
    %408 = vector.broadcast %4 : vector<1x256xf32> to vector<8x256xf32>
    %409 = arith.mulf %407, %408 : vector<8x256xf32>
    %c0_426 = arith.constant 0 : index
    %c0_427 = arith.constant 0 : index
    %410 = vector.load %arg8[%c0_426, %c0_427] : memref<72x256xf32, #tpu.memory_space<vmem>>, vector<8x256xf32>
    tpu.vector_store %arg8[%c0_426, %c0_427], %409 {strides = array<i32>} : memref<72x256xf32, #tpu.memory_space<vmem>>, vector<8x256xf32>,
    %c0_428 = arith.constant 0 : index
    %c112_429 = arith.constant 112 : index
    %411 = vector.load %arg7[%c0_428, %c112_429] : memref<8x512xf32, #tpu.memory_space<vmem>>, vector<8x256xf32>
    %c8_430 = arith.constant 8 : index
    %c0_431 = arith.constant 0 : index
    %412 = vector.load %arg8[%c8_430, %c0_431] : memref<72x256xf32, #tpu.memory_space<vmem>>, vector<8x256xf32>
    tpu.vector_store %arg8[%c8_430, %c0_431], %411 {strides = array<i32>} : memref<72x256xf32, #tpu.memory_space<vmem>>, vector<8x256xf32>,
    %c0_432 = arith.constant 0 : index
    %c113_433 = arith.constant 113 : index
    %413 = vector.load %arg7[%c0_432, %c113_433] : memref<8x512xf32, #tpu.memory_space<vmem>>, vector<8x256xf32>
    %414 = vector.broadcast %5 : vector<1x256xf32> to vector<8x256xf32>
    %415 = arith.mulf %413, %414 : vector<8x256xf32>
    %c16_434 = arith.constant 16 : index
    %c0_435 = arith.constant 0 : index
    %416 = vector.load %arg8[%c16_434, %c0_435] : memref<72x256xf32, #tpu.memory_space<vmem>>, vector<8x256xf32>
    tpu.vector_store %arg8[%c16_434, %c0_435], %415 {strides = array<i32>} : memref<72x256xf32, #tpu.memory_space<vmem>>, vector<8x256xf32>,
    %c0_436 = arith.constant 0 : index
    %c127_437 = arith.constant 127 : index
    %417 = vector.load %arg7[%c0_436, %c127_437] : memref<8x512xf32, #tpu.memory_space<vmem>>, vector<8x256xf32>
    %418 = vector.broadcast %4 : vector<1x256xf32> to vector<8x256xf32>
    %419 = arith.mulf %417, %418 : vector<8x256xf32>
    %c24_438 = arith.constant 24 : index
    %c0_439 = arith.constant 0 : index
    %420 = vector.load %arg8[%c24_438, %c0_439] : memref<72x256xf32, #tpu.memory_space<vmem>>, vector<8x256xf32>
    tpu.vector_store %arg8[%c24_438, %c0_439], %419 {strides = array<i32>} : memref<72x256xf32, #tpu.memory_space<vmem>>, vector<8x256xf32>,
    %c0_440 = arith.constant 0 : index
    %c128_441 = arith.constant 128 : index
    %421 = vector.load %arg7[%c0_440, %c128_441] : memref<8x512xf32, #tpu.memory_space<vmem>>, vector<8x256xf32>
    %c32_442 = arith.constant 32 : index
    %c0_443 = arith.constant 0 : index
    %422 = vector.load %arg8[%c32_442, %c0_443] : memref<72x256xf32, #tpu.memory_space<vmem>>, vector<8x256xf32>
    tpu.vector_store %arg8[%c32_442, %c0_443], %421 {strides = array<i32>} : memref<72x256xf32, #tpu.memory_space<vmem>>, vector<8x256xf32>,
    %c0_444 = arith.constant 0 : index
    %c129_445 = arith.constant 129 : index
    %423 = vector.load %arg7[%c0_444, %c129_445] : memref<8x512xf32, #tpu.memory_space<vmem>>, vector<8x256xf32>
    %424 = vector.broadcast %5 : vector<1x256xf32> to vector<8x256xf32>
    %425 = arith.mulf %423, %424 : vector<8x256xf32>
    %c40_446 = arith.constant 40 : index
    %c0_447 = arith.constant 0 : index
    %426 = vector.load %arg8[%c40_446, %c0_447] : memref<72x256xf32, #tpu.memory_space<vmem>>, vector<8x256xf32>
    tpu.vector_store %arg8[%c40_446, %c0_447], %425 {strides = array<i32>} : memref<72x256xf32, #tpu.memory_space<vmem>>, vector<8x256xf32>,
    %c0_448 = arith.constant 0 : index
    %c143_449 = arith.constant 143 : index
    %427 = vector.load %arg7[%c0_448, %c143_449] : memref<8x512xf32, #tpu.memory_space<vmem>>, vector<8x256xf32>
    %428 = vector.broadcast %4 : vector<1x256xf32> to vector<8x256xf32>
    %429 = arith.mulf %427, %428 : vector<8x256xf32>
    %c48_450 = arith.constant 48 : index
    %c0_451 = arith.constant 0 : index
    %430 = vector.load %arg8[%c48_450, %c0_451] : memref<72x256xf32, #tpu.memory_space<vmem>>, vector<8x256xf32>
    tpu.vector_store %arg8[%c48_450, %c0_451], %429 {strides = array<i32>} : memref<72x256xf32, #tpu.memory_space<vmem>>, vector<8x256xf32>,
    %c0_452 = arith.constant 0 : index
    %c144_453 = arith.constant 144 : index
    %431 = vector.load %arg7[%c0_452, %c144_453] : memref<8x512xf32, #tpu.memory_space<vmem>>, vector<8x256xf32>
    %c56_454 = arith.constant 56 : index
    %c0_455 = arith.constant 0 : index
    %432 = vector.load %arg8[%c56_454, %c0_455] : memref<72x256xf32, #tpu.memory_space<vmem>>, vector<8x256xf32>
    tpu.vector_store %arg8[%c56_454, %c0_455], %431 {strides = array<i32>} : memref<72x256xf32, #tpu.memory_space<vmem>>, vector<8x256xf32>,
    %c0_456 = arith.constant 0 : index
    %c145_457 = arith.constant 145 : index
    %433 = vector.load %arg7[%c0_456, %c145_457] : memref<8x512xf32, #tpu.memory_space<vmem>>, vector<8x256xf32>
    %434 = vector.broadcast %5 : vector<1x256xf32> to vector<8x256xf32>
    %435 = arith.mulf %433, %434 : vector<8x256xf32>
    %c64_458 = arith.constant 64 : index
    %c0_459 = arith.constant 0 : index
    %436 = vector.load %arg8[%c64_458, %c0_459] : memref<72x256xf32, #tpu.memory_space<vmem>>, vector<8x256xf32>
    tpu.vector_store %arg8[%c64_458, %c0_459], %435 {strides = array<i32>} : memref<72x256xf32, #tpu.memory_space<vmem>>, vector<8x256xf32>,
    %c0_460 = arith.constant 0 : index
    %c0_461 = arith.constant 0 : index
    %437 = vector.load %arg8[%c0_460, %c0_461] : memref<72x256xf32, #tpu.memory_space<vmem>>, vector<72x256xf32>
    %cst_462 = arith.constant dense<0.000000e+00> : vector<4x256xf32>
    %438 = tpu.matmul %405, %437, %cst_462 {dimension_numbers = #tpu.dot_dimension_numbers<[1], [0], [0], [1], [0, 0, 1, 1], [], []>} : vector<4x72xf32>, vector<72x256xf32>, vector<4x256xf32> -> vector<4x256xf32>
    %439 = arith.addf %398, %438 : vector<4x256xf32>
    %c6_463 = arith.constant 6 : index
    %c0_464 = arith.constant 0 : index
    %c0_465 = arith.constant 0 : index
    %440 = vector.load %arg4[%c6_463, %c0_464, %c0_465] : memref<7x4x1xf32, #tpu.memory_space<vmem>>, vector<1x4x1xf32>
    %441 = vector.shape_cast %440 : vector<1x4x1xf32> to vector<4x1xf32>
    %442 = vector.broadcast %441 : vector<4x1xf32> to vector<4x256xf32>
    %443 = arith.addf %439, %442 : vector<4x256xf32>
    %cst_466 = arith.constant 0.899999976 : f32
    %444 = vector.broadcast %cst_466 : f32 to vector<4x256xf32>
    %445 = arith.cmpf olt, %443, %444 : vector<4x256xf32>
    %cst_467 = arith.constant 0.000000e+00 : f32
    %446 = vector.broadcast %cst_467 : f32 to vector<4x256xf32>
    %cst_468 = arith.constant 1.000000e-01 : f32
    %447 = vector.broadcast %cst_468 : f32 to vector<4x256xf32>
    %448 = arith.mulf %443, %447 : vector<4x256xf32>
    %449 = arith.select %445, %446, %448 : vector<4x256xi1>, vector<4x256xf32>
    %450 = arith.addf %1, %449 : vector<4x256xf32>
    %c0_469 = arith.constant 0 : index
    %c0_470 = arith.constant 0 : index
    %c0_471 = arith.constant 0 : index
    %451 = vector.load %arg6[%c0_469, %c0_470, %c0_471] : memref<1x4x256xf32, #tpu.memory_space<vmem>>, vector<1x4x256xf32>
    %452 = vector.shape_cast %451 : vector<1x4x256xf32> to vector<4x256xf32>
    %453 = vector.shape_cast %450 : vector<4x256xf32> to vector<1x4x256xf32>
    tpu.vector_store %arg6[%c0_469, %c0_470, %c0_471], %453 {strides = array<i32>} : memref<1x4x256xf32, #tpu.memory_space<vmem>>, vector<1x4x256xf32>,
    return
  }
  func.func @transform_0(%arg0: i32) -> (i32, i32, i32) {
    %c0_i32 = arith.constant 0 : i32
    %c0_i32_0 = arith.constant 0 : i32
    %c0_i32_1 = arith.constant 0 : i32
    return %arg0, %c0_i32, %c0_i32_0 : i32, i32, i32
  }
  func.func @transform_1(%arg0: i32) -> (i32, i32, i32) {
    %c0_i32 = arith.constant 0 : i32
    %c0_i32_0 = arith.constant 0 : i32
    %c0_i32_1 = arith.constant 0 : i32
    return %arg0, %c0_i32, %c0_i32_0 : i32, i32, i32
  }
  func.func @transform_2(%arg0: i32) -> (i32, i32, i32) {
    %c0_i32 = arith.constant 0 : i32
    %c0_i32_0 = arith.constant 0 : i32
    %c0_i32_1 = arith.constant 0 : i32
    %c0_i32_2 = arith.constant 0 : i32
    return %c0_i32, %c0_i32_0, %c0_i32_1 : i32, i32, i32
  }
  func.func @transform_3(%arg0: i32) -> (i32, i32, i32) {
    %c0_i32 = arith.constant 0 : i32
    %c0_i32_0 = arith.constant 0 : i32
    %c0_i32_1 = arith.constant 0 : i32
    %c0_i32_2 = arith.constant 0 : i32
    return %c0_i32, %c0_i32_0, %c0_i32_1 : i32, i32, i32
  }
  func.func @transform_4(%arg0: i32) -> (i32, i32) {
    %c0_i32 = arith.constant 0 : i32
    %c0_i32_0 = arith.constant 0 : i32
    %c0_i32_1 = arith.constant 0 : i32
    return %c0_i32, %c0_i32_0 : i32, i32
  }
  func.func @transform_5(%arg0: i32) -> (i32, i32, i32) {
    %c0_i32 = arith.constant 0 : i32
    %c0_i32_0 = arith.constant 0 : i32
    %c0_i32_1 = arith.constant 0 : i32
    return %arg0, %c0_i32, %c0_i32_0 : i32, i32, i32
  }
}

</mosaic_0001>

<bundles_post_ra>
// kernel: _lambda_.1
= control target key start
LH: loop header
LB: loop body
LE: loop exit
PB: predicated region body
PF: predicated region fallthrough
CT: control target
= control target key end

     0   :  { %s3433_s18 = smov 0   ;;  %s4672_s0 = inlined_call_operand.vmem [shape: f32[2,4,256], index: 0, kind: input, shape index: {}]   ;;  %s4673_s1 = inlined_call_operand.vmem [shape: f32[2,4,256], index: 1, kind: input, shape index: {}]   ;;  %s4674_s2 = inlined_call_operand.vmem [shape: f32[10,4,72], index: 2, kind: input, shape index: {}]   ;;  %s4675_s3 = inlined_call_operand.vmem [shape: f32[7,4,1], index: 3, kind: input, shape index: {}]   ;;  %s4676_s4 = inlined_call_operand.vmem [shape: f32[4,256], index: 4, kind: input, shape index: {}]   ;;  %s4677_s5 = inlined_call_operand.vmem [shape: f32[2,4,256], index: 5, kind: output, shape index: {}]  }
   0x1 LB: > { %s3238_s19 = sadd.s32 4294967295, %s3391_s18   ;;  %p3242_p0 = scmp.ge.s32.totalorder %s3391_s18, 1  ;;  %s3391_s18 = sphi %s3433_s18, %s15_s18  }
   0x2   : > { %p197_p1 = scmp.lt.s32.totalorder %s3391_s18, 3 }
   0x4   : > { %p198_p2 = pnand %p3242_p0, %p197_p1 }
   0x6   : > { %201 = sbr.rel (%p198_p2) target bundleno = 2419 (0x973), region = 40 }
   0xb   : > { %v282_v0 = vlaneseq  ;;  %v3393_v1 = vmov 0.0   ;;  %v3249_v2 = vld [vmem:[%s4676_s4 + $0x1] ss:$4 sm:$0x3]  ;;  %p230_p3 = scmp.lt.s32.totalorder %s3238_s19, 1  ;;  %s3394_s25 = smov 17  }
   0xc   : > { %255 = vst [vmem:[#allocation2] sm:$0xff] %v3393_v1  ;;  %254 = vst [vmem:[#allocation2 + $0x10] sm:$0xff] %v3393_v1  ;;  %610 = vmatprep.mubr.f32.mxu0 %v3393_v1  ;;  %881 = vmatprep.mubr.f32.mxu1 %v3393_v1  ;;  %v247_v4 = vld [vmem:[%s4676_s4] ss:$4 sm:$0x3]  ;;  %s3395_s26 = smov 15  }
   0xd   : > { %256 = vst [vmem:[#allocation2 + $0x18] sm:$0xff] %v3393_v1  ;;  %v283_v3 = vshrl.u32 %v282_v0, 7  ;;  %s4710_s19 = smov (!%p230_p3, %s3238_s19), 1  ;;  %s3396_s30 = smov 1   ;;  %v3401_v15 = vmov 0   ;;  %vm311_vm0 = vcmask 138240  }
   0xe   : > { %s3458_s24 = sshll.u32 %s4710_s19, 3  ;;  %s3397_s6 = smov 127   ;;  %3310 = vset.pattern.permute.xlu0 %v3401_v15  ;;  %3331 = vset.pattern.permute.xlu1 %v3401_v15  ;;  %vm370_vm1 = vcmask 121856   ;;  %vm401_vm2 = vcmask 7168   ;;  %vm384_vm3 = vcmask 1039360   ;;  %vm353_vm4 = vcmask 924672  }
   0xf   : > { %v3452_v5 = vsub.s32 0, %v283_v3  ;;  %v3454_v6 = vsub.s32 1, %v283_v3  ;;  %s3468_s29 = scalar_lea.vmem %s4672_s0, %s3458_s24  ;;  %s3398_s7 = smov 113   ;;  %vm294_vm5 = vcmask 908288   ;;  %v536_v62 = vld [vmem:[%s4675_s3] sm:$0xf] }
  0x10   : > { %v245_v11 = vld [vmem:[%s3468_s29] sm:$0xff]  ;;  %s3399_s8 = smov 111   ;;  %s3400_s9 = smov 112   ;;  %vm482_vm6 = vcmask 916480   ;;  %vm330_vm7 = vcmask 130048   ;;  %vm542_vm8 = vcmask 588800  }
  0x11   : > { %v344_v7 = vrot.slane %v3249_v2, %v3452_v5  ;;  %v285_v8 = vrot.slane %v247_v4, %v3452_v5  ;;  %v348_v9 = vrot.slane %v3249_v2, %v3454_v6  ;;  %v289_v10 = vrot.slane %v247_v4, %v3454_v6  ;;  %s3402_s10 = smov 16   ;;  %s239_s11 = scalar_lea.vmem %s4673_s1, %s3458_s24 }
  0x12   : > { %v3252_v12 = vmul.f32 -1.442695, %v245_v11  ;;  %v3483_v16 = vmax.f32 %v245_v11, 0.0  ;;  %s244_s19 = scalar_lea.vmem %s4677_s5, %s3458_s24 }
  0x13   : > { %492 = vrot.lane.b32.xlu0 %v344_v7, %s3394_s25  ;;  %444 = vrot.lane.b32.xlu1 %v285_v8, %s3395_s26 }
  0x14   : > { %3342 = vpow2.f32 %v3252_v12 }
  0x17   : > { %494 = vrot.lane.b32.xlu0 %v348_v9, %s3394_s25  ;;  %446 = vrot.lane.b32.xlu1 %v289_v10, %s3395_s26 }
  0x1b   : > { %415 = vrot.lane.b32.xlu0 %v344_v7, %s3396_s30  ;;  %417 = vrot.lane.b32.xlu1 %v348_v9, %s3396_s30 }
  0x1f   : > { %380 = vrot.lane.b32.xlu0 %v285_v8, %s3397_s6  ;;  %382 = vrot.lane.b32.xlu1 %v289_v10, %s3397_s6 }
  0x21   : > { %v3343_v13 = vpop.eup %3342 }
  0x22   : > { %v261_v14 = vadd.f32 1.0, %v3343_v13 }
  0x23   : > { %349 = vrot.lane.b32.xlu0 %v344_v7, %s3398_s7  ;;  %351 = vrot.lane.b32.xlu1 %v348_v9, %s3398_s7 }
  0x24   : > { %3344 = vrcp.f32 %v261_v14 }
  0x27   : > { %290 = vrot.lane.b32.xlu0 %v285_v8, %s3399_s8  ;;  %292 = vrot.lane.b32.xlu1 %v289_v10, %s3399_s8 }
  0x2b   : > { %480 = vrot.lane.b32.xlu0 %v3393_v1, %s3400_s9 }
  0x31   : > { %v3485_v17 = vpop.eup %3344 }
  0x32   : > { %v265_v18 = vadd.f32 %v3485_v17, %v3483_v16 }
  0x34   : > { %v3253_v19 = vmul.f32 -1.442695, %v265_v18 }
  0x36   : > { %3346 = vpow2.f32 %v3253_v19 }
  0x43   : > { %v3347_v20 = vpop.eup %3346 }
  0x44   : > { %v269_v21 = vadd.f32 1.0, %v3347_v20 }
  0x46   : > { %3348 = vrcp.f32 %v269_v21 }
  0x53   : > { %v3349_v22 = vpop.eup %3348 }
  0x54   : > { %276 = vst [vmem:[#allocation2] sm:$0xf] %v3349_v22  ;;  %v274_v23 = vcombine.high %v3349_v22, %v3349_v22 }
  0x56   : > { %277 = vst [vmem:[#allocation2 + $0x18] sm:$0xf] %v274_v23 }
  0x5b   : > { %v3489_v24 = vld [vmem:[#allocation2] sm:$0xff] }
  0x5c   : > { %476 = vrot.lane.b32.xlu1 %v3489_v24, %s3400_s9  ;;  %326 = vrot.lane.b32.xlu0 %v3489_v24, %s3402_s10 }
  0x5d   : > { %v3495_v25 = vld [vmem:[#allocation2 + $0x18] sm:$0xff] }
  0x60   : > { %478 = vrot.lane.b32.xlu1 %v3495_v25, %s3400_s9 }
  0x64   : > { %328 = vrot.lane.b32.xlu1 %v3495_v25, %s3402_s10 }
  0x85   : > { %v3501_v26 = vpop.permute.xlu0 %492  ;;  %v3503_v27 = vpop.permute.xlu1 %444 }
  0x86   : > { %v500_v28 = vmul.f32 %v3501_v26, %v3489_v24  ;;  %v452_v31 = vmul.f32 %v3489_v24, %v3503_v27 }
  0x88   : > { %506 = vrot.lane.b32.xlu0 %v500_v28, %s3399_s8 }
  0x89   : > { %v3508_v29 = vpop.permute.xlu0 %494  ;;  %v3510_v30 = vpop.permute.xlu1 %446 }
  0x8a   : > { %v3515_v32 = vmul.f32 0.0, %v3508_v29  ;;  %v3528_v36 = vmul.f32 0.0, %v3510_v30  ;;  %v3557_v45 = vsel %vm311_vm0, %v3501_v26, %v3508_v29  ;;  %v3569_v48 = vsel %vm370_vm1, %v3503_v27, %v3510_v30 }
  0x8b   : > { %v501_v47 = vmul.f32 %v3557_v45, %v3495_v25  ;;  %4695 = vst [vmem:[#allocation6_spill] sm:$0xff] %v3569_v48  ;;  %v453_v50 = vmul.f32 %v3495_v25, %v3569_v48 }
  0x8c   : > { %458 = vrot.lane.b32.xlu0 %v452_v31, %s3398_s7  ;;  %510 = vrot.lane.b32.xlu1 %v3515_v32, %s3399_s8 }
  0x8d   : > { %v3520_v33 = vpop.permute.xlu0 %415  ;;  %v3522_v34 = vpop.permute.xlu1 %417 }
  0x8e   : > { %v3525_v35 = vmul.f32 0.0, %v3522_v34  ;;  %v423_v40 = vmul.f32 %v3489_v24, %v3520_v33  ;;  %v3574_v49 = vsel %vm401_vm2, %v3520_v33, %v3522_v34 }
  0x8f   : > { %4696 = vst [vmem:[#allocation7_spill] sm:$0xff] %v3574_v49  ;;  %v424_v51 = vmul.f32 %v3495_v25, %v3574_v49 }
  0x90   : > { %433 = vrot.lane.b32.xlu0 %v3525_v35, %s3397_s6  ;;  %462 = vrot.lane.b32.xlu1 %v3528_v36, %s3398_s7 }
  0x91   : > { %v3534_v37 = vpop.permute.xlu0 %380  ;;  %v3536_v38 = vpop.permute.xlu1 %382 }
  0x92   : > { %4693 = vst [vmem:[#allocation4_spill] sm:$0xff] %v3536_v38  ;;  %v3539_v39 = vmul.f32 0.0, %v3534_v37  ;;  %v391_v43 = vmul.f32 %v3495_v25, %v3536_v38  ;;  %v3590_v54 = vsel %vm384_vm3, %v3534_v37, %v3536_v38 }
  0x93   : > { %v390_v57 = vmul.f32 %v3489_v24, %v3590_v54 }
  0x94   : > { %395 = vrot.lane.b32.xlu0 %v3539_v39, %s3396_s30  ;;  %429 = vrot.lane.b32.xlu1 %v423_v40, %s3397_s6 }
  0x95   : > { %v3546_v41 = vpop.permute.xlu1 %351  ;;  %v3552_v44 = vpop.permute.xlu0 %349 }
  0x96   : > { %4694 = vst [vmem:[#allocation5_spill] sm:$0xff] %v3546_v41  ;;  %v360_v42 = vmul.f32 %v3495_v25, %v3546_v41  ;;  %v3562_v46 = vmul.f32 0.0, %v3552_v44  ;;  %v3595_v55 = vsel %vm353_vm4, %v3552_v44, %v3546_v41 }
  0x97   : > { %4699 = vst [vmem:[#allocation10_spill] sm:$0xff] %v3595_v55  ;;  %v359_v58 = vmul.f32 %v3489_v24, %v3595_v55 }
  0x98   : > { %368 = vrot.lane.b32.xlu0 %v360_v42, %s3395_s26  ;;  %399 = vrot.lane.b32.xlu1 %v391_v43, %s3396_s30 }
  0x99   : > { %v3583_v52 = vpop.permute.xlu0 %290  ;;  %v3585_v53 = vpop.permute.xlu1 %292 }
  0x9a   : > { %4697 = vst [vmem:[#allocation8_spill] sm:$0xff] %v3583_v52  ;;  %4698 = vst [vmem:[#allocation9_spill] sm:$0xff] %v3585_v53  ;;  %v3602_v56 = vsel %vm294_vm5, %v3583_v52, %v3585_v53  ;;  %v3616_v60 = vmul.f32 0.0, %v3583_v52  ;;  %v301_v61 = vmul.f32 %v3495_v25, %v3585_v53 }
  0x9b   : > { %4700 = vst [vmem:[#allocation11_spill] sm:$0xff] %v3602_v56  ;;  %v300_v59 = vmul.f32 %v3489_v24, %v3602_v56 }
  0x9c   : > { %508 = vrot.lane.b32.xlu0 %v501_v47, %s3399_s8  ;;  %364 = vrot.lane.b32.xlu1 %v3562_v46, %s3395_s26 }
  0x9d   : > { %v481_v0 = vpop.permute.xlu0 %480 }
  0xa0   : > { %460 = vrot.lane.b32.xlu0 %v453_v50, %s3398_s7  ;;  %431 = vrot.lane.b32.xlu1 %v424_v51, %s3397_s6 }
  0xa4   : > { %397 = vrot.lane.b32.xlu0 %v390_v57, %s3396_s30  ;;  %366 = vrot.lane.b32.xlu1 %v359_v58, %s3395_s26 }
  0xa8   : > { %324 = vrot.lane.b32.xlu0 %v3393_v1, %s3402_s10  ;;  %307 = vrot.lane.b32.xlu1 %v300_v59, %s3394_s25 }
  0xac   : > { %305 = vrot.lane.b32.xlu1 %v3616_v60, %s3394_s25  ;;  %309 = vrot.lane.b32.xlu0 %v301_v61, %s3394_s25 }
  0xb0   : > { %781 = vrot.lane.b32.xlu1 %v3515_v32, %s3399_s8  ;;  %539 = vperm.xlu0 %3310, %v536_v62  }
  0xb4   : > { %742 = vrot.lane.b32.xlu1 %v3528_v36, %s3398_s7  ;;  %760 = vrot.lane.b32.xlu0 %v3393_v1, %s3400_s9 }
  0xb8   : > { %671 = vrot.lane.b32.xlu1 %v3562_v46, %s3395_s26  ;;  %721 = vrot.lane.b32.xlu0 %v3525_v35, %s3397_s6 }
  0xbc   : > { %692 = vrot.lane.b32.xlu0 %v3539_v39, %s3396_s30 }
  0xce   : > { %v477_v63 = vpop.permute.xlu1 %476  ;;  %v327_v3 = vpop.permute.xlu0 %326 }
  0xd2   : > { %v479_v2 = vpop.permute.xlu1 %478 }
  0xd3   : > { %v484_v22 = vsel %vm482_vm6, %v479_v2, %v481_v0  ;;  %v483_v31 = vsel %vm482_vm6, %v477_v63, %v479_v2 }
  0xd6   : > { %v329_v4 = vpop.permute.xlu1 %328 }
  0xd7   : > { %v332_v0 = vsel %vm330_vm7, %v327_v3, %v329_v4  ;;  %v3258_v4 = vmul.f32 -1.442695, %v3485_v17 }
  0xd9   : > { %3350 = vpow2.f32 %v3258_v4 }
  0xfa   : > { %v507_v7 = vpop.permute.xlu0 %506 }
  0xfe   : > { %v459_v8 = vpop.permute.xlu0 %458  ;;  %v511_v9 = vpop.permute.xlu1 %510 }
 0x102   : > { %v434_v10 = vpop.permute.xlu0 %433  ;;  %v463_v11 = vpop.permute.xlu1 %462 }
 0x106   : > { %v396_v12 = vpop.permute.xlu0 %395  ;;  %v430_v13 = vpop.permute.xlu1 %429 }
 0x10a   : > { %v369_v14 = vpop.permute.xlu0 %368  ;;  %v400_v15 = vpop.permute.xlu1 %399 }
 0x10e   : > { %v509_v18 = vpop.permute.xlu0 %508  ;;  %v365_v19 = vpop.permute.xlu1 %364 }
 0x10f   : > { %v513_v20 = vsel %vm294_vm5, %v509_v18, %v511_v9  ;;  %v512_v21 = vsel %vm294_vm5, %v507_v7, %v509_v18  ;;  %v272_v9 = vld [vmem:[%s4674_s2] sm:$0xf] }
 0x110   : > { %560 = vmatprep.subr.mxu0 %v513_v20 }
 0x111   : > { %561 = vmatpush1.msra.mxu0 %v512_v21 }
 0x112   : > { %v461_v23 = vpop.permute.xlu0 %460  ;;  %562 = vmatprep.subr.mxu0 %v484_v22  ;;  %v432_v28 = vpop.permute.xlu1 %431 }
 0x113   : > { %563 = vmatpush1.msra.mxu0 %v483_v31  ;;  %v465_v40 = vsel %vm353_vm4, %v461_v23, %v463_v11  ;;  %v464_v42 = vsel %vm353_vm4, %v459_v8, %v461_v23  ;;  %v436_v43 = vsel %vm384_vm3, %v432_v28, %v434_v10  ;;  %v435_v51 = vsel %vm384_vm3, %v430_v13, %v432_v28 }
 0x114   : > { %564 = vmatprep.subr.mxu0 %v465_v40 }
 0x115   : > { %565 = vmatpush1.msra.mxu0 %v464_v42 }
 0x116   : > { %v398_v47 = vpop.permute.xlu0 %397  ;;  %566 = vmatprep.subr.mxu0 %v436_v43  ;;  %v367_v50 = vpop.permute.xlu1 %366 }
 0x117   : > { %567 = vmatpush1.msra.mxu0 %v435_v51  ;;  %v403_v57 = vsel %vm401_vm2, %v398_v47, %v400_v15  ;;  %v402_v61 = vsel %vm401_vm2, %v396_v12, %v398_v47  ;;  %v372_v62 = vsel %vm370_vm1, %v367_v50, %v369_v14  ;;  %v371_v63 = vsel %vm370_vm1, %v365_v19, %v367_v50 }
 0x118   : > { %568 = vmatprep.subr.mxu0 %v3495_v25 }
 0x119   : > { %569 = vmatpush1.msra.mxu0 %v3489_v24 }
 0x11a   : > { %v325_v58 = vpop.permute.xlu0 %324  ;;  %570 = vmatprep.subr.mxu0 %v403_v57  ;;  %v308_v59 = vpop.permute.xlu1 %307 }
 0x11b   : > { %571 = vmatpush1.msra.mxu0 %v402_v61  ;;  %v331_v2 = vsel %vm330_vm7, %v325_v58, %v327_v3  ;;  %v3351_v3 = vpop.eup %3350  ;;  %v3251_v61 = vld [vmem:[%s4676_s4 + $0x3] ss:$4 sm:$0x3] }
 0x11c   : > { %572 = vmatprep.subr.mxu0 %v372_v62  ;;  %v893_v10 = vadd.f32 1.0, %v3351_v3 }
 0x11d   : > { %573 = vmatpush1.msra.mxu0 %v371_v63  ;;  %v1527_v63 = vrot.slane %v3251_v61, %v3454_v6 }
 0x11e   : > { %574 = vmatprep.subr.mxu0 %v332_v0  ;;  %v306_v25 = vpop.permute.xlu1 %305  ;;  %v310_v24 = vpop.permute.xlu0 %309  ;;  %3352 = vrcp.f32 %v893_v10  ;;  %v3250_v0 = vld [vmem:[%s4676_s4 + $0x2] ss:$4 sm:$0x3] }
 0x11f   : > { %575 = vmatpush1.msra.mxu0 %v331_v2  ;;  %v313_v7 = vsel %vm311_vm0, %v308_v59, %v310_v24  ;;  %v312_v8 = vsel %vm311_vm0, %v306_v25, %v308_v59  ;;  %v3256_v59 = vld [vmem:[%s4675_s3 + $0x4] sm:$0xf]  ;;  %v1471_v25 = vrot.slane %v3250_v0, %v3454_v6  ;;  %v1523_v24 = vrot.slane %v3251_v61, %v3452_v5 }
 0x120   : > { %576 = vmatprep.subr.mxu0 %v313_v7  ;;  %v1467_v2 = vrot.slane %v3250_v0, %v3452_v5 }
 0x121   : > { %577 = vmatpush1.msra.mxu0 %v312_v8 }
 0x122   : > { %3254 = vmatmul.mubr.msk.f32.vlgmr.msra.gmra.mxu0 %vm542_vm8, %v272_v9  ;;  %v782_v5 = vpop.permute.xlu1 %781 }
 0x123   : > { %1354 = vmatprep.mubr.f32.mxu0 %v3393_v1 }
 0x126   : > { %v743_v7 = vpop.permute.xlu1 %742 }
 0x12a   : > { %v672_v9 = vpop.permute.xlu1 %671 }
 0x12b   : > { %v540_v11 = vpop.permute.xlu0 %539  ;;  %v3353_v20 = vpop.eup %3352 }
 0x12c   : > { %v899_v21 = vcombine.high %v3353_v20, %v3353_v20 }
 0x12f   : > { %v761_v6 = vpop.permute.xlu0 %760 }
 0x133   : > { %v722_v8 = vpop.permute.xlu0 %721 }
 0x137   : > { %v693_v4 = vpop.permute.xlu0 %692 }
 0x1e2   : > { %v612_v12 = vpop.f32.mrf.mxu0 }
 0x1e3   : > { %v613_v13 = vadd.f32 %v612_v12, %v540_v11 }
 0x1e4   : > { %v614_v14 = vpop.f32.mrf.mxu0 }
 0x1e5   : > { %v617_v15 = vmax.f32 %v613_v13, 0.0  ;;  %v615_v18 = vadd.f32 %v614_v14, %v540_v11 }
 0x1e7   : > { %621 = vst [vmem:[#allocation2] sm:$0xf] %v617_v15  ;;  %v618_v19 = vmax.f32 %v615_v18, 0.0 }
 0x1e9   : > { %622 = vst [vmem:[#allocation2 + $0x18] sm:$0xf] %v618_v19 }
 0x1ee   : > { %v3662_v22 = vld [vmem:[#allocation2] sm:$0xff] }
 0x1ef   : > { %756 = vrot.lane.b32.xlu1 %v3662_v22, %s3400_s9  ;;  %652 = vrot.lane.b32.xlu0 %v3662_v22, %s3402_s10  ;;  %901 = vst [vmem:[#allocation2] sm:$0xf] %v3353_v20  ;;  %v771_v23 = vmul.f32 %v3662_v22, %v3501_v26  ;;  %v711_v28 = vmul.f32 %v3662_v22, %v3520_v33 }
 0x1f0   : > { %v3668_v17 = vld [vmem:[#allocation2 + $0x18] sm:$0xff]  ;;  %v732_v31 = vmul.f32 %v3662_v22, %v3503_v27  ;;  %v666_v40 = vmul.f32 %v3662_v22, %v3595_v55  ;;  %v687_v42 = vmul.f32 %v3662_v22, %v3590_v54  ;;  %v627_v62 = vmul.f32 %v3662_v22, %v3602_v56 }
 0x1f1   : > { %902 = vst [vmem:[#allocation2 + $0x18] sm:$0xf] %v899_v21  ;;  %v772_v43 = vmul.f32 %v3668_v17, %v3557_v45  ;;  %v733_v47 = vmul.f32 %v3668_v17, %v3569_v48  ;;  %v712_v50 = vmul.f32 %v3668_v17, %v3574_v49  ;;  %v667_v51 = vmul.f32 %v3668_v17, %v3546_v41 }
 0x1f2   : > { %v688_v57 = vmul.f32 %v3668_v17, %v3536_v38  ;;  %v628_v58 = vmul.f32 %v3668_v17, %v3585_v53 }
 0x1f3   : > { %758 = vrot.lane.b32.xlu1 %v3668_v17, %s3400_s9  ;;  %777 = vrot.lane.b32.xlu0 %v771_v23, %s3399_s8 }
 0x1f7   : > { %717 = vrot.lane.b32.xlu1 %v711_v28, %s3397_s6  ;;  %738 = vrot.lane.b32.xlu0 %v732_v31, %s3398_s7 }
 0x1fb   : > { %673 = vrot.lane.b32.xlu1 %v666_v40, %s3395_s26  ;;  %694 = vrot.lane.b32.xlu0 %v687_v42, %s3396_s30 }
 0x1ff   : > { %779 = vrot.lane.b32.xlu1 %v772_v43, %s3399_s8  ;;  %740 = vrot.lane.b32.xlu0 %v733_v47, %s3398_s7 }
 0x203   : > { %654 = vrot.lane.b32.xlu1 %v3668_v17, %s3402_s10  ;;  %650 = vrot.lane.b32.xlu0 %v3393_v1, %s3402_s10 }
 0x207   : > { %719 = vrot.lane.b32.xlu1 %v712_v50, %s3397_s6  ;;  %675 = vrot.lane.b32.xlu0 %v667_v51, %s3395_s26 }
 0x20b   : > { %696 = vrot.lane.b32.xlu1 %v688_v57, %s3396_s30  ;;  %636 = vrot.lane.b32.xlu0 %v628_v58, %s3394_s25 }
 0x20f   : > { %811 = vperm.xlu0 %3310, %v3256_v59   ;;  %634 = vrot.lane.b32.xlu1 %v627_v62, %s3394_s25 }
 0x213   : > { %1668 = vrot.lane.b32.xlu0 %v1527_v63, %s3394_s25  ;;  %632 = vrot.lane.b32.xlu1 %v3616_v60, %s3394_s25 }
 0x217   : > { %1621 = vrot.lane.b32.xlu0 %v1471_v25, %s3395_s26  ;;  %1666 = vrot.lane.b32.xlu1 %v1523_v24, %s3394_s25 }
 0x21b   : > { %1592 = vrot.lane.b32.xlu0 %v1527_v63, %s3396_s30  ;;  %1619 = vrot.lane.b32.xlu1 %v1467_v2, %s3395_s26 }
 0x21f   : > { %1559 = vrot.lane.b32.xlu0 %v1471_v25, %s3397_s6  ;;  %1590 = vrot.lane.b32.xlu1 %v1523_v24, %s3396_s30 }
 0x223   : > { %1530 = vrot.lane.b32.xlu0 %v1527_v63, %s3398_s7  ;;  %1557 = vrot.lane.b32.xlu1 %v1467_v2, %s3397_s6 }
 0x227   : > { %1474 = vrot.lane.b32.xlu0 %v1471_v25, %s3399_s8  ;;  %1528 = vrot.lane.b32.xlu1 %v1523_v24, %s3398_s7 }
 0x22b   : > { %1261 = vrot.lane.b32.xlu0 %v3515_v32, %s3399_s8  ;;  %1472 = vrot.lane.b32.xlu1 %v1467_v2, %s3399_s8 }
 0x22f   : > { %1222 = vrot.lane.b32.xlu0 %v3528_v36, %s3398_s7  ;;  %3312 = vrot.lane.b32.xlu1 %v3393_v1, %s3400_s9 }
 0x233   : > { %1151 = vrot.lane.b32.xlu0 %v3562_v46, %s3395_s26  ;;  %1201 = vrot.lane.b32.xlu1 %v3525_v35, %s3397_s6 }
 0x237   : > { %1112 = vrot.lane.b32.xlu0 %v3616_v60, %s3394_s25  ;;  %1172 = vrot.lane.b32.xlu1 %v3539_v39, %s3396_s30 }
 0x23b   : > { %1130 = vrot.lane.b32.xlu1 %v3393_v1, %s3402_s10 }
 0x261   : > { %v757_v3 = vpop.permute.xlu1 %756  ;;  %v653_v10 = vpop.permute.xlu0 %652 }
 0x265   : > { %v759_v11 = vpop.permute.xlu1 %758  ;;  %v778_v12 = vpop.permute.xlu0 %777 }
 0x266   : > { %v763_v28 = vsel %vm482_vm6, %v759_v11, %v761_v6  ;;  %v762_v40 = vsel %vm482_vm6, %v757_v3, %v759_v11  ;;  %v3255_v6 = vld [vmem:[%s4674_s2 + $0x4] sm:$0xf] }
 0x269   : > { %v718_v13 = vpop.permute.xlu1 %717  ;;  %v739_v14 = vpop.permute.xlu0 %738 }
 0x26d   : > { %v674_v15 = vpop.permute.xlu1 %673  ;;  %v695_v18 = vpop.permute.xlu0 %694 }
 0x26e   : > { %v698_v62 = vsel %vm401_vm2, %v693_v4, %v695_v18  ;;  %v677_v25 = vsel %vm370_vm1, %v672_v9, %v674_v15 }
 0x271   : > { %v780_v19 = vpop.permute.xlu1 %779  ;;  %v741_v20 = vpop.permute.xlu0 %740 }
 0x272   : > { %v784_v21 = vsel %vm294_vm5, %v780_v19, %v782_v5  ;;  %v783_v23 = vsel %vm294_vm5, %v778_v12, %v780_v19  ;;  %v745_v42 = vsel %vm353_vm4, %v741_v20, %v743_v7  ;;  %v744_v47 = vsel %vm353_vm4, %v739_v14, %v741_v20 }
 0x273   : > { %831 = vmatprep.subr.mxu1 %v784_v21 }
 0x274   : > { %832 = vmatpush1.msra.mxu1 %v783_v23  ;;  %v246_v23 = vld [vmem:[%s239_s11] sm:$0xff] }
 0x275   : > { %v655_v31 = vpop.permute.xlu1 %654  ;;  %833 = vmatprep.subr.mxu1 %v763_v28  ;;  %v651_v43 = vpop.permute.xlu0 %650  ;;  %v3266_v28 = vmul.f32 -1.442695, %v246_v23 }
 0x276   : > { %834 = vmatpush1.msra.mxu1 %v762_v40  ;;  %v657_v24 = vsel %vm330_vm7, %v653_v10, %v655_v31 }
 0x277   : > { %835 = vmatprep.subr.mxu1 %v745_v42  ;;  %3354 = vpow2.f32 %v3266_v28 }
 0x278   : > { %836 = vmatpush1.msra.mxu1 %v744_v47 }
 0x279   : > { %v720_v50 = vpop.permute.xlu1 %719  ;;  %v676_v58 = vpop.permute.xlu0 %675 }
 0x27a   : > { %v724_v51 = vsel %vm384_vm3, %v720_v50, %v722_v8  ;;  %v723_v57 = vsel %vm384_vm3, %v718_v13, %v720_v50  ;;  %v678_v63 = vsel %vm370_vm1, %v674_v15, %v676_v58 }
 0x27b   : > { %837 = vmatprep.subr.mxu1 %v724_v51 }
 0x27c   : > { %838 = vmatpush1.msra.mxu1 %v723_v57 }
 0x27d   : > { %v697_v59 = vpop.permute.xlu1 %696  ;;  %839 = vmatprep.subr.mxu1 %v3668_v17  ;;  %v637_v2 = vpop.permute.xlu0 %636  ;;  %v656_v17 = vsel %vm330_vm7, %v651_v43, %v653_v10 }
 0x27e   : > { %840 = vmatpush1.msra.mxu1 %v3662_v22  ;;  %v699_v61 = vsel %vm401_vm2, %v695_v18, %v697_v59 }
 0x27f   : > { %841 = vmatprep.subr.mxu1 %v699_v61 }
 0x280   : > { %842 = vmatpush1.msra.mxu1 %v698_v62 }
 0x281   : > { %v635_v0 = vpop.permute.xlu1 %634  ;;  %843 = vmatprep.subr.mxu1 %v678_v63 }
 0x282   : > { %844 = vmatpush1.msra.mxu1 %v677_v25  ;;  %v639_v22 = vsel %vm311_vm0, %v635_v0, %v637_v2  ;;  %v1444_v25 = vmax.f32 %v246_v23, 0.0 }
 0x283   : > { %845 = vmatprep.subr.mxu1 %v657_v24 }
 0x284   : > { %846 = vmatpush1.msra.mxu1 %v656_v17  ;;  %v3355_v58 = vpop.eup %3354 }
 0x285   : > { %v633_v5 = vpop.permute.xlu1 %632  ;;  %847 = vmatprep.subr.mxu1 %v639_v22  ;;  %v1448_v59 = vadd.f32 1.0, %v3355_v58  ;;  %v3808_v22 = vld [vmem:[#allocation2] sm:$0xff] }
 0x286   : > { %v638_v7 = vsel %vm311_vm0, %v633_v5, %v635_v0 }
 0x287   : > { %848 = vmatpush1.msra.mxu1 %v638_v7 }
 0x288   : > { %3257 = vmatmul.mubr.msk.f32.vlgmr.msra.gmra.mxu1 %vm542_vm8, %v3255_v6  ;;  %v3810_v6 = vld [vmem:[#allocation2 + $0x18] sm:$0xff] }
 0x289   : > { %1428 = vmatprep.mubr.f32.mxu1 %v3393_v1  ;;  %v3778_v9 = vpop.permute.xlu1 %1666 }
 0x28a   : > { %v812_v8 = vpop.permute.xlu0 %811 }
 0x28d   : > { %v3782_v3 = vpop.permute.xlu1 %1619 }
 0x28e   : > { %v3780_v4 = vpop.permute.xlu0 %1668 }
 0x28f   : > { %v1676_v12 = vmul.f32 0.0, %v3780_v4 }
 0x291   : > { %v3786_v11 = vpop.permute.xlu1 %1590  ;;  %1684 = vrot.lane.b32.xlu0 %v1676_v12, %s3399_s8 }
 0x292   : > { %v3784_v10 = vpop.permute.xlu0 %1621 }
 0x293   : > { %v1629_v18 = vmul.f32 0.0, %v3784_v10 }
 0x295   : > { %v3792_v14 = vpop.permute.xlu1 %1557  ;;  %1637 = vrot.lane.b32.xlu1 %v1629_v18, %s3398_s7 }
 0x296   : > { %v3790_v13 = vpop.permute.xlu0 %1592  ;;  %v1565_v19 = vmul.f32 0.0, %v3792_v14 }
 0x297   : > { %v1600_v15 = vmul.f32 0.0, %v3790_v13 }
 0x299   : > { %1608 = vrot.lane.b32.xlu0 %v1600_v15, %s3397_s6  ;;  %v3798_v20 = vpop.permute.xlu1 %1528 }
 0x29a   : > { %v1536_v21 = vmul.f32 0.0, %v3798_v20  ;;  %v3866_v58 = vpop.permute.xlu0 %1559 }
 0x29c   : > { %1542 = vrot.lane.b32.xlu1 %v1536_v21, %s3395_s26 }
 0x29d   : > { %1571 = vrot.lane.b32.xlu0 %v1565_v19, %s3396_s30 }
 0x348   : > { %v883_v31 = vpop.f32.mrf.mxu1 }
 0x349   : > { %v884_v40 = vadd.f32 %v883_v31, %v812_v8 }
 0x34a   : > { %v885_v42 = vpop.f32.mrf.mxu1 }
 0x34b   : > { %v888_v43 = vmax.f32 %v884_v40, 0.0  ;;  %v886_v47 = vadd.f32 %v885_v42, %v812_v8 }
 0x34d   : > { %v3260_v50 = vmul.f32 -1.442695, %v888_v43  ;;  %v889_v51 = vmax.f32 %v886_v47, 0.0 }
 0x34f   : > { %3356 = vpow2.f32 %v3260_v50  ;;  %v3261_v57 = vmul.f32 -1.442695, %v889_v51 }
 0x351   : > { %3358 = vpow2.f32 %v3261_v57 }
 0x352   : > { %3360 = vrcp.f32 %v1448_v59 }
 0x35c   : > { %v3357_v61 = vpop.eup %3356 }
 0x35d   : > { %v1093_v62 = vadd.f32 1.0, %v3357_v61 }
 0x35e   : > { %v3359_v63 = vpop.eup %3358 }
 0x35f   : > { %3362 = vrcp.f32 %v1093_v62  ;;  %v1094_v0 = vadd.f32 1.0, %v3359_v63  ;;  %v3361_v24 = vpop.eup %3360 }
 0x360   : > { %v1451_v2 = vadd.f32 %v3361_v24, %v1444_v25  ;;  %v3886_v25 = vsel %vm384_vm3, %v3792_v14, %v3866_v58 }
 0x361   : > { %3364 = vrcp.f32 %v1094_v0  ;;  %v3879_v0 = vpop.permute.xlu0 %1530 }
 0x362   : > { %v1452_v7 = vmax.f32 %v1451_v2, 0.0  ;;  %v3891_v24 = vsel %vm353_vm4, %v3798_v20, %v3879_v0 }
 0x364   : > { %v1456_v8 = vcombine.high %v1452_v7, %v1452_v7 }
 0x36c   : > { %v3363_v17 = vpop.eup %3362 }
 0x36d   : > { %1101 = vst [vmem:[#allocation2] sm:$0xf] %v3363_v17 }
 0x36e   : > { %v3365_v5 = vpop.eup %3364 }
 0x36f   : > { %1102 = vst [vmem:[#allocation2 + $0x18] sm:$0xf] %v3365_v5  ;;  %v3902_v5 = vsel %vm311_vm0, %v3778_v9, %v3780_v4 }
 0x374   : > { %v3812_v12 = vld [vmem:[#allocation2] sm:$0xff] }
 0x375   : > { %1132 = vrot.lane.b32.xlu1 %v3812_v12, %s3402_s10  ;;  %1236 = vrot.lane.b32.xlu0 %v3812_v12, %s3400_s9  ;;  %1458 = vst [vmem:[#allocation2] sm:$0xf] %v1452_v7  ;;  %v1251_v18 = vmul.f32 %v3812_v12, %v3501_v26  ;;  %v1212_v19 = vmul.f32 %v3812_v12, %v3503_v27 }
 0x376   : > { %v3818_v15 = vld [vmem:[#allocation2 + $0x18] sm:$0xff]  ;;  %v1191_v21 = vmul.f32 %v3812_v12, %v3520_v33  ;;  %v1167_v23 = vmul.f32 %v3812_v12, %v3590_v54  ;;  %v1146_v28 = vmul.f32 %v3812_v12, %v3595_v55  ;;  %v1107_v42 = vmul.f32 %v3812_v12, %v3602_v56 }
 0x377   : > { %1459 = vst [vmem:[#allocation2 + $0x18] sm:$0xf] %v1456_v8  ;;  %v1252_v31 = vmul.f32 %v3818_v15, %v3557_v45  ;;  %v1213_v40 = vmul.f32 %v3818_v15, %v3569_v48  ;;  %v1147_v43 = vmul.f32 %v3818_v15, %v3546_v41  ;;  %v1192_v47 = vmul.f32 %v3818_v15, %v3574_v49 }
 0x378   : > { %v1108_v50 = vmul.f32 %v3818_v15, %v3585_v53  ;;  %v1168_v51 = vmul.f32 %v3818_v15, %v3536_v38  ;;  %v3907_v7 = vsel %vm370_vm1, %v3782_v3, %v3784_v10 }
 0x379   : > { %1257 = vrot.lane.b32.xlu1 %v1251_v18, %s3399_s8  ;;  %1238 = vrot.lane.b32.xlu0 %v3818_v15, %s3400_s9 }
 0x37c   : > { %v3860_v57 = vld [vmem:[#allocation2] sm:$0xff] }
 0x37d   : > { %1218 = vrot.lane.b32.xlu1 %v1212_v19, %s3398_s7  ;;  %1197 = vrot.lane.b32.xlu0 %v1191_v21, %s3397_s6  ;;  %v1674_v59 = vmul.f32 %v3778_v9, %v3860_v57  ;;  %v1598_v62 = vmul.f32 %v3860_v57, %v3786_v11  ;;  %v1627_v63 = vmul.f32 %v3860_v57, %v3782_v3 }
 0x37e   : > { %v3870_v61 = vld [vmem:[#allocation2 + $0x18] sm:$0xff]  ;;  %v1566_v2 = vmul.f32 %v3860_v57, %v3886_v25  ;;  %v1537_v17 = vmul.f32 %v3860_v57, %v3891_v24  ;;  %v3922_v19 = vsel %vm401_vm2, %v3786_v11, %v3790_v13 }
 0x37f   : > { %v1628_v8 = vmul.f32 %v3870_v61, %v3907_v7  ;;  %v1675_v18 = vmul.f32 %v3902_v5, %v3870_v61  ;;  %v1538_v21 = vmul.f32 %v3870_v61, %v3879_v0 }
 0x381   : > { %1174 = vrot.lane.b32.xlu1 %v1167_v23, %s3396_s30  ;;  %1153 = vrot.lane.b32.xlu0 %v1146_v28, %s3395_s26  ;;  %v1599_v23 = vmul.f32 %v3870_v61, %v3922_v19  ;;  %v3928_v28 = vpop.permute.xlu0 %1474 }
 0x385   : > { %1259 = vrot.lane.b32.xlu1 %v1252_v31, %s3399_s8  ;;  %1134 = vrot.lane.b32.xlu0 %v3818_v15, %s3402_s10  ;;  %v3930_v31 = vpop.permute.xlu1 %1472 }
 0x389   : > { %1220 = vrot.lane.b32.xlu1 %v1213_v40, %s3398_s7  ;;  %1114 = vrot.lane.b32.xlu0 %v1107_v42, %s3394_s25  ;;  %v1482_v40 = vmul.f32 %v3870_v61, %v3928_v28  ;;  %v3939_v42 = vsel %vm294_vm5, %v3930_v31, %v3928_v28 }
 0x38d   : > { %1155 = vrot.lane.b32.xlu1 %v1147_v43, %s3395_s26  ;;  %1199 = vrot.lane.b32.xlu0 %v1192_v47, %s3397_s6  ;;  %v1567_v43 = vmul.f32 %v3870_v61, %v3866_v58  ;;  %v1481_v47 = vmul.f32 %v3860_v57, %v3939_v42 }
 0x391   : > { %1116 = vrot.lane.b32.xlu1 %v1108_v50, %s3394_s25  ;;  %1176 = vrot.lane.b32.xlu0 %v1168_v51, %s3396_s30  ;;  %v3268_v50 = vld [vmem:[%s4675_s3 + $0x8] sm:$0xf]  ;;  %v1480_v51 = vmul.f32 0.0, %v3930_v31 }
 0x395   : > { %1651 = vrot.lane.b32.xlu1 %v3860_v57, %s3400_s9  ;;  %1506 = vrot.lane.b32.xlu0 %v3860_v57, %s3402_s10 }
 0x399   : > { %1680 = vrot.lane.b32.xlu1 %v1674_v59, %s3399_s8  ;;  %1653 = vrot.lane.b32.xlu0 %v3870_v61, %s3400_s9  ;;  %v1052_v59 = vmul.f32 %v3810_v6, %v3557_v45 }
 0x39d   : > { %1604 = vrot.lane.b32.xlu1 %v1598_v62, %s3397_s6  ;;  %1633 = vrot.lane.b32.xlu0 %v1627_v63, %s3398_s7  ;;  %v1051_v62 = vmul.f32 %v3808_v22, %v3501_v26  ;;  %v3962_v63 = vpop.permute.xlu0 %1261 }
 0x3a1   : > { %1573 = vrot.lane.b32.xlu0 %v1566_v2, %s3396_s30  ;;  %1544 = vrot.lane.b32.xlu1 %v1537_v17, %s3395_s26  ;;  %v3973_v2 = vpop.permute.xlu0 %1222  ;;  %v992_v17 = vmul.f32 %v3810_v6, %v3574_v49 }
 0x3a5   : > { %1635 = vrot.lane.b32.xlu0 %v1628_v8, %s3398_s7  ;;  %1682 = vrot.lane.b32.xlu1 %v1675_v18, %s3399_s8  ;;  %v1013_v8 = vmul.f32 %v3810_v6, %v3569_v48 }
 0x3a9   : > { %1504 = vrot.lane.b32.xlu0 %v3393_v1, %s3402_s10  ;;  %1508 = vrot.lane.b32.xlu1 %v3870_v61, %s3402_s10 }
 0x3ad   : > { %1546 = vrot.lane.b32.xlu0 %v1538_v21, %s3395_s26  ;;  %1606 = vrot.lane.b32.xlu1 %v1599_v23, %s3397_s6  ;;  %v3987_v21 = vpop.permute.xlu0 %1151  ;;  %v968_v23 = vmul.f32 %v3810_v6, %v3536_v38 }
 0x3b1   : > { %1575 = vrot.lane.b32.xlu1 %v1567_v43, %s3396_s30  ;;  %1490 = vrot.lane.b32.xlu0 %v1482_v40, %s3394_s25  ;;  %v3998_v43 = vpop.permute.xlu0 %1112 }
 0x3b5   : > { %1714 = vperm.xlu0 %3310, %v3268_v50   ;;  %1488 = vrot.lane.b32.xlu1 %v1481_v47, %s3394_s25  ;;  %v946_v47 = vmul.f32 %v3808_v22, %v3595_v55  ;;  %v967_v50 = vmul.f32 %v3808_v22, %v3590_v54 }
 0x3b9   : > { %1061 = vrot.lane.b32.xlu0 %v3515_v32, %s3399_s8  ;;  %1486 = vrot.lane.b32.xlu1 %v1480_v51, %s3394_s25  ;;  %v3967_v32 = vpop.permute.xlu1 %3312 }
 0x3bd   : > { %1038 = vrot.lane.b32.xlu0 %v3810_v6, %s3400_s9  ;;  %1059 = vrot.lane.b32.xlu1 %v1052_v59, %s3399_s8  ;;  %v3981_v18 = vpop.permute.xlu1 %1201  ;;  %v4008_v59 = vpop.permute.xlu0 %1684 }
 0x3c1   : > { %1036 = vrot.lane.b32.xlu0 %v3808_v22, %s3400_s9  ;;  %1057 = vrot.lane.b32.xlu1 %v1051_v62, %s3399_s8  ;;  %v3993_v40 = vpop.permute.xlu1 %1172 }
 0x3c5   : > { %1022 = vrot.lane.b32.xlu0 %v3528_v36, %s3398_s7  ;;  %3317 = vrot.lane.b32.xlu1 %v3393_v1, %s3400_s9  ;;  %v991_v36 = vmul.f32 %v3808_v22, %v3520_v33  ;;  %v1012_v1 = vmul.f32 %v3808_v22, %v3503_v27  ;;  %v4006_v51 = vpop.permute.xlu1 %1130 }
 0x3c9   : > { %999 = vrot.lane.b32.xlu0 %v992_v17, %s3397_s6  ;;  %1020 = vrot.lane.b32.xlu1 %v1013_v8, %s3398_s7  ;;  %v4016_v62 = vpop.permute.xlu1 %1637  ;;  %v4018_v17 = vpop.permute.xlu0 %1608  ;;  %v907_v8 = vmul.f32 %v3808_v22, %v3602_v56 }
 0x3cd   : > { %997 = vrot.lane.b32.xlu0 %v991_v36, %s3397_s6  ;;  %1018 = vrot.lane.b32.xlu1 %v1012_v1, %s3398_s7  ;;  %v4034_v36 = vld [vmem:[#allocation2 + $0x10] sm:$0xff] }
 0x3ce   : > { %v1947_v1 = vmul.f32 %v4034_v36, %v3780_v4  ;;  %v1860_v4 = vmul.f32 %v4034_v36, %v3792_v14 }
 0x3d1   : > { %976 = vrot.lane.b32.xlu0 %v968_v23, %s3396_s30  ;;  %1001 = vrot.lane.b32.xlu1 %v3525_v35, %s3397_s6  ;;  %v947_v35 = vmul.f32 %v3810_v6, %v3546_v41 }
 0x3d5   : > { %953 = vrot.lane.b32.xlu0 %v946_v47, %s3395_s26  ;;  %974 = vrot.lane.b32.xlu1 %v967_v50, %s3396_s30  ;;  %v908_v50 = vmul.f32 %v3810_v6, %v3585_v53 }
 0x3d9   : > { %951 = vrot.lane.b32.xlu0 %v3562_v46, %s3395_s26  ;;  %972 = vrot.lane.b32.xlu1 %v3539_v39, %s3396_s30  ;;  %v4028_v39 = vpop.permute.xlu1 %1542  ;;  %v4030_v46 = vpop.permute.xlu0 %1571 }
 0x3dd   : > { %934 = vrot.lane.b32.xlu0 %v3810_v6, %s3402_s10  ;;  %955 = vrot.lane.b32.xlu1 %v947_v35, %s3395_s26  ;;  %v1887_v35 = vmul.f32 %v4034_v36, %v3790_v13 }
 0x3e1   : > { %914 = vrot.lane.b32.xlu0 %v907_v8, %s3394_s25  ;;  %932 = vrot.lane.b32.xlu1 %v3808_v22, %s3402_s10 }
 0x3e5   : > { %912 = vrot.lane.b32.xlu0 %v3616_v60, %s3394_s25  ;;  %930 = vrot.lane.b32.xlu1 %v4034_v36, %s3402_s10  ;;  %v1908_v60 = vmul.f32 %v4034_v36, %v3784_v10 }
 0x3e7   : > { %v1133_v23 = vpop.permute.xlu1 %1132  ;;  %v1237_v47 = vpop.permute.xlu0 %1236 }
 0x3e9   : > { %1955 = vrot.lane.b32.xlu0 %v1947_v1, %s3399_s8  ;;  %916 = vrot.lane.b32.xlu1 %v908_v50, %s3394_s25  ;;  %v1839_v1 = vmul.f32 %v4034_v36, %v3798_v20 }
 0x3eb   : > { %v1258_v8 = vpop.permute.xlu1 %1257  ;;  %v1239_v52 = vpop.permute.xlu0 %1238 }
 0x3ed   : > { %1895 = vrot.lane.b32.xlu0 %v1887_v35, %s3397_s6  ;;  %1916 = vrot.lane.b32.xlu1 %v1908_v60, %s3398_s7  ;;  %v3314_v35 = vunpack.i.l.bf16 %v3967_v32 }
 0x3ef   : > { %v1219_v53 = vpop.permute.xlu1 %1218  ;;  %v1198_v50 = vpop.permute.xlu0 %1197  ;;  %v1243_v20 = vsel %vm482_vm6, %v1239_v52, %v3314_v35 }
 0x3f1   : > { %1866 = vrot.lane.b32.xlu0 %v1860_v4, %s3396_s30  ;;  %1845 = vrot.lane.b32.xlu1 %v1839_v1, %s3395_s26  ;;  %v1242_v1 = vsel %vm482_vm6, %v1237_v47, %v1239_v52 }
 0x3f3   : > { %v1175_v10 = vpop.permute.xlu1 %1174  ;;  %v1154_v13 = vpop.permute.xlu0 %1153 }
 0x3f7   : > { %v1260_v56 = vpop.permute.xlu1 %1259  ;;  %v1135_v49 = vpop.permute.xlu0 %1134 }
 0x3f8   : > { %v1264_v60 = vsel %vm294_vm5, %v1260_v56, %v3962_v63  ;;  %v1263_v14 = vsel %vm294_vm5, %v1258_v8, %v1260_v56 }
 0x3f9   : > { %1304 = vmatprep.subr.mxu0 %v1264_v60 }
 0x3fa   : > { %1305 = vmatpush1.msra.mxu0 %v1263_v14  ;;  %v3315_v14 = vunpack.i.h.bf16 %v3967_v32 }
 0x3fb   : > { %v1221_v41 = vpop.permute.xlu1 %1220  ;;  %1306 = vmatprep.subr.mxu0 %v1243_v20  ;;  %v1115_v4 = vpop.permute.xlu0 %1114 }
 0x3fc   : > { %1307 = vmatpush1.msra.mxu0 %v1242_v1  ;;  %v1225_v48 = vsel %vm353_vm4, %v1221_v41, %v3973_v2  ;;  %v1224_v38 = vsel %vm353_vm4, %v1219_v53, %v1221_v41 }
 0x3fd   : > { %1308 = vmatprep.subr.mxu0 %v1225_v48 }
 0x3fe   : > { %1309 = vmatpush1.msra.mxu0 %v1224_v38  ;;  %v1178_v38 = vsel %vm401_vm2, %v3993_v40, %v1175_v10  ;;  %v3262_v40 = vld [vmem:[%s4674_s2 + $0x14] sm:$0xf] }
 0x3ff   : > { %v1156_v63 = vpop.permute.xlu1 %1155  ;;  %v1200_v55 = vpop.permute.xlu0 %1199 }
 0x400   : > { %v1204_v56 = vsel %vm384_vm3, %v1200_v55, %v3981_v18  ;;  %v1203_v8 = vsel %vm384_vm3, %v1198_v50, %v1200_v55  ;;  %v1158_v41 = vsel %vm370_vm1, %v1154_v13, %v1156_v63  ;;  %v1157_v55 = vsel %vm370_vm1, %v3987_v21, %v1154_v13 }
 0x401   : > { %1310 = vmatprep.subr.mxu0 %v1204_v56  ;;  %v1118_v21 = vsel %vm311_vm0, %v3998_v43, %v1115_v4 }
 0x402   : > { %1311 = vmatpush1.msra.mxu0 %v1203_v8 }
 0x403   : > { %v1117_v35 = vpop.permute.xlu1 %1116  ;;  %1312 = vmatprep.subr.mxu0 %v3818_v15  ;;  %v1177_v52 = vpop.permute.xlu0 %1176  ;;  %v1137_v15 = vsel %vm330_vm7, %v1133_v23, %v1135_v49 }
 0x404   : > { %1313 = vmatpush1.msra.mxu0 %v3812_v12  ;;  %v1179_v2 = vsel %vm401_vm2, %v1175_v10, %v1177_v52  ;;  %v1136_v12 = vsel %vm330_vm7, %v4006_v51, %v1133_v23  ;;  %v1119_v18 = vsel %vm311_vm0, %v1115_v4, %v1117_v35 }
 0x405   : > { %1314 = vmatprep.subr.mxu0 %v1179_v2 }
 0x406   : > { %1315 = vmatpush1.msra.mxu0 %v1178_v38 }
 0x407   : > { %v1652_v48 = vpop.permute.xlu1 %1651  ;;  %1316 = vmatprep.subr.mxu0 %v1158_v41  ;;  %v1507_v53 = vpop.permute.xlu0 %1506 }
 0x408   : > { %1317 = vmatpush1.msra.mxu0 %v1157_v55 }
 0x409   : > { %1318 = vmatprep.subr.mxu0 %v1137_v15 }
 0x40a   : > { %1319 = vmatpush1.msra.mxu0 %v1136_v12 }
 0x40b   : > { %v1681_v47 = vpop.permute.xlu1 %1680  ;;  %1320 = vmatprep.subr.mxu0 %v1119_v18  ;;  %v1654_v50 = vpop.permute.xlu0 %1653 }
 0x40c   : > { %1321 = vmatpush1.msra.mxu0 %v1118_v21  ;;  %v1658_v43 = vsel %vm482_vm6, %v1654_v50, %v3315_v14  ;;  %v1657_v63 = vsel %vm482_vm6, %v1652_v48, %v1654_v50 }
 0x40d   : > { %3263 = vmatmul.mubr.msk.f32.vlgmr.msra.gmra.mxu0 %vm542_vm8, %v3262_v40 }
 0x40e   : > { %1784 = vmatprep.mubr.f32.mxu0 %v4034_v36 }
 0x40f   : > { %v1605_v49 = vpop.permute.xlu1 %1604  ;;  %v1634_v51 = vpop.permute.xlu0 %1633 }
 0x413   : > { %v1545_v23 = vpop.permute.xlu1 %1544  ;;  %v1574_v10 = vpop.permute.xlu0 %1573 }
 0x414   : > { %v1577_v41 = vsel %vm401_vm2, %v4030_v46, %v1574_v10  ;;  %v1548_v15 = vsel %vm370_vm1, %v4028_v39, %v1545_v23  ;;  %v3267_v46 = vld [vmem:[%s4674_s2 + $0x8] sm:$0xf] }
 0x417   : > { %v1683_v13 = vpop.permute.xlu1 %1682  ;;  %v1636_v60 = vpop.permute.xlu0 %1635 }
 0x418   : > { %v1687_v20 = vsel %vm294_vm5, %v1683_v13, %v4008_v59  ;;  %v1686_v1 = vsel %vm294_vm5, %v1681_v47, %v1683_v13  ;;  %v1640_v56 = vsel %vm353_vm4, %v1636_v60, %v4016_v62  ;;  %v1639_v32 = vsel %vm353_vm4, %v1634_v51, %v1636_v60 }
 0x419   : > { %1734 = vmatprep.subr.mxu0 %v1687_v20 }
 0x41a   : > { %1735 = vmatpush1.msra.mxu0 %v1686_v1 }
 0x41b   : > { %v1509_v4 = vpop.permute.xlu1 %1508  ;;  %1736 = vmatprep.subr.mxu0 %v1658_v43  ;;  %v1505_v8 = vpop.permute.xlu0 %1504 }
 0x41c   : > { %1737 = vmatpush1.msra.mxu0 %v1657_v63 }
 0x41d   : > { %1738 = vmatprep.subr.mxu0 %v1640_v56 }
 0x41e   : > { %1739 = vmatpush1.msra.mxu0 %v1639_v32 }
 0x41f   : > { %v1607_v59 = vpop.permute.xlu1 %1606  ;;  %v1547_v2 = vpop.permute.xlu0 %1546 }
 0x420   : > { %v1611_v35 = vsel %vm384_vm3, %v1607_v59, %v4018_v17  ;;  %v1610_v52 = vsel %vm384_vm3, %v1605_v49, %v1607_v59  ;;  %v1549_v48 = vsel %vm370_vm1, %v1545_v23, %v1547_v2 }
 0x421   : > { %1740 = vmatprep.subr.mxu0 %v1611_v35 }
 0x422   : > { %1741 = vmatpush1.msra.mxu0 %v1610_v52 }
 0x423   : > { %v1576_v38 = vpop.permute.xlu1 %1575  ;;  %1742 = vmatprep.subr.mxu0 %v3870_v61  ;;  %v1491_v17 = vpop.permute.xlu0 %1490  ;;  %v1511_v61 = vsel %vm330_vm7, %v1507_v53, %v1509_v4 }
 0x424   : > { %1743 = vmatpush1.msra.mxu0 %v3860_v57  ;;  %v1578_v62 = vsel %vm401_vm2, %v1574_v10, %v1576_v38  ;;  %v1510_v57 = vsel %vm330_vm7, %v1505_v8, %v1507_v53 }
 0x425   : > { %1744 = vmatprep.subr.mxu0 %v1578_v62 }
 0x426   : > { %1745 = vmatpush1.msra.mxu0 %v1577_v41 }
 0x427   : > { %v1489_v55 = vpop.permute.xlu1 %1488  ;;  %1746 = vmatprep.subr.mxu0 %v1549_v48 }
 0x428   : > { %1747 = vmatpush1.msra.mxu0 %v1548_v15  ;;  %v1493_v12 = vsel %vm311_vm0, %v1489_v55, %v1491_v17 }
 0x429   : > { %1748 = vmatprep.subr.mxu0 %v1511_v61 }
 0x42a   : > { %1749 = vmatpush1.msra.mxu0 %v1510_v57 }
 0x42b   : > { %v1487_v18 = vpop.permute.xlu1 %1486  ;;  %1750 = vmatprep.subr.mxu0 %v1493_v12 }
 0x42c   : > { %v1492_v40 = vsel %vm311_vm0, %v1487_v18, %v1489_v55 }
 0x42d   : > { %1751 = vmatpush1.msra.mxu0 %v1492_v40 }
 0x42e   : > { %3269 = vmatmul.mubr.msk.f32.vlgmr.msra.gmra.mxu0 %vm542_vm8, %v3267_v46 }
 0x42f   : > { %v1060_v39 = vpop.permute.xlu1 %1059  ;;  %2512 = vmatprep.mubr.f32.mxu0 %v4034_v36 }
 0x430   : > { %v4116_v47 = vpop.permute.xlu0 %1714 }
 0x433   : > { %v1058_v53 = vpop.permute.xlu1 %1057 }
 0x434   : > { %v1062_v50 = vpop.permute.xlu0 %1061  ;;  %v1063_v49 = vsel %vm294_vm5, %v1058_v53, %v1060_v39 }
 0x435   : > { %v1064_v21 = vsel %vm294_vm5, %v1060_v39, %v1062_v50  ;;  %v3259_v50 = vld [vmem:[%s4674_s2 + $0x10] sm:$0xf] }
 0x436   : > { %1378 = vmatprep.subr.mxu1 %v1064_v21 }
 0x437   : > { %v4120_v51 = vpop.permute.xlu1 %3317  ;;  %1379 = vmatpush1.msra.mxu1 %v1063_v49 }
 0x438   : > { %v3319_v23 = vunpack.i.l.bf16 %v4120_v51  ;;  %v1039_v10 = vpop.permute.xlu0 %1038 }
 0x43a   : > { %v1043_v13 = vsel %vm482_vm6, %v1039_v10, %v3319_v23 }
 0x43b   : > { %v1021_v60 = vpop.permute.xlu1 %1020  ;;  %1380 = vmatprep.subr.mxu1 %v1043_v13 }
 0x43c   : > { %v1037_v14 = vpop.permute.xlu0 %1036 }
 0x43d   : > { %v1042_v20 = vsel %vm482_vm6, %v1037_v14, %v1039_v10 }
 0x43e   : > { %1381 = vmatpush1.msra.mxu1 %v1042_v20 }
 0x43f   : > { %v1019_v1 = vpop.permute.xlu1 %1018 }
 0x440   : > { %v1023_v43 = vpop.permute.xlu0 %1022  ;;  %v1024_v63 = vsel %vm353_vm4, %v1019_v1, %v1021_v60 }
 0x441   : > { %v1025_v4 = vsel %vm353_vm4, %v1021_v60, %v1023_v43  ;;  %v2067_v43 = vcombine.high %v3483_v16, %v3483_v16 }
 0x442   : > { %1382 = vmatprep.subr.mxu1 %v1025_v4 }
 0x443   : > { %v1002_v56 = vpop.permute.xlu1 %1001  ;;  %1383 = vmatpush1.msra.mxu1 %v1024_v63 }
 0x444   : > { %v1000_v8 = vpop.permute.xlu0 %999 }
 0x445   : > { %v1004_v32 = vsel %vm384_vm3, %v1000_v8, %v1002_v56 }
 0x446   : > { %1384 = vmatprep.subr.mxu1 %v1004_v32  ;;  %v4217_v32 = vmul.f32 %v4034_v36, %v3510_v30  ;;  %v4237_v30 = vmul.f32 %v4034_v36, %v3522_v34 }
 0x447   : > { %v975_v59 = vpop.permute.xlu1 %974 }
 0x448   : > { %v998_v35 = vpop.permute.xlu0 %997 }
 0x449   : > { %v1003_v52 = vsel %vm384_vm3, %v998_v35, %v1000_v8 }
 0x44a   : > { %1385 = vmatpush1.msra.mxu1 %v1003_v52 }
 0x44b   : > { %v973_v2 = vpop.permute.xlu1 %972  ;;  %1386 = vmatprep.subr.mxu1 %v3810_v6 }
 0x44c   : > { %v977_v38 = vpop.permute.xlu0 %976  ;;  %1387 = vmatpush1.msra.mxu1 %v3808_v22  ;;  %v978_v41 = vsel %vm401_vm2, %v973_v2, %v975_v59 }
 0x44d   : > { %v979_v62 = vsel %vm401_vm2, %v975_v59, %v977_v38  ;;  %v4701_v38 = vld [vmem:[#allocation10_spill] sm:$0xff] }
 0x44e   : > { %1388 = vmatprep.subr.mxu1 %v979_v62 }
 0x44f   : > { %v956_v48 = vpop.permute.xlu1 %955  ;;  %1389 = vmatpush1.msra.mxu1 %v978_v41  ;;  %v4702_v41 = vld [vmem:[#allocation4_spill] sm:$0xff] }
 0x450   : > { %v954_v17 = vpop.permute.xlu0 %953 }
 0x451   : > { %v958_v55 = vsel %vm370_vm1, %v954_v17, %v956_v48 }
 0x452   : > { %1390 = vmatprep.subr.mxu1 %v958_v55 }
 0x453   : > { %v933_v15 = vpop.permute.xlu1 %932 }
 0x454   : > { %v952_v61 = vpop.permute.xlu0 %951 }
 0x455   : > { %v957_v57 = vsel %vm370_vm1, %v952_v61, %v954_v17  ;;  %v4703_v17 = vld [vmem:[#allocation6_spill] sm:$0xff] }
 0x456   : > { %1391 = vmatpush1.msra.mxu1 %v957_v57  ;;  %v4705_v57 = vld [vmem:[#allocation7_spill] sm:$0xff] }
 0x457   : > { %v931_v6 = vpop.permute.xlu1 %930 }
 0x458   : > { %v936_v12 = vsel %vm330_vm7, %v931_v6, %v933_v15  ;;  %v935_v22 = vpop.permute.xlu0 %934 }
 0x459   : > { %v937_v18 = vsel %vm330_vm7, %v933_v15, %v935_v22  ;;  %v4704_v15 = vld [vmem:[#allocation5_spill] sm:$0xff] }
 0x45a   : > { %1392 = vmatprep.subr.mxu1 %v937_v18 }
 0x45b   : > { %v917_v46 = vpop.permute.xlu1 %916  ;;  %1393 = vmatpush1.msra.mxu1 %v936_v12 }
 0x45c   : > { %v915_v40 = vpop.permute.xlu0 %914 }
 0x45d   : > { %v919_v39 = vsel %vm311_vm0, %v915_v40, %v917_v46 }
 0x45e   : > { %1394 = vmatprep.subr.mxu1 %v919_v39 }
 0x45f   : > { %v1917_v22 = vpop.permute.xlu1 %1916 }
 0x460   : > { %v913_v53 = vpop.permute.xlu0 %912 }
 0x461   : > { %v918_v21 = vsel %vm311_vm0, %v913_v53, %v915_v40 }
 0x462   : > { %1395 = vmatpush1.msra.mxu1 %v918_v21 }
 0x463   : > { %3264 = vmatmul.mubr.msk.f32.vlgmr.msra.gmra.mxu1 %vm542_vm8, %v3259_v50  ;;  %v1846_v46 = vpop.permute.xlu1 %1845 }
 0x464   : > { %2055 = vmatprep.mubr.f32.mxu1 %v4034_v36  ;;  %v1956_v12 = vpop.permute.xlu0 %1955 }
 0x468   : > { %v1896_v18 = vpop.permute.xlu0 %1895 }
 0x46c   : > { %v1867_v40 = vpop.permute.xlu0 %1866 }
 0x4cd   : > { %v4144_v49 = vpop.f32.mrf.mxu0 }
 0x4cf   : > { %v4146_v23 = vpop.f32.mrf.mxu0 }
 0x4ee   : > { %v1786_v10 = vpop.f32.mrf.mxu0 }
 0x4ef   : > { %v1787_v13 = vadd.f32 %v1786_v10, %v4116_v47 }
 0x4f0   : > { %v1788_v60 = vpop.f32.mrf.mxu0 }
 0x4f1   : > { %v1791_v14 = vmax.f32 %v1787_v13, 0.0  ;;  %v1789_v20 = vadd.f32 %v1788_v60, %v4116_v47 }
 0x4f3   : > { %1795 = vst [vmem:[#allocation2] sm:$0xf] %v1791_v14  ;;  %v1792_v1 = vmax.f32 %v1789_v20, 0.0 }
 0x4f5   : > { %1796 = vst [vmem:[#allocation2 + $0x18] sm:$0xf] %v1792_v1 }
 0x4fa   : > { %v4152_v4 = vld [vmem:[#allocation2] sm:$0xff] }
 0x4fb   : > { %1930 = vrot.lane.b32.xlu1 %v4152_v4, %s3400_s9  ;;  %1826 = vrot.lane.b32.xlu0 %v4152_v4, %s3402_s10  ;;  %2069 = vst [vmem:[#allocation2] sm:$0xf] %v3483_v16  ;;  %v1945_v47 = vmul.f32 %v4152_v4, %v3778_v9  ;;  %v1885_v56 = vmul.f32 %v4152_v4, %v3786_v11 }
 0x4fc   : > { %v4159_v63 = vld [vmem:[#allocation2 + $0x18] sm:$0xff]  ;;  %v1906_v8 = vmul.f32 %v4152_v4, %v3782_v3  ;;  %v1840_v16 = vmul.f32 %v4152_v4, %v3891_v24  ;;  %v1861_v9 = vmul.f32 %v4152_v4, %v3886_v25 }
 0x4fd   : > { %2070 = vst [vmem:[#allocation2 + $0x18] sm:$0xf] %v2067_v43  ;;  %v1946_v11 = vmul.f32 %v4159_v63, %v3902_v5  ;;  %v1907_v3 = vmul.f32 %v4159_v63, %v3907_v7  ;;  %v1886_v25 = vmul.f32 %v4159_v63, %v3922_v19  ;;  %v1841_v24 = vmul.f32 %v4159_v63, %v3879_v0  ;;  %v3271_v19 = vld [vmem:[%s4675_s3 + $0xc] sm:$0xf] }
 0x4fe   : > { %v1862_v5 = vmul.f32 %v4159_v63, %v3866_v58  ;;  %v1802_v7 = vmul.f32 %v4159_v63, %v3928_v28  ;;  %v1801_v0 = vmul.f32 %v4152_v4, %v3939_v42  ;;  %v1800_v58 = vmul.f32 %v4034_v36, %v3930_v31 }
 0x4ff   : > { %1951 = vrot.lane.b32.xlu1 %v1945_v47, %s3399_s8  ;;  %1932 = vrot.lane.b32.xlu0 %v4159_v63, %s3400_s9  ;;  %v4210_v28 = vmul.f32 %v4034_v36, %v3508_v29  ;;  %v4225_v31 = vpack.i.bf16 %v4034_v36, %v4034_v36  ;;  %v4233_v29 = vmul.f32 %v4034_v36, %v3534_v37  ;;  %v3320_v43 = vunpack.i.h.bf16 %v4120_v51 }
 0x500   : > { %v4245_v42 = vmul.f32 %v4034_v36, %v3552_v44 }
 0x502   : > { %v4255_v34 = vld [vmem:[#allocation2] sm:$0xff] }
 0x503   : > { %1891 = vrot.lane.b32.xlu1 %v1885_v56, %s3397_s6  ;;  %1912 = vrot.lane.b32.xlu0 %v1906_v8, %s3398_s7  ;;  %v2219_v37 = vmul.f32 %v4255_v34, %v3501_v26  ;;  %v2180_v44 = vmul.f32 %v4255_v34, %v3503_v27  ;;  %v2159_v35 = vmul.f32 %v4255_v34, %v3520_v33 }
 0x504   : > { %v4268_v59 = vld [vmem:[#allocation2 + $0x18] sm:$0xff]  ;;  %v2135_v52 = vmul.f32 %v4255_v34, %v3590_v54  ;;  %v2114_v62 = vmul.f32 %v4255_v34, %v4701_v38 }
 0x505   : > { %v2220_v2 = vmul.f32 %v4268_v59, %v3557_v45  ;;  %v2136_v48 = vmul.f32 %v4268_v59, %v4702_v41  ;;  %v2181_v55 = vmul.f32 %v4268_v59, %v4703_v17  ;;  %v2115_v61 = vmul.f32 %v4268_v59, %v4704_v15 }
 0x506   : > { %v2160_v6 = vmul.f32 %v4268_v59, %v4705_v57 }
 0x507   : > { %1847 = vrot.lane.b32.xlu1 %v1840_v16, %s3395_s26  ;;  %1868 = vrot.lane.b32.xlu0 %v1861_v9, %s3396_s30 }
 0x50b   : > { %1953 = vrot.lane.b32.xlu1 %v1946_v11, %s3399_s8  ;;  %1914 = vrot.lane.b32.xlu0 %v1907_v3, %s3398_s7 }
 0x50f   : > { %1828 = vrot.lane.b32.xlu1 %v4159_v63, %s3402_s10  ;;  %1824 = vrot.lane.b32.xlu0 %v4034_v36, %s3402_s10 }
 0x513   : > { %1893 = vrot.lane.b32.xlu1 %v1886_v25, %s3397_s6  ;;  %1849 = vrot.lane.b32.xlu0 %v1841_v24, %s3395_s26 }
 0x517   : > { %1870 = vrot.lane.b32.xlu1 %v1862_v5, %s3396_s30  ;;  %1810 = vrot.lane.b32.xlu0 %v1802_v7, %s3394_s25 }
 0x51b   : > { %1985 = vperm.xlu0 %3310, %v3271_v19   ;;  %1808 = vrot.lane.b32.xlu1 %v1801_v0, %s3394_s25 }
 0x51f   : > { %2229 = vrot.lane.b32.xlu0 %v4210_v28, %s3399_s8  ;;  %1806 = vrot.lane.b32.xlu1 %v1800_v58, %s3394_s25 }
 0x523   : > { %2419 = vrot.lane.b32.xlu0 %v4210_v28, %s3399_s8  ;;  %2190 = vrot.lane.b32.xlu1 %v4217_v32, %s3398_s7 }
 0x527   : > { %3322 = vrot.lane.b32.xlu0 %v4225_v31, %s3400_s9  ;;  %2380 = vrot.lane.b32.xlu1 %v4217_v32, %s3398_s7 }
 0x52b   : > { %2140 = vrot.lane.b32.xlu0 %v4233_v29, %s3396_s30  ;;  %2169 = vrot.lane.b32.xlu1 %v4237_v30, %s3397_s6 }
 0x52f   : > { %2119 = vrot.lane.b32.xlu0 %v4245_v42, %s3395_s26  ;;  %2359 = vrot.lane.b32.xlu1 %v4237_v30, %s3397_s6 }
 0x533   : > { %3327 = vrot.lane.b32.xlu0 %v4225_v31, %s3402_s10  ;;  %2330 = vrot.lane.b32.xlu1 %v4233_v29, %s3396_s30 }
 0x537   : > { %2204 = vrot.lane.b32.xlu0 %v4255_v34, %s3400_s9  ;;  %2309 = vrot.lane.b32.xlu1 %v4245_v42, %s3395_s26 }
 0x53b   : > { %2100 = vrot.lane.b32.xlu0 %v4255_v34, %s3402_s10  ;;  %2225 = vrot.lane.b32.xlu1 %v2219_v37, %s3399_s8 }
 0x53f   : > { %2186 = vrot.lane.b32.xlu0 %v2180_v44, %s3398_s7  ;;  %2206 = vrot.lane.b32.xlu1 %v4268_v59, %s3400_s9 }
 0x543   : > { %2165 = vrot.lane.b32.xlu0 %v2159_v35, %s3397_s6  ;;  %2102 = vrot.lane.b32.xlu1 %v4268_v59, %s3402_s10 }
 0x547   : > { %2142 = vrot.lane.b32.xlu0 %v2135_v52, %s3396_s30  ;;  %2227 = vrot.lane.b32.xlu1 %v2220_v2, %s3399_s8 }
 0x54b   : > { %2121 = vrot.lane.b32.xlu0 %v2114_v62, %s3395_s26  ;;  %2144 = vrot.lane.b32.xlu1 %v2136_v48, %s3396_s30  ;;  %v3270_v48 = vld [vmem:[%s4674_s2 + $0xc] sm:$0xf] }
 0x54f   : > { %2188 = vrot.lane.b32.xlu0 %v2181_v55, %s3398_s7  ;;  %2123 = vrot.lane.b32.xlu1 %v2115_v61, %s3395_s26 }
 0x553   : > { %2167 = vrot.lane.b32.xlu0 %v2160_v6, %s3397_s6 }
 0x56d   : > { %v1931_v39 = vpop.permute.xlu1 %1930  ;;  %v1827_v53 = vpop.permute.xlu0 %1826 }
 0x571   : > { %v1952_v50 = vpop.permute.xlu1 %1951  ;;  %v1933_v21 = vpop.permute.xlu0 %1932 }
 0x572   : > { %v1937_v8 = vsel %vm482_vm6, %v1933_v21, %v3320_v43  ;;  %v1936_v9 = vsel %vm482_vm6, %v1931_v39, %v1933_v21 }
 0x575   : > { %v1892_v10 = vpop.permute.xlu1 %1891  ;;  %v1913_v13 = vpop.permute.xlu0 %1912 }
 0x579   : > { %v1848_v60 = vpop.permute.xlu1 %1847  ;;  %v1869_v14 = vpop.permute.xlu0 %1868 }
 0x57a   : > { %v1872_v58 = vsel %vm401_vm2, %v1867_v40, %v1869_v14  ;;  %v1851_v35 = vsel %vm370_vm1, %v1846_v46, %v1848_v60 }
 0x57d   : > { %v1954_v20 = vpop.permute.xlu1 %1953  ;;  %v1915_v1 = vpop.permute.xlu0 %1914 }
 0x57e   : > { %v1958_v47 = vsel %vm294_vm5, %v1954_v20, %v1956_v12  ;;  %v1957_v56 = vsel %vm294_vm5, %v1952_v50, %v1954_v20  ;;  %v1919_v11 = vsel %vm353_vm4, %v1915_v1, %v1917_v22  ;;  %v1918_v25 = vsel %vm353_vm4, %v1913_v13, %v1915_v1 }
 0x57f   : > { %2005 = vmatprep.subr.mxu1 %v1958_v47 }
 0x580   : > { %2006 = vmatpush1.msra.mxu1 %v1957_v56 }
 0x581   : > { %v1829_v16 = vpop.permute.xlu1 %1828  ;;  %2007 = vmatprep.subr.mxu1 %v1937_v8  ;;  %v1825_v3 = vpop.permute.xlu0 %1824 }
 0x582   : > { %2008 = vmatpush1.msra.mxu1 %v1936_v9  ;;  %v1831_v52 = vsel %vm330_vm7, %v1827_v53, %v1829_v16  ;;  %v1830_v2 = vsel %vm330_vm7, %v1825_v3, %v1827_v53 }
 0x583   : > { %2009 = vmatprep.subr.mxu1 %v1919_v11 }
 0x584   : > { %2010 = vmatpush1.msra.mxu1 %v1918_v25 }
 0x585   : > { %v1894_v51 = vpop.permute.xlu1 %1893  ;;  %v1850_v7 = vpop.permute.xlu0 %1849 }
 0x586   : > { %v1898_v24 = vsel %vm384_vm3, %v1894_v51, %v1896_v18  ;;  %v1897_v5 = vsel %vm384_vm3, %v1892_v10, %v1894_v51  ;;  %v1852_v37 = vsel %vm370_vm1, %v1848_v60, %v1850_v7 }
 0x587   : > { %2011 = vmatprep.subr.mxu1 %v1898_v24 }
 0x588   : > { %2012 = vmatpush1.msra.mxu1 %v1897_v5 }
 0x589   : > { %v1871_v19 = vpop.permute.xlu1 %1870  ;;  %2013 = vmatprep.subr.mxu1 %v4159_v63  ;;  %v1811_v63 = vpop.permute.xlu0 %1810 }
 0x58a   : > { %2014 = vmatpush1.msra.mxu1 %v4152_v4  ;;  %v1873_v0 = vsel %vm401_vm2, %v1869_v14, %v1871_v19 }
 0x58b   : > { %2015 = vmatprep.subr.mxu1 %v1873_v0 }
 0x58c   : > { %2016 = vmatpush1.msra.mxu1 %v1872_v58 }
 0x58d   : > { %v1809_v44 = vpop.permute.xlu1 %1808  ;;  %2017 = vmatprep.subr.mxu1 %v1852_v37 }
 0x58e   : > { %2018 = vmatpush1.msra.mxu1 %v1851_v35  ;;  %v1813_v4 = vsel %vm311_vm0, %v1809_v44, %v1811_v63 }
 0x58f   : > { %2019 = vmatprep.subr.mxu1 %v1831_v52 }
 0x590   : > { %2020 = vmatpush1.msra.mxu1 %v1830_v2 }
 0x591   : > { %v1807_v62 = vpop.permute.xlu1 %1806  ;;  %2021 = vmatprep.subr.mxu1 %v1813_v4 }
 0x592   : > { %v1812_v55 = vsel %vm311_vm0, %v1807_v62, %v1809_v44 }
 0x593   : > { %2022 = vmatpush1.msra.mxu1 %v1812_v55 }
 0x594   : > { %3272 = vmatmul.mubr.msk.f32.vlgmr.msra.gmra.mxu1 %vm542_vm8, %v3270_v48 }
 0x595   : > { %v2191_v61 = vpop.permute.xlu1 %2190  ;;  %2586 = vmatprep.mubr.f32.mxu1 %v4034_v36 }
 0x596   : > { %v4323_v6 = vpop.permute.xlu0 %1985 }
 0x599   : > { %v4325_v12 = vpop.permute.xlu1 %2380 }
 0x59a   : > { %v2230_v22 = vpop.permute.xlu0 %2229 }
 0x59d   : > { %v2170_v18 = vpop.permute.xlu1 %2169 }
 0x59e   : > { %v4327_v46 = vpop.permute.xlu0 %2419 }
 0x5a1   : > { %v4329_v40 = vpop.permute.xlu1 %2359 }
 0x5a2   : > { %v4331_v39 = vpop.permute.xlu0 %3322 }
 0x5a3   : > { %v3324_v43 = vunpack.i.l.bf16 %v4331_v39 }
 0x5a5   : > { %v4333_v53 = vpop.permute.xlu1 %2330 }
 0x5a6   : > { %v2141_v50 = vpop.permute.xlu0 %2140 }
 0x5a9   : > { %v4335_v21 = vpop.permute.xlu1 %2309 }
 0x5aa   : > { %v2120_v10 = vpop.permute.xlu0 %2119 }
 0x5ad   : > { %v2226_v13 = vpop.permute.xlu1 %2225 }
 0x5ae   : > { %v4337_v60 = vpop.permute.xlu0 %3327 }
 0x5af   : > { %v3329_v62 = vunpack.i.l.bf16 %v4337_v60 }
 0x5b1   : > { %v2207_v14 = vpop.permute.xlu1 %2206 }
 0x5b2   : > { %v2205_v20 = vpop.permute.xlu0 %2204  ;;  %v2211_v11 = vsel %vm482_vm6, %v2207_v14, %v3324_v43 }
 0x5b3   : > { %v2210_v3 = vsel %vm482_vm6, %v2205_v20, %v2207_v14 }
 0x5b5   : > { %v2103_v1 = vpop.permute.xlu1 %2102 }
 0x5b6   : > { %v2101_v47 = vpop.permute.xlu0 %2100 }
 0x5b7   : > { %v2104_v48 = vsel %vm330_vm7, %v3329_v62, %v2101_v47  ;;  %v2105_v55 = vsel %vm330_vm7, %v2101_v47, %v2103_v1 }
 0x5b9   : > { %v2228_v56 = vpop.permute.xlu1 %2227 }
 0x5ba   : > { %v2231_v8 = vsel %vm294_vm5, %v2226_v13, %v2228_v56  ;;  %v2187_v16 = vpop.permute.xlu0 %2186  ;;  %v2232_v9 = vsel %vm294_vm5, %v2228_v56, %v2230_v22 }
 0x5bb   : > { %2536 = vmatprep.subr.mxu1 %v2232_v9 }
 0x5bc   : > { %2537 = vmatpush1.msra.mxu1 %v2231_v8 }
 0x5bd   : > { %2538 = vmatprep.subr.mxu1 %v2211_v11  ;;  %v2145_v0 = vpop.permute.xlu1 %2144 }
 0x5be   : > { %v2166_v25 = vpop.permute.xlu0 %2165  ;;  %2539 = vmatpush1.msra.mxu1 %v2210_v3 }
 0x5c1   : > { %v2124_v52 = vpop.permute.xlu1 %2123 }
 0x5c2   : > { %v2143_v51 = vpop.permute.xlu0 %2142 }
 0x5c3   : > { %v2147_v35 = vsel %vm401_vm2, %v2143_v51, %v2145_v0  ;;  %v2146_v2 = vsel %vm401_vm2, %v2141_v50, %v2143_v51 }
 0x5c6   : > { %v2122_v24 = vpop.permute.xlu0 %2121 }
 0x5c7   : > { %v2126_v63 = vsel %vm370_vm1, %v2122_v24, %v2124_v52  ;;  %v2125_v4 = vsel %vm370_vm1, %v2120_v10, %v2122_v24  ;;  %v4706_v24 = vld [vmem:[#allocation11_spill] sm:$0xff] }
 0x5ca   : > { %v2189_v5 = vpop.permute.xlu0 %2188 }
 0x5cb   : > { %v2192_v7 = vsel %vm353_vm4, %v2187_v16, %v2189_v5  ;;  %v2193_v19 = vsel %vm353_vm4, %v2189_v5, %v2191_v61  ;;  %v4357_v61 = vpop.f32.mrf.mxu1  ;;  %v2075_v5 = vmul.f32 %v4255_v34, %v4706_v24 }
 0x5cc   : > { %2540 = vmatprep.subr.mxu1 %v2193_v19 }
 0x5cd   : > { %2541 = vmatpush1.msra.mxu1 %v2192_v7  ;;  %v4359_v22 = vpop.f32.mrf.mxu1  ;;  %v4707_v7 = vld [vmem:[#allocation9_spill] sm:$0xff] }
 0x5ce   : > { %v2168_v58 = vpop.permute.xlu0 %2167  ;;  %v2076_v19 = vmul.f32 %v4268_v59, %v4707_v7 }
 0x5cf   : > { %v2171_v37 = vsel %vm384_vm3, %v2166_v25, %v2168_v58  ;;  %v2172_v44 = vsel %vm384_vm3, %v2168_v58, %v2170_v18 }
 0x5d0   : > { %2542 = vmatprep.subr.mxu1 %v2172_v44  ;;  %v3265_v44 = vld [vmem:[%s4675_s3 + $0x10] sm:$0xf] }
 0x5d1   : > { %2543 = vmatpush1.msra.mxu1 %v2171_v37  ;;  %v4708_v37 = vld [vmem:[#allocation8_spill] sm:$0xff] }
 0x5d2   : > { %2544 = vmatprep.subr.mxu1 %v4268_v59  ;;  %v4415_v59 = vmul.f32 %v4034_v36, %v4708_v37  ;;  %v3277_v36 = vld [vmem:[%s4675_s3 + $0x14] sm:$0xf] }
 0x5d3   : > { %2545 = vmatpush1.msra.mxu1 %v4255_v34 }
 0x5d4   : > { %2546 = vmatprep.subr.mxu1 %v2147_v35 }
 0x5d5   : > { %2547 = vmatpush1.msra.mxu1 %v2146_v2 }
 0x5d6   : > { %2548 = vmatprep.subr.mxu1 %v2126_v63 }
 0x5d7   : > { %2549 = vmatpush1.msra.mxu1 %v2125_v4 }
 0x5d8   : > { %2550 = vmatprep.subr.mxu1 %v2105_v55 }
 0x5d9   : > { %2551 = vmatpush1.msra.mxu1 %v2104_v48 }
 0x654   : > { %v2057_v18 = vpop.f32.mrf.mxu1 }
 0x655   : > { %v2058_v50 = vadd.f32 %v2057_v18, %v4323_v6 }
 0x656   : > { %v2059_v13 = vpop.f32.mrf.mxu1 }
 0x657   : > { %v2062_v14 = vmax.f32 %v2058_v50, 0.0  ;;  %v2060_v10 = vadd.f32 %v2059_v13, %v4323_v6 }
 0x659   : > { %v2255_v20 = vmax.f32 %v2062_v14, 0.0  ;;  %v2063_v43 = vmax.f32 %v2060_v10, 0.0 }
 0x65b   : > { %v2256_v56 = vmax.f32 %v2063_v43, 0.0  ;;  %2259 = vst [vmem:[#allocation2] sm:$0xf] %v2255_v20 }
 0x65d   : > { %2260 = vst [vmem:[#allocation2 + $0x18] sm:$0xf] %v2256_v56 }
 0x662   : > { %v4363_v8 = vld [vmem:[#allocation2] sm:$0xff] }
 0x663   : > { %2394 = vrot.lane.b32.xlu1 %v4363_v8, %s3400_s9  ;;  %2290 = vrot.lane.b32.xlu0 %v4363_v8, %s3402_s10  ;;  %v2409_v1 = vmul.f32 %v4363_v8, %v3501_v26  ;;  %v2370_v6 = vmul.f32 %v4363_v8, %v3503_v27  ;;  %v2325_v16 = vmul.f32 %v4363_v8, %v3590_v54 }
 0x664   : > { %v4371_v47 = vld [vmem:[#allocation2 + $0x18] sm:$0xff]  ;;  %v2349_v9 = vmul.f32 %v4363_v8, %v3520_v33  ;;  %v2304_v11 = vmul.f32 %v4363_v8, %v4701_v38  ;;  %v2265_v35 = vmul.f32 %v4363_v8, %v4706_v24 }
 0x665   : > { %v2371_v3 = vmul.f32 %v4371_v47, %v4703_v17  ;;  %v2410_v25 = vmul.f32 %v4371_v47, %v3557_v45  ;;  %v2350_v51 = vmul.f32 %v4371_v47, %v4705_v57  ;;  %v2326_v0 = vmul.f32 %v4371_v47, %v4702_v41 }
 0x666   : > { %v2266_v58 = vmul.f32 %v4371_v47, %v4707_v7  ;;  %v2305_v34 = vmul.f32 %v4371_v47, %v4704_v15 }
 0x667   : > { %2396 = vrot.lane.b32.xlu1 %v4371_v47, %s3400_s9  ;;  %2415 = vrot.lane.b32.xlu0 %v2409_v1, %s3399_s8 }
 0x66b   : > { %2376 = vrot.lane.b32.xlu1 %v2370_v6, %s3398_s7  ;;  %2332 = vrot.lane.b32.xlu0 %v2325_v16, %s3396_s30 }
 0x66f   : > { %2355 = vrot.lane.b32.xlu1 %v2349_v9, %s3397_s6  ;;  %2311 = vrot.lane.b32.xlu0 %v2304_v11, %s3395_s26 }
 0x673   : > { %2292 = vrot.lane.b32.xlu1 %v4371_v47, %s3402_s10  ;;  %2378 = vrot.lane.b32.xlu0 %v2371_v3, %s3398_s7  ;;  %v3330_v3 = vunpack.i.h.bf16 %v4337_v60  ;;  %v3274_v60 = vld [vmem:[%s4674_s2 + $0x1c] sm:$0xf] }
 0x677   : > { %2417 = vrot.lane.b32.xlu1 %v2410_v25, %s3399_s8  ;;  %2357 = vrot.lane.b32.xlu0 %v2350_v51, %s3397_s6 }
 0x67b   : > { %2082 = vrot.lane.b32.xlu1 %v2075_v5, %s3394_s25  ;;  %2084 = vrot.lane.b32.xlu0 %v2076_v19, %s3394_s25 }
 0x67f   : > { %2334 = vrot.lane.b32.xlu1 %v2326_v0, %s3396_s30  ;;  %2274 = vrot.lane.b32.xlu0 %v2266_v58, %s3394_s25  ;;  %v3273_v0 = vld [vmem:[%s4674_s2 + $0x18] sm:$0xf] }
 0x683   : > { %2313 = vrot.lane.b32.xlu1 %v2305_v34, %s3395_s26  ;;  %2270 = vrot.lane.b32.xlu0 %v4415_v59, %s3394_s25  ;;  %v3383_v34 = vld [vmem:[#allocation2 + $0x10] sm:$0xff] }
 0x687   : > { %1439 = vperm.xlu0 %3310, %v3265_v44   ;;  %2272 = vrot.lane.b32.xlu1 %v2265_v35, %s3394_s25 }
 0x68b   : > { %2776 = vrot.lane.b32.xlu0 %v4210_v28, %s3399_s8  ;;  %2080 = vrot.lane.b32.xlu1 %v4415_v59, %s3394_s25 }
 0x68f   : > { %2976 = vrot.lane.b32.xlu0 %v4210_v28, %s3399_s8  ;;  %2597 = vperm.xlu1 %3331, %v3277_v36   ;;  %v1431_v36 = vadd.f32 %v4357_v61, %v4144_v49 }
 0x693   : > { %3333 = vrot.lane.b32.xlu0 %v4225_v31, %s3400_s9  ;;  %2737 = vrot.lane.b32.xlu1 %v4217_v32, %s3398_s7 }
 0x697   : > { %2687 = vrot.lane.b32.xlu0 %v4233_v29, %s3396_s30  ;;  %2937 = vrot.lane.b32.xlu1 %v4217_v32, %s3398_s7 }
 0x69b   : > { %2666 = vrot.lane.b32.xlu0 %v4245_v42, %s3395_s26  ;;  %2716 = vrot.lane.b32.xlu1 %v4237_v30, %s3397_s6 }
 0x69f   : > { %2916 = vrot.lane.b32.xlu1 %v4237_v30, %s3397_s6  ;;  %3338 = vrot.lane.b32.xlu0 %v4225_v31, %s3402_s10  ;;  %v3325_v31 = vunpack.i.h.bf16 %v4331_v39 }
 0x6a3   : > { %2887 = vrot.lane.b32.xlu1 %v4233_v29, %s3396_s30 }
 0x6a7   : > { %2866 = vrot.lane.b32.xlu1 %v4245_v42, %s3395_s26 }
 0x6d5   : > { %v2395_v28 = vpop.permute.xlu1 %2394  ;;  %v2291_v32 = vpop.permute.xlu0 %2290 }
 0x6d9   : > { %v2397_v52 = vpop.permute.xlu1 %2396  ;;  %v2416_v2 = vpop.permute.xlu0 %2415 }
 0x6da   : > { %v2401_v42 = vsel %vm482_vm6, %v2397_v52, %v3325_v31  ;;  %v2400_v14 = vsel %vm482_vm6, %v2395_v28, %v2397_v52 }
 0x6dd   : > { %v2377_v63 = vpop.permute.xlu1 %2376  ;;  %v2333_v4 = vpop.permute.xlu0 %2332 }
 0x6de   : > { %v2336_v9 = vsel %vm401_vm2, %v4333_v53, %v2333_v4 }
 0x6e1   : > { %v2356_v62 = vpop.permute.xlu1 %2355  ;;  %v2312_v48 = vpop.permute.xlu0 %2311 }
 0x6e2   : > { %v2315_v25 = vsel %vm370_vm1, %v4335_v21, %v2312_v48 }
 0x6e5   : > { %v2293_v55 = vpop.permute.xlu1 %2292  ;;  %v2379_v18 = vpop.permute.xlu0 %2378 }
 0x6e6   : > { %v2383_v43 = vsel %vm353_vm4, %v2379_v18, %v4325_v12  ;;  %v2382_v56 = vsel %vm353_vm4, %v2377_v63, %v2379_v18  ;;  %v1433_v63 = vadd.f32 %v4359_v22, %v4146_v23 }
 0x6e9   : > { %v2418_v30 = vpop.permute.xlu1 %2417  ;;  %v2358_v50 = vpop.permute.xlu0 %2357 }
 0x6ea   : > { %v2421_v13 = vsel %vm294_vm5, %v2416_v2, %v2418_v30  ;;  %v2422_v29 = vsel %vm294_vm5, %v2418_v30, %v4327_v46  ;;  %v2362_v46 = vsel %vm384_vm3, %v2358_v50, %v4329_v40  ;;  %v2361_v1 = vsel %vm384_vm3, %v2356_v62, %v2358_v50 }
 0x6eb   : > { %2462 = vmatprep.subr.mxu0 %v2422_v29 }
 0x6ec   : > { %2463 = vmatpush1.msra.mxu0 %v2421_v13 }
 0x6ed   : > { %v2083_v10 = vpop.permute.xlu1 %2082  ;;  %v2085_v20 = vpop.permute.xlu0 %2084  ;;  %2464 = vmatprep.subr.mxu0 %v2401_v42 }
 0x6ee   : > { %2465 = vmatpush1.msra.mxu0 %v2400_v14  ;;  %v2087_v39 = vsel %vm311_vm0, %v2083_v10, %v2085_v20 }
 0x6ef   : > { %2466 = vmatprep.subr.mxu0 %v2383_v43  ;;  %2552 = vmatprep.subr.mxu1 %v2087_v39 }
 0x6f0   : > { %2467 = vmatpush1.msra.mxu0 %v2382_v56 }
 0x6f1   : > { %v2335_v6 = vpop.permute.xlu1 %2334  ;;  %2468 = vmatprep.subr.mxu0 %v2362_v46  ;;  %v2275_v16 = vpop.permute.xlu0 %2274 }
 0x6f2   : > { %2469 = vmatpush1.msra.mxu0 %v2361_v1  ;;  %v2337_v12 = vsel %vm401_vm2, %v2333_v4, %v2335_v6 }
 0x6f3   : > { %2470 = vmatprep.subr.mxu0 %v4371_v47  ;;  %v2295_v47 = vsel %vm330_vm7, %v2291_v32, %v2293_v55 }
 0x6f4   : > { %2471 = vmatpush1.msra.mxu0 %v4363_v8  ;;  %v2294_v8 = vsel %vm330_vm7, %v3330_v3, %v2291_v32 }
 0x6f5   : > { %v2314_v11 = vpop.permute.xlu1 %2313  ;;  %2472 = vmatprep.subr.mxu0 %v2337_v12  ;;  %v2271_v51 = vpop.permute.xlu0 %2270 }
 0x6f6   : > { %2473 = vmatpush1.msra.mxu0 %v2336_v9  ;;  %v2316_v40 = vsel %vm370_vm1, %v2312_v48, %v2314_v11 }
 0x6f7   : > { %2474 = vmatprep.subr.mxu0 %v2316_v40 }
 0x6f8   : > { %2475 = vmatpush1.msra.mxu0 %v2315_v25 }
 0x6f9   : > { %v2273_v5 = vpop.permute.xlu1 %2272  ;;  %2476 = vmatprep.subr.mxu0 %v2295_v47 }
 0x6fa   : > { %v2276_v53 = vsel %vm311_vm0, %v2271_v51, %v2273_v5  ;;  %2477 = vmatpush1.msra.mxu0 %v2294_v8  ;;  %v2277_v19 = vsel %vm311_vm0, %v2273_v5, %v2275_v16 }
 0x6fb   : > { %2478 = vmatprep.subr.mxu0 %v2277_v19 }
 0x6fc   : > { %2479 = vmatpush1.msra.mxu0 %v2276_v53 }
 0x6fd   : > { %v2081_v21 = vpop.permute.xlu1 %2080  ;;  %3275 = vmatmul.mubr.msk.f32.vlgmr.msra.gmra.mxu0 %vm542_vm8, %v3274_v60 }
 0x6fe   : > { %v2086_v58 = vsel %vm311_vm0, %v2081_v21, %v2083_v10  ;;  %3069 = vmatprep.mubr.f32.mxu0 %v3383_v34 }
 0x6ff   : > { %2553 = vmatpush1.msra.mxu1 %v2086_v58 }
 0x700   : > { %3276 = vmatmul.mubr.msk.f32.vlgmr.msra.gmra.mxu1 %vm542_vm8, %v3273_v0 }
 0x701   : > { %3143 = vmatprep.mubr.f32.mxu1 %v3383_v34 }
 0x702   : > { %v1440_v44 = vpop.permute.xlu0 %1439 }
 0x703   : > { %v1442_v4 = vadd.f32 %v1440_v44, %v1431_v36  ;;  %v1443_v55 = vadd.f32 %v1440_v44, %v1433_v63 }
 0x705   : > { %v3281_v50 = vmul.f32 -1.442695, %v1442_v4  ;;  %v3282_v13 = vmul.f32 -1.442695, %v1443_v55 }
 0x706   : > { %v2777_v58 = vpop.permute.xlu0 %2776 }
 0x70a   : > { %v2598_v28 = vpop.permute.xlu1 %2597  ;;  %v4597_v34 = vpop.permute.xlu0 %2976 }
 0x7bd   : > { %v2514_v37 = vpop.f32.mrf.mxu0 }
 0x7bf   : > { %v2516_v52 = vpop.f32.mrf.mxu0 }
 0x7c0   : > { %v2588_v35 = vpop.f32.mrf.mxu1 }
 0x7c1   : > { %v2589_v32 = vadd.f32 %v2588_v35, %v2514_v37 }
 0x7c2   : > { %v2590_v2 = vpop.f32.mrf.mxu1 }
 0x7c3   : > { %v2600_v62 = vadd.f32 %v2598_v28, %v2589_v32  ;;  %v2591_v48 = vadd.f32 %v2590_v2, %v2516_v52 }
 0x7c5   : > { %v3278_v18 = vmul.f32 -1.442695, %v2600_v62  ;;  %v2601_v30 = vadd.f32 %v2598_v28, %v2591_v48 }
 0x7c7   : > { %3366 = vpow2.f32 %v3278_v18  ;;  %v3279_v31 = vmul.f32 -1.442695, %v2601_v30 }
 0x7c9   : > { %3368 = vpow2.f32 %v3279_v31 }
 0x7ca   : > { %3370 = vpow2.f32 %v3281_v50 }
 0x7cb   : > { %3372 = vpow2.f32 %v3282_v13 }
 0x7d4   : > { %v3367_v49 = vpop.eup %3366 }
 0x7d5   : > { %v2608_v61 = vadd.f32 1.0, %v3367_v49 }
 0x7d6   : > { %v3369_v29 = vpop.eup %3368 }
 0x7d7   : > { %3374 = vrcp.f32 %v2608_v61  ;;  %v2609_v42 = vadd.f32 1.0, %v3369_v29  ;;  %v3371_v14 = vpop.eup %3370 }
 0x7d8   : > { %v3373_v23 = vpop.eup %3372  ;;  %v2808_v22 = vadd.f32 1.0, %v3371_v14 }
 0x7d9   : > { %3376 = vrcp.f32 %v2609_v42  ;;  %v2809_v10 = vadd.f32 1.0, %v3373_v23 }
 0x7da   : > { %3378 = vrcp.f32 %v2808_v22 }
 0x7db   : > { %3380 = vrcp.f32 %v2809_v10 }
 0x7e4   : > { %v3375_v20 = vpop.eup %3374 }
 0x7e5   : > { %2616 = vst [vmem:[#allocation2] sm:$0xf] %v3375_v20 }
 0x7e6   : > { %v3377_v43 = vpop.eup %3376 }
 0x7e7   : > { %2617 = vst [vmem:[#allocation2 + $0x18] sm:$0xf] %v3377_v43  ;;  %v3379_v39 = vpop.eup %3378 }
 0x7e8   : > { %v3381_v1 = vpop.eup %3380 }
 0x7ec   : > { %v4494_v56 = vld [vmem:[#allocation2] sm:$0xff] }
 0x7ed   : > { %2751 = vrot.lane.b32.xlu0 %v4494_v56, %s3400_s9  ;;  %v2766_v46 = vmul.f32 %v4494_v56, %v3501_v26  ;;  %2816 = vst [vmem:[#allocation2] sm:$0xf] %v3379_v39  ;;  %v2727_v16 = vmul.f32 %v4494_v56, %v3503_v27  ;;  %v2706_v12 = vmul.f32 %v4494_v56, %v3520_v33 }
 0x7ee   : > { %v4500_v6 = vld [vmem:[#allocation2 + $0x18] sm:$0xff]  ;;  %v2682_v11 = vmul.f32 %v4494_v56, %v3590_v54  ;;  %v2661_v3 = vmul.f32 %v4494_v56, %v4701_v38 }
 0x7ef   : > { %2772 = vrot.lane.b32.xlu1 %v2766_v46, %s3399_s8  ;;  %2817 = vst [vmem:[#allocation2 + $0x18] sm:$0xf] %v3381_v1  ;;  %v2767_v9 = vmul.f32 %v4500_v6, %v3557_v45  ;;  %v2683_v40 = vmul.f32 %v4500_v6, %v4702_v41  ;;  %v2662_v25 = vmul.f32 %v4500_v6, %v4704_v15 }
 0x7f0   : > { %v2728_v47 = vmul.f32 %v4500_v6, %v4703_v17  ;;  %v2707_v51 = vmul.f32 %v4500_v6, %v4705_v57 }
 0x7f1   : > { %2647 = vrot.lane.b32.xlu0 %v4494_v56, %s3402_s10 }
 0x7f3   : > { %2753 = vrot.lane.b32.xlu1 %v4500_v6, %s3400_s9 }
 0x7f4   : > { %v4533_v8 = vld [vmem:[#allocation2] sm:$0xff] }
 0x7f5   : > { %2733 = vrot.lane.b32.xlu0 %v2727_v16, %s3398_s7  ;;  %v2927_v53 = vmul.f32 %v4533_v8, %v3503_v27  ;;  %v2966_v19 = vmul.f32 %v4533_v8, %v3501_v26  ;;  %v2906_v60 = vmul.f32 %v4533_v8, %v3520_v33  ;;  %v2882_v21 = vmul.f32 %v4533_v8, %v3590_v54 }
 0x7f6   : > { %v4540_v5 = vld [vmem:[#allocation2 + $0x18] sm:$0xff]  ;;  %v2861_v27 = vmul.f32 %v4533_v8, %v4701_v38  ;;  %v2622_v54 = vmul.f32 %v4494_v56, %v4706_v24 }
 0x7f7   : > { %2649 = vrot.lane.b32.xlu1 %v4500_v6, %s3402_s10  ;;  %v2967_v26 = vmul.f32 %v4540_v5, %v3557_v45  ;;  %v2928_v33 = vmul.f32 %v4540_v5, %v4703_v17  ;;  %v2907_v38 = vmul.f32 %v4540_v5, %v4705_v57  ;;  %v2883_v45 = vmul.f32 %v4540_v5, %v4702_v41 }
 0x7f8   : > { %v2623_v17 = vmul.f32 %v4500_v6, %v4707_v7  ;;  %v2862_v0 = vmul.f32 %v4540_v5, %v4704_v15  ;;  %v2823_v57 = vmul.f32 %v4540_v5, %v4707_v7  ;;  %v2822_v41 = vmul.f32 %v4533_v8, %v4706_v24  ;;  %v3286_v15 = vld [vmem:[%s4675_s3 + $0x18] sm:$0xf]  ;;  %v2738_v7 = vpop.permute.xlu1 %2737  ;;  %v4601_v24 = vpop.permute.xlu0 %3333 }
 0x7f9   : > { %2712 = vrot.lane.b32.xlu0 %v2706_v12, %s3397_s6  ;;  %v3335_v50 = vunpack.i.l.bf16 %v4601_v24 }
 0x7fb   : > { %2774 = vrot.lane.b32.xlu1 %v2767_v9, %s3399_s8 }
 0x7fc   : > { %v4599_v37 = vpop.permute.xlu1 %2937  ;;  %v2688_v35 = vpop.permute.xlu0 %2687 }
 0x7fd   : > { %2689 = vrot.lane.b32.xlu0 %v2682_v11, %s3396_s30 }
 0x7ff   : > { %2691 = vrot.lane.b32.xlu1 %v2683_v40, %s3396_s30 }
 0x800   : > { %v2717_v44 = vpop.permute.xlu1 %2716  ;;  %v2667_v28 = vpop.permute.xlu0 %2666 }
 0x801   : > { %2668 = vrot.lane.b32.xlu0 %v2661_v3, %s3395_s26 }
 0x803   : > { %2670 = vrot.lane.b32.xlu1 %v2662_v25, %s3395_s26 }
 0x804   : > { %v4603_v36 = vpop.permute.xlu1 %2916 }
 0x805   : > { %2735 = vrot.lane.b32.xlu0 %v2728_v47, %s3398_s7 }
 0x807   : > { %2951 = vrot.lane.b32.xlu1 %v4533_v8, %s3400_s9 }
 0x808   : > { %v4605_v32 = vpop.permute.xlu1 %2887 }
 0x809   : > { %2714 = vrot.lane.b32.xlu0 %v2707_v51, %s3397_s6 }
 0x80b   : > { %2953 = vrot.lane.b32.xlu1 %v4540_v5, %s3400_s9 }
 0x80c   : > { %v4609_v52 = vpop.permute.xlu1 %2866 }
 0x80d   : > { %2847 = vrot.lane.b32.xlu0 %v4533_v8, %s3402_s10 }
 0x80f   : > { %2933 = vrot.lane.b32.xlu1 %v2927_v53, %s3398_s7 }
 0x811   : > { %2972 = vrot.lane.b32.xlu0 %v2966_v19, %s3399_s8 }
 0x813   : > { %2912 = vrot.lane.b32.xlu1 %v2906_v60, %s3397_s6 }
 0x815   : > { %2889 = vrot.lane.b32.xlu0 %v2882_v21, %s3396_s30 }
 0x817   : > { %2849 = vrot.lane.b32.xlu1 %v4540_v5, %s3402_s10 }
 0x819   : > { %2868 = vrot.lane.b32.xlu0 %v2861_v27, %s3395_s26 }
 0x81b   : > { %2974 = vrot.lane.b32.xlu1 %v2967_v26, %s3399_s8  ;;  %v3336_v26 = vunpack.i.h.bf16 %v4601_v24 }
 0x81d   : > { %2935 = vrot.lane.b32.xlu0 %v2928_v33, %s3398_s7 }
 0x81f   : > { %2629 = vrot.lane.b32.xlu1 %v2622_v54, %s3394_s25 }
 0x821   : > { %2914 = vrot.lane.b32.xlu0 %v2907_v38, %s3397_s6 }
 0x823   : > { %2891 = vrot.lane.b32.xlu1 %v2883_v45, %s3396_s30 }
 0x825   : > { %2631 = vrot.lane.b32.xlu0 %v2623_v17, %s3394_s25 }
 0x827   : > { %2870 = vrot.lane.b32.xlu1 %v2862_v0, %s3395_s26 }
 0x829   : > { %2831 = vrot.lane.b32.xlu0 %v2823_v57, %s3394_s25 }
 0x82b   : > { %2829 = vrot.lane.b32.xlu1 %v2822_v41, %s3394_s25 }
 0x82d   : > { %2827 = vrot.lane.b32.xlu0 %v4415_v59, %s3394_s25 }
 0x82f   : > { %2627 = vrot.lane.b32.xlu1 %v4415_v59, %s3394_s25  ;;  %v4607_v59 = vpop.permute.xlu0 %3338 }
 0x830   : > { %v3340_v25 = vunpack.i.l.bf16 %v4607_v59 }
 0x833   : > { %3154 = vperm.xlu1 %3331, %v3286_v15  }
 0x85f   : > { %v2752_v2 = vpop.permute.xlu0 %2751 }
 0x861   : > { %v2773_v63 = vpop.permute.xlu1 %2772 }
 0x863   : > { %v2648_v4 = vpop.permute.xlu0 %2647 }
 0x865   : > { %v2754_v62 = vpop.permute.xlu1 %2753 }
 0x866   : > { %v2758_v61 = vsel %vm482_vm6, %v2754_v62, %v3335_v50  ;;  %v2757_v29 = vsel %vm482_vm6, %v2752_v2, %v2754_v62  ;;  %v3341_v2 = vunpack.i.h.bf16 %v4607_v59  ;;  %v3283_v59 = vld [vmem:[%s4674_s2 + $0x24] sm:$0xf] }
 0x867   : > { %v2734_v48 = vpop.permute.xlu0 %2733 }
 0x869   : > { %v2650_v55 = vpop.permute.xlu1 %2649 }
 0x86b   : > { %v2713_v18 = vpop.permute.xlu0 %2712 }
 0x86d   : > { %v2775_v30 = vpop.permute.xlu1 %2774 }
 0x86e   : > { %v2778_v31 = vsel %vm294_vm5, %v2773_v63, %v2775_v30  ;;  %v2779_v13 = vsel %vm294_vm5, %v2775_v30, %v2777_v58 }
 0x86f   : > { %3093 = vmatprep.subr.mxu1 %v2779_v13  ;;  %v2690_v49 = vpop.permute.xlu0 %2689 }
 0x870   : > { %3094 = vmatpush1.msra.mxu1 %v2778_v31  ;;  %v2693_v11 = vsel %vm401_vm2, %v2688_v35, %v2690_v49 }
 0x871   : > { %3095 = vmatprep.subr.mxu1 %v2758_v61  ;;  %v2692_v42 = vpop.permute.xlu1 %2691 }
 0x872   : > { %3096 = vmatpush1.msra.mxu1 %v2757_v29  ;;  %v2694_v9 = vsel %vm401_vm2, %v2690_v49, %v2692_v42 }
 0x873   : > { %v2669_v14 = vpop.permute.xlu0 %2668 }
 0x874   : > { %v2672_v47 = vsel %vm370_vm1, %v2667_v28, %v2669_v14 }
 0x875   : > { %v2671_v23 = vpop.permute.xlu1 %2670 }
 0x876   : > { %v2673_v3 = vsel %vm370_vm1, %v2669_v14, %v2671_v23 }
 0x877   : > { %v2736_v22 = vpop.permute.xlu0 %2735 }
 0x878   : > { %v2739_v10 = vsel %vm353_vm4, %v2734_v48, %v2736_v22  ;;  %v2740_v20 = vsel %vm353_vm4, %v2736_v22, %v2738_v7 }
 0x879   : > { %3097 = vmatprep.subr.mxu1 %v2740_v20  ;;  %v2952_v43 = vpop.permute.xlu1 %2951 }
 0x87a   : > { %3098 = vmatpush1.msra.mxu1 %v2739_v10 }
 0x87b   : > { %v2715_v39 = vpop.permute.xlu0 %2714 }
 0x87c   : > { %v2718_v46 = vsel %vm384_vm3, %v2713_v18, %v2715_v39  ;;  %v2719_v1 = vsel %vm384_vm3, %v2715_v39, %v2717_v44  ;;  %v3280_v18 = vld [vmem:[%s4674_s2 + $0x20] sm:$0xf] }
 0x87d   : > { %3099 = vmatprep.subr.mxu1 %v2719_v1  ;;  %v2954_v16 = vpop.permute.xlu1 %2953 }
 0x87e   : > { %3100 = vmatpush1.msra.mxu1 %v2718_v46  ;;  %v2958_v45 = vsel %vm482_vm6, %v2954_v16, %v3336_v26  ;;  %v2957_v17 = vsel %vm482_vm6, %v2952_v43, %v2954_v16  ;;  %v3384_v46 = vld [vmem:[%s3468_s29] sm:$0xff] }
 0x87f   : > { %3101 = vmatprep.subr.mxu1 %v4500_v6  ;;  %v2848_v12 = vpop.permute.xlu0 %2847  ;;  %v2652_v6 = vsel %vm330_vm7, %v2648_v4, %v2650_v55 }
 0x880   : > { %3102 = vmatpush1.msra.mxu1 %v4494_v56  ;;  %v2651_v56 = vsel %vm330_vm7, %v3340_v25, %v2648_v4  ;;  %v2851_v4 = vsel %vm330_vm7, %v3341_v2, %v2848_v12 }
 0x881   : > { %3103 = vmatprep.subr.mxu1 %v2694_v9  ;;  %v2934_v40 = vpop.permute.xlu1 %2933 }
 0x882   : > { %3104 = vmatpush1.msra.mxu1 %v2693_v11 }
 0x883   : > { %3105 = vmatprep.subr.mxu1 %v2673_v3  ;;  %v2973_v51 = vpop.permute.xlu0 %2972 }
 0x884   : > { %3106 = vmatpush1.msra.mxu1 %v2672_v47 }
 0x885   : > { %3107 = vmatprep.subr.mxu1 %v2652_v6  ;;  %v2913_v53 = vpop.permute.xlu1 %2912 }
 0x886   : > { %3108 = vmatpush1.msra.mxu1 %v2651_v56 }
 0x887   : > { %v2890_v19 = vpop.permute.xlu0 %2889 }
 0x888   : > { %v2893_v35 = vsel %vm401_vm2, %v4605_v32, %v2890_v19 }
 0x889   : > { %v2850_v60 = vpop.permute.xlu1 %2849 }
 0x88b   : > { %v2869_v21 = vpop.permute.xlu0 %2868 }
 0x88d   : > { %v2975_v27 = vpop.permute.xlu1 %2974 }
 0x88e   : > { %v2978_v33 = vsel %vm294_vm5, %v2973_v51, %v2975_v27  ;;  %v2979_v54 = vsel %vm294_vm5, %v2975_v27, %v4597_v34 }
 0x88f   : > { %3019 = vmatprep.subr.mxu0 %v2979_v54  ;;  %v2936_v38 = vpop.permute.xlu0 %2935 }
 0x890   : > { %3020 = vmatpush1.msra.mxu0 %v2978_v33  ;;  %v2940_v57 = vsel %vm353_vm4, %v2936_v38, %v4599_v37  ;;  %v2939_v41 = vsel %vm353_vm4, %v2934_v40, %v2936_v38 }
 0x891   : > { %3021 = vmatprep.subr.mxu0 %v2958_v45  ;;  %v2630_v0 = vpop.permute.xlu1 %2629 }
 0x892   : > { %3022 = vmatpush1.msra.mxu0 %v2957_v17 }
 0x893   : > { %3023 = vmatprep.subr.mxu0 %v2940_v57  ;;  %v2915_v15 = vpop.permute.xlu0 %2914 }
 0x894   : > { %v2918_v58 = vsel %vm384_vm3, %v2913_v53, %v2915_v15  ;;  %3024 = vmatpush1.msra.mxu0 %v2939_v41  ;;  %v2919_v7 = vsel %vm384_vm3, %v2915_v15, %v4603_v36 }
 0x895   : > { %3025 = vmatprep.subr.mxu0 %v2919_v7  ;;  %v2892_v34 = vpop.permute.xlu1 %2891 }
 0x896   : > { %3026 = vmatpush1.msra.mxu0 %v2918_v58  ;;  %v2894_v37 = vsel %vm401_vm2, %v2890_v19, %v2892_v34 }
 0x897   : > { %3027 = vmatprep.subr.mxu0 %v4540_v5  ;;  %v2632_v24 = vpop.permute.xlu0 %2631  ;;  %v2872_v5 = vsel %vm370_vm1, %v4609_v52, %v2869_v21 }
 0x898   : > { %3028 = vmatpush1.msra.mxu0 %v4533_v8  ;;  %v2634_v44 = vsel %vm311_vm0, %v2630_v0, %v2632_v24  ;;  %v2852_v8 = vsel %vm330_vm7, %v2848_v12, %v2850_v60 }
 0x899   : > { %3029 = vmatprep.subr.mxu0 %v2894_v37  ;;  %3109 = vmatprep.subr.mxu1 %v2634_v44  ;;  %v2871_v28 = vpop.permute.xlu1 %2870 }
 0x89a   : > { %3030 = vmatpush1.msra.mxu0 %v2893_v35  ;;  %v2873_v36 = vsel %vm370_vm1, %v2869_v21, %v2871_v28 }
 0x89b   : > { %v2832_v63 = vpop.permute.xlu0 %2831  ;;  %3031 = vmatprep.subr.mxu0 %v2873_v36 }
 0x89c   : > { %3032 = vmatpush1.msra.mxu0 %v2872_v5 }
 0x89d   : > { %3033 = vmatprep.subr.mxu0 %v2852_v8  ;;  %v2830_v32 = vpop.permute.xlu1 %2829 }
 0x89e   : > { %3034 = vmatpush1.msra.mxu0 %v2851_v4  ;;  %v2834_v62 = vsel %vm311_vm0, %v2830_v32, %v2832_v63 }
 0x89f   : > { %v2828_v48 = vpop.permute.xlu0 %2827  ;;  %3035 = vmatprep.subr.mxu0 %v2834_v62 }
 0x8a0   : > { %v2833_v52 = vsel %vm311_vm0, %v2828_v48, %v2830_v32 }
 0x8a1   : > { %3036 = vmatpush1.msra.mxu0 %v2833_v52  ;;  %v2628_v55 = vpop.permute.xlu1 %2627 }
 0x8a2   : > { %v2633_v30 = vsel %vm311_vm0, %v2628_v55, %v2630_v0  ;;  %3284 = vmatmul.mubr.msk.f32.vlgmr.msra.gmra.mxu0 %vm542_vm8, %v3283_v59 }
 0x8a3   : > { %3110 = vmatpush1.msra.mxu1 %v2633_v30 }
 0x8a4   : > { %3285 = vmatmul.mubr.msk.f32.vlgmr.msra.gmra.mxu1 %vm542_vm8, %v3280_v18 }
 0x8ae   : > { %v3155_v13 = vpop.permute.xlu1 %3154 }
 0x962   : > { %v3071_v50 = vpop.f32.mrf.mxu0 }
 0x964   : > { %v3145_v31 = vpop.f32.mrf.mxu1  ;;  %v3073_v61 = vpop.f32.mrf.mxu0 }
 0x965   : > { %v3146_v49 = vadd.f32 %v3145_v31, %v3071_v50 }
 0x966   : > { %v3147_v29 = vpop.f32.mrf.mxu1 }
 0x967   : > { %v3157_v42 = vadd.f32 %v3155_v13, %v3146_v49  ;;  %v3148_v14 = vadd.f32 %v3147_v29, %v3073_v61 }
 0x969   : > { %v3161_v23 = vmul.f32 0.1, %v3157_v42  ;;  %v3158_v22 = vadd.f32 %v3155_v13, %v3148_v14  ;;  %vm3159_vm9 = vcmp.lt.f32.partialorder %v3157_v42, 0.9 }
 0x96b   : > { %vm3160_vm10 = vcmp.lt.f32.partialorder %v3158_v22, 0.9  ;;  %v3162_v10 = vmul.f32 0.1, %v3158_v22  ;;  %v3163_v20 = vsel %vm3159_vm9, 0.0, %v3161_v23 }
 0x96d   : > { %v3164_v43 = vsel %vm3160_vm10, 0.0, %v3162_v10 }
 0x96e   : > { %v3167_v39 = vcombine.low %v3163_v20, %v3164_v43 }
 0x970   : > { %v3169_v1 = vadd.f32 %v3384_v46, %v3167_v39 }
 0x972   : > { %3170 = vst [vmem:[%s244_s19] sm:$0xff] %v3169_v1 }
 0x973 PF: > { %s15_s18 = sadd.s32 1, %s3391_s18  }
 0x974   : > { %p12_p4 = scmp.ge.s32.totalorder %s15_s18, 4  }
 0x976   :  { %14 = sbr.rel (!%p12_p4) target bundleno = 1 (0x1), region = 91 }

</bundles_post_ra>
